<compile_context>
chip_gen: v7x
topology: tpu7x:2x2x1
jax: 0.10.0
libtpu: 0.0.40
codegen_flags: <defaults>
</compile_context>

<pallas_src>
import functools

import jax
import jax.numpy as jnp
from jax.experimental import pallas as pl
from jax.experimental.pallas import tpu as pltpu

SLOPE = 0.01      # nn.LeakyReLU default negative_slope
BN_EPS = 1e-5     # nn.BatchNorm2d default eps


def _round_up(x, m):
    return (x + m - 1) // m * m


# ---------------------------------------------------------------------------
# Fused Pallas kernel:  out = LeakyReLU((A @ B) * scale[col] + shift[col])
# A: bf16 [M, K], B: bf16 [K, N]; accumulation + epilogue in f32.
# ---------------------------------------------------------------------------
def _gemm_bn_lrelu_kernel(a_ref, b_ref, scale_ref, shift_ref, o_ref, *, apply_lrelu):
    acc = jnp.dot(a_ref[...], b_ref[...], preferred_element_type=jnp.float32)
    y = acc * scale_ref[...] + shift_ref[...]
    if apply_lrelu:
        y = jnp.where(y >= 0, y, SLOPE * y)
    o_ref[...] = y.astype(o_ref.dtype)


def fused_gemm_bn_lrelu(a, b, scale, shift, apply_lrelu=True):
    """Tiled-over-M fused GEMM + folded BN + LeakyReLU.  K and N are kept at full
    size (no 128-padding); bf16 operands, f32 accumulation."""
    M, K = a.shape
    K2, N = b.shape
    assert K == K2
    # M tile: as large as possible (<= 512 rows) while dividing the padded M evenly.
    nb = -(-M // 512)
    tm = _round_up(-(-M // nb), 8)
    Mp = tm * nb

    a_p = jnp.pad(a, ((0, Mp - M), (0, 0))).astype(jnp.bfloat16)
    b_bf = b.astype(jnp.bfloat16)
    scale_r = scale.reshape(1, N).astype(jnp.float32)
    shift_r = shift.reshape(1, N).astype(jnp.float32)

    out = pl.pallas_call(
        functools.partial(_gemm_bn_lrelu_kernel, apply_lrelu=apply_lrelu),
        out_shape=jax.ShapeDtypeStruct((Mp, N), jnp.float32),
        grid=(nb,),
        in_specs=[
            pl.BlockSpec((tm, K), lambda i: (i, 0)),   # A tile (full K)
            pl.BlockSpec((K, N), lambda i: (0, 0)),    # whole B (full K, full N)
            pl.BlockSpec((1, N), lambda i: (0, 0)),    # per-channel scale
            pl.BlockSpec((1, N), lambda i: (0, 0)),    # per-channel shift
        ],
        out_specs=pl.BlockSpec((tm, N), lambda i: (i, 0)),
        compiler_params=pltpu.CompilerParams(
            dimension_semantics=("parallel",),
            vmem_limit_bytes=32 * 1024 * 1024,
        ),
    )(a_p, b_bf, scale_r, shift_r)
    return out[:M]


# ---------------------------------------------------------------------------
# convBlockT forward: ConvTranspose2d(k=3, p=1, output_padding, bias=False)
#                     + folded BatchNorm2d + LeakyReLU.
# wt_eq is the equivalent forward-conv kernel in HWIO:
#     wt_eq[a, b, ci, co] = W_pytorch[ci, co, 2 - a, 2 - b]
# ---------------------------------------------------------------------------
def convt_block(x, wt_eq, scale, shift, stride, out_padding=(0, 0), apply_lrelu=True):
    n, h, w, c = x.shape
    cout = wt_eq.shape[-1]
    x = x.astype(jnp.bfloat16)          # operands for the MXU

    if stride == 1:
        # ConvTranspose(k=3, s=1, p=1) == stride-1 "same" conv with flipped kernel.
        xp = jnp.pad(x, ((0, 0), (1, 1), (1, 1), (0, 0)))
        cols = [xp[:, a:a + h, b:b + w, :] for a in range(3) for b in range(3)]
        a_mat = jnp.concatenate(cols, axis=-1).reshape(n * h * w, 9 * c)
        b_mat = wt_eq.reshape(9 * c, cout)
        y = fused_gemm_bn_lrelu(a_mat, b_mat, scale, shift, apply_lrelu)
        return y.reshape(n, h, w, cout)

    assert stride == 2, "convBlockT is only used with stride 1 or 2"
    oph, opw = out_padding
    ho, wo = 2 * h - 1 + oph, 2 * w - 1 + opw
    hodd, wodd = h - 1 + oph, w - 1 + opw

    # One zero row/col at bottom/right so the '+1' taps of the odd phases exist.
    xp = jnp.pad(x, ((0, 0), (0, 1), (0, 1), (0, 0)))

    def phase(tap_offsets, tap_weights, hh, ww):
        cols = [xp[:, di:di + hh, dj:dj + ww, :] for (di, dj) in tap_offsets]
        a_mat = jnp.concatenate(cols, axis=-1).reshape(n * hh * ww, len(cols) * c)
        b_mat = jnp.concatenate(tap_weights, axis=0)            # (taps*Cin, Cout)
        y = fused_gemm_bn_lrelu(a_mat, b_mat, scale, shift, apply_lrelu)
        return y.reshape(n, hh, ww, cout)

    # 4-phase sub-pixel decomposition (no zero-dilated input, no structural-zero
    # rows in the GEMM).  BN + LeakyReLU are per-channel pointwise, so applying
    # them per phase before interleaving is exact.
    y_ee = phase([(0, 0)], [wt_eq[1, 1]], h, w)                                 # [0::2, 0::2]
    y_eo = phase([(0, 0), (0, 1)], [wt_eq[1, 0], wt_eq[1, 2]], h, wodd)         # [0::2, 1::2]
    y_oe = phase([(0, 0), (1, 0)], [wt_eq[0, 1], wt_eq[2, 1]], hodd, w)         # [1::2, 0::2]
    y_oo = phase([(0, 0), (0, 1), (1, 0), (1, 1)],
                 [wt_eq[0, 0], wt_eq[0, 2], wt_eq[2, 0], wt_eq[2, 2]],
                 hodd, wodd)                                                    # [1::2, 1::2]

    out = jnp.zeros((n, ho, wo, cout), jnp.float32)
    out = out.at[:, 0::2, 0::2, :].set(y_ee)
    out = out.at[:, 0::2, 1::2, :].set(y_eo)
    out = out.at[:, 1::2, 0::2, :].set(y_oe)
    out = out.at[:, 1::2, 1::2, :].set(y_oo)
    return out


def conv_block_t(params, x_nchw, stride, out_padding=(0, 0)):
    """NCHW in / NCHW out wrapper (PyTorch convention)."""
    x = jnp.transpose(x_nchw, (0, 2, 3, 1))                     # NCHW -> NHWC
    y = convt_block(x, params["wt_eq"], params["scale"], params["shift"],
                    stride, out_padding)
    return jnp.transpose(y, (0, 3, 1, 2))                        # NHWC -> NCHW


# ---------------------------------------------------------------------------
# Deterministic parameter construction (PyTorch layouts, then folded/converted)
# ---------------------------------------------------------------------------
def init_convblockt_params(key, in_channels, out_channels):
    k1, k2, k3, k4, k5 = jax.random.split(key, 5)
    # ConvTranspose2d weight in PyTorch layout (Cin, Cout, kh, kw)
    wt = jax.random.normal(k1, (in_channels, out_channels, 3, 3),
                           jnp.float32) / jnp.sqrt(9.0 * in_channels)
    gamma = 1.0 + 0.1 * jax.random.normal(k2, (out_channels,), jnp.float32)
    beta = 0.1 * jax.random.normal(k3, (out_channels,), jnp.float32)
    rmean = 0.1 * jax.random.normal(k4, (out_channels,), jnp.float32)
    rvar = 0.5 + jax.random.uniform(k5, (out_channels,), jnp.float32)
    scale = gamma / jnp.sqrt(rvar + BN_EPS)
    shift = beta - rmean * scale
    # Equivalent forward-conv kernel: spatial flip + in/out channel swap -> HWIO.
    wt_eq = jnp.transpose(wt, (2, 3, 0, 1))[::-1, ::-1, :, :]
    return {"wt_eq": wt_eq, "scale": scale, "shift": shift}


# ---------------------------------------------------------------------------
# Plain-XLA reference (f32) for correctness checking
# ---------------------------------------------------------------------------
def conv_block_t_ref(params, x_nchw, stride, out_padding=(0, 0)):
    x = jnp.transpose(x_nchw, (0, 2, 3, 1))
    oph, opw = out_padding
    y = jax.lax.conv_general_dilated(
        x, params["wt_eq"],
        window_strides=(1, 1),
        padding=((1, 1 + oph), (1, 1 + opw)),
        lhs_dilation=(stride, stride),
        dimension_numbers=("NHWC", "HWIO", "NHWC"))
    y = y * params["scale"] + params["shift"]
    y = jnp.where(y >= 0, y, SLOPE * y)
    return jnp.transpose(y, (0, 3, 1, 2))


if __name__ == "__main__":
    key = jax.random.PRNGKey(0)
    k_p1, k_p2, k_x = jax.random.split(key, 3)

    # Two instances of convBlockT, exercising both strides and output_padding:
    #   convBlockT(8 -> 16, stride=1) then convBlockT(16 -> 32, stride=2, out_padding=(1, 0))
    p1 = init_convblockt_params(k_p1, 8, 16)
    p2 = init_convblockt_params(k_p2, 16, 32)
    x = jax.random.normal(k_x, (2, 8, 12, 20), jnp.float32)      # NCHW

    @jax.jit
    def fwd(p1, p2, x):
        y1 = conv_block_t(p1, x, stride=1)
        y2 = conv_block_t(p2, y1, stride=2, out_padding=(1, 0))
        return y1, y2

    y1, y2 = fwd(p1, p2, x)
    jax.block_until_ready((y1, y2))

    assert y1.shape == (2, 16, 12, 20), y1.shape
    assert y2.shape == (2, 32, 24, 39), y2.shape
    assert bool(jnp.all(jnp.isfinite(y1))) and bool(jnp.all(jnp.isfinite(y2)))

    # Correctness vs f32 XLA reference (loose tolerance: kernel uses bf16 MXU
    # operands with f32 accumulation).
    r1 = conv_block_t_ref(p1, x, stride=1)
    r2 = conv_block_t_ref(p2, y1, stride=2, out_padding=(1, 0))
    assert jnp.allclose(y1, r1, rtol=1e-1, atol=1e-1), float(jnp.max(jnp.abs(y1 - r1)))
    assert jnp.allclose(y2, r2, rtol=1e-1, atol=1e-1), float(jnp.max(jnp.abs(y2 - r2)))

    print("KERNEL_OK")
</pallas_src>

<mosaic_0001>
module attributes {stable_mosaic.version = 11 : i64} {
  func.func @_gemm_bn_lrelu_kernel(%arg0: i32, %arg1: memref<480x72xbf16, #tpu.memory_space<vmem>>, %arg2: memref<72x16xbf16, #tpu.memory_space<vmem>>, %arg3: memref<1x16xf32, #tpu.memory_space<vmem>>, %arg4: memref<1x16xf32, #tpu.memory_space<vmem>>, %arg5: memref<480x16xf32, #tpu.memory_space<vmem>>) attributes {dimension_semantics = [#tpu.dimension_semantics<parallel>], iteration_bounds = array<i64: 1>, scalar_prefetch = 0 : i64, scratch_operands = 0 : i64, tpu.core_type = #tpu.core_type<tc>, window_params = [{transform_indices = @transform_0, window_bounds = array<i64: 480, 72>}, {pipeline_mode = #tpu.pipeline_mode<synchronous>, transform_indices = @transform_1, window_bounds = array<i64: 72, 16>}, {pipeline_mode = #tpu.pipeline_mode<synchronous>, transform_indices = @transform_2, window_bounds = array<i64: 1, 16>}, {pipeline_mode = #tpu.pipeline_mode<synchronous>, transform_indices = @transform_3, window_bounds = array<i64: 1, 16>}, {transform_indices = @transform_4, window_bounds = array<i64: 480, 16>}]} {
    %c0 = arith.constant 0 : index
    %c0_0 = arith.constant 0 : index
    %0 = vector.load %arg1[%c0, %c0_0] : memref<480x72xbf16, #tpu.memory_space<vmem>>, vector<480x72xbf16>
    %c0_1 = arith.constant 0 : index
    %c0_2 = arith.constant 0 : index
    %1 = vector.load %arg2[%c0_1, %c0_2] : memref<72x16xbf16, #tpu.memory_space<vmem>>, vector<72x16xbf16>
    %cst = arith.constant dense<0.000000e+00> : vector<480x16xf32>
    %2 = tpu.matmul %0, %1, %cst {dimension_numbers = #tpu.dot_dimension_numbers<[1], [0], [0], [1], [0, 0, 1, 1], [], []>} : vector<480x72xbf16>, vector<72x16xbf16>, vector<480x16xf32> -> vector<480x16xf32>
    %c0_3 = arith.constant 0 : index
    %c0_4 = arith.constant 0 : index
    %3 = vector.load %arg3[%c0_3, %c0_4] : memref<1x16xf32, #tpu.memory_space<vmem>>, vector<1x16xf32>
    %4 = vector.broadcast %3 : vector<1x16xf32> to vector<480x16xf32>
    %5 = arith.mulf %2, %4 : vector<480x16xf32>
    %c0_5 = arith.constant 0 : index
    %c0_6 = arith.constant 0 : index
    %6 = vector.load %arg4[%c0_5, %c0_6] : memref<1x16xf32, #tpu.memory_space<vmem>>, vector<1x16xf32>
    %7 = vector.broadcast %6 : vector<1x16xf32> to vector<480x16xf32>
    %8 = arith.addf %5, %7 : vector<480x16xf32>
    %cst_7 = arith.constant 0.000000e+00 : f32
    %9 = vector.broadcast %cst_7 : f32 to vector<480x16xf32>
    %10 = arith.cmpf oge, %8, %9 : vector<480x16xf32>
    %cst_8 = arith.constant 0.00999999977 : f32
    %11 = vector.broadcast %cst_8 : f32 to vector<480x16xf32>
    %12 = arith.mulf %11, %8 : vector<480x16xf32>
    %13 = arith.select %10, %8, %12 : vector<480x16xi1>, vector<480x16xf32>
    %c0_9 = arith.constant 0 : index
    %c0_10 = arith.constant 0 : index
    %14 = vector.load %arg5[%c0_9, %c0_10] : memref<480x16xf32, #tpu.memory_space<vmem>>, vector<480x16xf32>
    tpu.vector_store %arg5[%c0_9, %c0_10], %13 {strides = array<i32>} : memref<480x16xf32, #tpu.memory_space<vmem>>, vector<480x16xf32>,
    return
  }
  func.func @transform_0(%arg0: i32) -> (i32, i32) {
    %c0_i32 = arith.constant 0 : i32
    %c0_i32_0 = arith.constant 0 : i32
    return %arg0, %c0_i32 : i32, i32
  }
  func.func @transform_1(%arg0: i32) -> (i32, i32) {
    %c0_i32 = arith.constant 0 : i32
    %c0_i32_0 = arith.constant 0 : i32
    %c0_i32_1 = arith.constant 0 : i32
    return %c0_i32, %c0_i32_0 : i32, i32
  }
  func.func @transform_2(%arg0: i32) -> (i32, i32) {
    %c0_i32 = arith.constant 0 : i32
    %c0_i32_0 = arith.constant 0 : i32
    %c0_i32_1 = arith.constant 0 : i32
    return %c0_i32, %c0_i32_0 : i32, i32
  }
  func.func @transform_3(%arg0: i32) -> (i32, i32) {
    %c0_i32 = arith.constant 0 : i32
    %c0_i32_0 = arith.constant 0 : i32
    %c0_i32_1 = arith.constant 0 : i32
    return %c0_i32, %c0_i32_0 : i32, i32
  }
  func.func @transform_4(%arg0: i32) -> (i32, i32) {
    %c0_i32 = arith.constant 0 : i32
    %c0_i32_0 = arith.constant 0 : i32
    return %arg0, %c0_i32 : i32, i32
  }
}

module attributes {stable_mosaic.version = 11 : i64} {
  func.func @_gemm_bn_lrelu_kernel(%arg0: i32, %arg1: memref<480x16xbf16, #tpu.memory_space<vmem>>, %arg2: memref<16x32xbf16, #tpu.memory_space<vmem>>, %arg3: memref<1x32xf32, #tpu.memory_space<vmem>>, %arg4: memref<1x32xf32, #tpu.memory_space<vmem>>, %arg5: memref<480x32xf32, #tpu.memory_space<vmem>>) attributes {dimension_semantics = [#tpu.dimension_semantics<parallel>], iteration_bounds = array<i64: 1>, scalar_prefetch = 0 : i64, scratch_operands = 0 : i64, tpu.core_type = #tpu.core_type<tc>, window_params = [{transform_indices = @transform_0, window_bounds = array<i64: 480, 16>}, {pipeline_mode = #tpu.pipeline_mode<synchronous>, transform_indices = @transform_1, window_bounds = array<i64: 16, 32>}, {pipeline_mode = #tpu.pipeline_mode<synchronous>, transform_indices = @transform_2, window_bounds = array<i64: 1, 32>}, {pipeline_mode = #tpu.pipeline_mode<synchronous>, transform_indices = @transform_3, window_bounds = array<i64: 1, 32>}, {transform_indices = @transform_4, window_bounds = array<i64: 480, 32>}]} {
    %c0 = arith.constant 0 : index
    %c0_0 = arith.constant 0 : index
    %0 = vector.load %arg1[%c0, %c0_0] : memref<480x16xbf16, #tpu.memory_space<vmem>>, vector<480x16xbf16>
    %c0_1 = arith.constant 0 : index
    %c0_2 = arith.constant 0 : index
    %1 = vector.load %arg2[%c0_1, %c0_2] : memref<16x32xbf16, #tpu.memory_space<vmem>>, vector<16x32xbf16>
    %cst = arith.constant dense<0.000000e+00> : vector<480x32xf32>
    %2 = tpu.matmul %0, %1, %cst {dimension_numbers = #tpu.dot_dimension_numbers<[1], [0], [0], [1], [0, 0, 1, 1], [], []>} : vector<480x16xbf16>, vector<16x32xbf16>, vector<480x32xf32> -> vector<480x32xf32>
    %c0_3 = arith.constant 0 : index
    %c0_4 = arith.constant 0 : index
    %3 = vector.load %arg3[%c0_3, %c0_4] : memref<1x32xf32, #tpu.memory_space<vmem>>, vector<1x32xf32>
    %4 = vector.broadcast %3 : vector<1x32xf32> to vector<480x32xf32>
    %5 = arith.mulf %2, %4 : vector<480x32xf32>
    %c0_5 = arith.constant 0 : index
    %c0_6 = arith.constant 0 : index
    %6 = vector.load %arg4[%c0_5, %c0_6] : memref<1x32xf32, #tpu.memory_space<vmem>>, vector<1x32xf32>
    %7 = vector.broadcast %6 : vector<1x32xf32> to vector<480x32xf32>
    %8 = arith.addf %5, %7 : vector<480x32xf32>
    %cst_7 = arith.constant 0.000000e+00 : f32
    %9 = vector.broadcast %cst_7 : f32 to vector<480x32xf32>
    %10 = arith.cmpf oge, %8, %9 : vector<480x32xf32>
    %cst_8 = arith.constant 0.00999999977 : f32
    %11 = vector.broadcast %cst_8 : f32 to vector<480x32xf32>
    %12 = arith.mulf %11, %8 : vector<480x32xf32>
    %13 = arith.select %10, %8, %12 : vector<480x32xi1>, vector<480x32xf32>
    %c0_9 = arith.constant 0 : index
    %c0_10 = arith.constant 0 : index
    %14 = vector.load %arg5[%c0_9, %c0_10] : memref<480x32xf32, #tpu.memory_space<vmem>>, vector<480x32xf32>
    tpu.vector_store %arg5[%c0_9, %c0_10], %13 {strides = array<i32>} : memref<480x32xf32, #tpu.memory_space<vmem>>, vector<480x32xf32>,
    return
  }
  func.func @transform_0(%arg0: i32) -> (i32, i32) {
    %c0_i32 = arith.constant 0 : i32
    %c0_i32_0 = arith.constant 0 : i32
    return %arg0, %c0_i32 : i32, i32
  }
  func.func @transform_1(%arg0: i32) -> (i32, i32) {
    %c0_i32 = arith.constant 0 : i32
    %c0_i32_0 = arith.constant 0 : i32
    %c0_i32_1 = arith.constant 0 : i32
    return %c0_i32, %c0_i32_0 : i32, i32
  }
  func.func @transform_2(%arg0: i32) -> (i32, i32) {
    %c0_i32 = arith.constant 0 : i32
    %c0_i32_0 = arith.constant 0 : i32
    %c0_i32_1 = arith.constant 0 : i32
    return %c0_i32, %c0_i32_0 : i32, i32
  }
  func.func @transform_3(%arg0: i32) -> (i32, i32) {
    %c0_i32 = arith.constant 0 : i32
    %c0_i32_0 = arith.constant 0 : i32
    %c0_i32_1 = arith.constant 0 : i32
    return %c0_i32, %c0_i32_0 : i32, i32
  }
  func.func @transform_4(%arg0: i32) -> (i32, i32) {
    %c0_i32 = arith.constant 0 : i32
    %c0_i32_0 = arith.constant 0 : i32
    return %arg0, %c0_i32 : i32, i32
  }
}

module attributes {stable_mosaic.version = 11 : i64} {
  func.func @_gemm_bn_lrelu_kernel(%arg0: i32, %arg1: memref<480x32xbf16, #tpu.memory_space<vmem>>, %arg2: memref<32x32xbf16, #tpu.memory_space<vmem>>, %arg3: memref<1x32xf32, #tpu.memory_space<vmem>>, %arg4: memref<1x32xf32, #tpu.memory_space<vmem>>, %arg5: memref<480x32xf32, #tpu.memory_space<vmem>>) attributes {dimension_semantics = [#tpu.dimension_semantics<parallel>], iteration_bounds = array<i64: 1>, scalar_prefetch = 0 : i64, scratch_operands = 0 : i64, tpu.core_type = #tpu.core_type<tc>, window_params = [{transform_indices = @transform_0, window_bounds = array<i64: 480, 32>}, {pipeline_mode = #tpu.pipeline_mode<synchronous>, transform_indices = @transform_1, window_bounds = array<i64: 32, 32>}, {pipeline_mode = #tpu.pipeline_mode<synchronous>, transform_indices = @transform_2, window_bounds = array<i64: 1, 32>}, {pipeline_mode = #tpu.pipeline_mode<synchronous>, transform_indices = @transform_3, window_bounds = array<i64: 1, 32>}, {transform_indices = @transform_4, window_bounds = array<i64: 480, 32>}]} {
    %c0 = arith.constant 0 : index
    %c0_0 = arith.constant 0 : index
    %0 = vector.load %arg1[%c0, %c0_0] : memref<480x32xbf16, #tpu.memory_space<vmem>>, vector<480x32xbf16>
    %c0_1 = arith.constant 0 : index
    %c0_2 = arith.constant 0 : index
    %1 = vector.load %arg2[%c0_1, %c0_2] : memref<32x32xbf16, #tpu.memory_space<vmem>>, vector<32x32xbf16>
    %cst = arith.constant dense<0.000000e+00> : vector<480x32xf32>
    %2 = tpu.matmul %0, %1, %cst {dimension_numbers = #tpu.dot_dimension_numbers<[1], [0], [0], [1], [0, 0, 1, 1], [], []>} : vector<480x32xbf16>, vector<32x32xbf16>, vector<480x32xf32> -> vector<480x32xf32>
    %c0_3 = arith.constant 0 : index
    %c0_4 = arith.constant 0 : index
    %3 = vector.load %arg3[%c0_3, %c0_4] : memref<1x32xf32, #tpu.memory_space<vmem>>, vector<1x32xf32>
    %4 = vector.broadcast %3 : vector<1x32xf32> to vector<480x32xf32>
    %5 = arith.mulf %2, %4 : vector<480x32xf32>
    %c0_5 = arith.constant 0 : index
    %c0_6 = arith.constant 0 : index
    %6 = vector.load %arg4[%c0_5, %c0_6] : memref<1x32xf32, #tpu.memory_space<vmem>>, vector<1x32xf32>
    %7 = vector.broadcast %6 : vector<1x32xf32> to vector<480x32xf32>
    %8 = arith.addf %5, %7 : vector<480x32xf32>
    %cst_7 = arith.constant 0.000000e+00 : f32
    %9 = vector.broadcast %cst_7 : f32 to vector<480x32xf32>
    %10 = arith.cmpf oge, %8, %9 : vector<480x32xf32>
    %cst_8 = arith.constant 0.00999999977 : f32
    %11 = vector.broadcast %cst_8 : f32 to vector<480x32xf32>
    %12 = arith.mulf %11, %8 : vector<480x32xf32>
    %13 = arith.select %10, %8, %12 : vector<480x32xi1>, vector<480x32xf32>
    %c0_9 = arith.constant 0 : index
    %c0_10 = arith.constant 0 : index
    %14 = vector.load %arg5[%c0_9, %c0_10] : memref<480x32xf32, #tpu.memory_space<vmem>>, vector<480x32xf32>
    tpu.vector_store %arg5[%c0_9, %c0_10], %13 {strides = array<i32>} : memref<480x32xf32, #tpu.memory_space<vmem>>, vector<480x32xf32>,
    return
  }
  func.func @transform_0(%arg0: i32) -> (i32, i32) {
    %c0_i32 = arith.constant 0 : i32
    %c0_i32_0 = arith.constant 0 : i32
    return %arg0, %c0_i32 : i32, i32
  }
  func.func @transform_1(%arg0: i32) -> (i32, i32) {
    %c0_i32 = arith.constant 0 : i32
    %c0_i32_0 = arith.constant 0 : i32
    %c0_i32_1 = arith.constant 0 : i32
    return %c0_i32, %c0_i32_0 : i32, i32
  }
  func.func @transform_2(%arg0: i32) -> (i32, i32) {
    %c0_i32 = arith.constant 0 : i32
    %c0_i32_0 = arith.constant 0 : i32
    %c0_i32_1 = arith.constant 0 : i32
    return %c0_i32, %c0_i32_0 : i32, i32
  }
  func.func @transform_3(%arg0: i32) -> (i32, i32) {
    %c0_i32 = arith.constant 0 : i32
    %c0_i32_0 = arith.constant 0 : i32
    %c0_i32_1 = arith.constant 0 : i32
    return %c0_i32, %c0_i32_0 : i32, i32
  }
  func.func @transform_4(%arg0: i32) -> (i32, i32) {
    %c0_i32 = arith.constant 0 : i32
    %c0_i32_0 = arith.constant 0 : i32
    return %arg0, %c0_i32 : i32, i32
  }
}

module attributes {stable_mosaic.version = 11 : i64} {
  func.func @_gemm_bn_lrelu_kernel(%arg0: i32, %arg1: memref<456x64xbf16, #tpu.memory_space<vmem>>, %arg2: memref<64x32xbf16, #tpu.memory_space<vmem>>, %arg3: memref<1x32xf32, #tpu.memory_space<vmem>>, %arg4: memref<1x32xf32, #tpu.memory_space<vmem>>, %arg5: memref<456x32xf32, #tpu.memory_space<vmem>>) attributes {dimension_semantics = [#tpu.dimension_semantics<parallel>], iteration_bounds = array<i64: 1>, scalar_prefetch = 0 : i64, scratch_operands = 0 : i64, tpu.core_type = #tpu.core_type<tc>, window_params = [{transform_indices = @transform_0, window_bounds = array<i64: 456, 64>}, {pipeline_mode = #tpu.pipeline_mode<synchronous>, transform_indices = @transform_1, window_bounds = array<i64: 64, 32>}, {pipeline_mode = #tpu.pipeline_mode<synchronous>, transform_indices = @transform_2, window_bounds = array<i64: 1, 32>}, {pipeline_mode = #tpu.pipeline_mode<synchronous>, transform_indices = @transform_3, window_bounds = array<i64: 1, 32>}, {transform_indices = @transform_4, window_bounds = array<i64: 456, 32>}]} {
    %c0 = arith.constant 0 : index
    %c0_0 = arith.constant 0 : index
    %0 = vector.load %arg1[%c0, %c0_0] : memref<456x64xbf16, #tpu.memory_space<vmem>>, vector<456x64xbf16>
    %c0_1 = arith.constant 0 : index
    %c0_2 = arith.constant 0 : index
    %1 = vector.load %arg2[%c0_1, %c0_2] : memref<64x32xbf16, #tpu.memory_space<vmem>>, vector<64x32xbf16>
    %cst = arith.constant dense<0.000000e+00> : vector<456x32xf32>
    %2 = tpu.matmul %0, %1, %cst {dimension_numbers = #tpu.dot_dimension_numbers<[1], [0], [0], [1], [0, 0, 1, 1], [], []>} : vector<456x64xbf16>, vector<64x32xbf16>, vector<456x32xf32> -> vector<456x32xf32>
    %c0_3 = arith.constant 0 : index
    %c0_4 = arith.constant 0 : index
    %3 = vector.load %arg3[%c0_3, %c0_4] : memref<1x32xf32, #tpu.memory_space<vmem>>, vector<1x32xf32>
    %4 = vector.broadcast %3 : vector<1x32xf32> to vector<456x32xf32>
    %5 = arith.mulf %2, %4 : vector<456x32xf32>
    %c0_5 = arith.constant 0 : index
    %c0_6 = arith.constant 0 : index
    %6 = vector.load %arg4[%c0_5, %c0_6] : memref<1x32xf32, #tpu.memory_space<vmem>>, vector<1x32xf32>
    %7 = vector.broadcast %6 : vector<1x32xf32> to vector<456x32xf32>
    %8 = arith.addf %5, %7 : vector<456x32xf32>
    %cst_7 = arith.constant 0.000000e+00 : f32
    %9 = vector.broadcast %cst_7 : f32 to vector<456x32xf32>
    %10 = arith.cmpf oge, %8, %9 : vector<456x32xf32>
    %cst_8 = arith.constant 0.00999999977 : f32
    %11 = vector.broadcast %cst_8 : f32 to vector<456x32xf32>
    %12 = arith.mulf %11, %8 : vector<456x32xf32>
    %13 = arith.select %10, %8, %12 : vector<456x32xi1>, vector<456x32xf32>
    %c0_9 = arith.constant 0 : index
    %c0_10 = arith.constant 0 : index
    %14 = vector.load %arg5[%c0_9, %c0_10] : memref<456x32xf32, #tpu.memory_space<vmem>>, vector<456x32xf32>
    tpu.vector_store %arg5[%c0_9, %c0_10], %13 {strides = array<i32>} : memref<456x32xf32, #tpu.memory_space<vmem>>, vector<456x32xf32>,
    return
  }
  func.func @transform_0(%arg0: i32) -> (i32, i32) {
    %c0_i32 = arith.constant 0 : i32
    %c0_i32_0 = arith.constant 0 : i32
    return %arg0, %c0_i32 : i32, i32
  }
  func.func @transform_1(%arg0: i32) -> (i32, i32) {
    %c0_i32 = arith.constant 0 : i32
    %c0_i32_0 = arith.constant 0 : i32
    %c0_i32_1 = arith.constant 0 : i32
    return %c0_i32, %c0_i32_0 : i32, i32
  }
  func.func @transform_2(%arg0: i32) -> (i32, i32) {
    %c0_i32 = arith.constant 0 : i32
    %c0_i32_0 = arith.constant 0 : i32
    %c0_i32_1 = arith.constant 0 : i32
    return %c0_i32, %c0_i32_0 : i32, i32
  }
  func.func @transform_3(%arg0: i32) -> (i32, i32) {
    %c0_i32 = arith.constant 0 : i32
    %c0_i32_0 = arith.constant 0 : i32
    %c0_i32_1 = arith.constant 0 : i32
    return %c0_i32, %c0_i32_0 : i32, i32
  }
  func.func @transform_4(%arg0: i32) -> (i32, i32) {
    %c0_i32 = arith.constant 0 : i32
    %c0_i32_0 = arith.constant 0 : i32
    return %arg0, %c0_i32 : i32, i32
  }
}

module attributes {stable_mosaic.version = 11 : i64} {
  func.func @_gemm_bn_lrelu_kernel(%arg0: i32, %arg1: memref<456x32xbf16, #tpu.memory_space<vmem>>, %arg2: memref<32x32xbf16, #tpu.memory_space<vmem>>, %arg3: memref<1x32xf32, #tpu.memory_space<vmem>>, %arg4: memref<1x32xf32, #tpu.memory_space<vmem>>, %arg5: memref<456x32xf32, #tpu.memory_space<vmem>>) attributes {dimension_semantics = [#tpu.dimension_semantics<parallel>], iteration_bounds = array<i64: 1>, scalar_prefetch = 0 : i64, scratch_operands = 0 : i64, tpu.core_type = #tpu.core_type<tc>, window_params = [{transform_indices = @transform_0, window_bounds = array<i64: 456, 32>}, {pipeline_mode = #tpu.pipeline_mode<synchronous>, transform_indices = @transform_1, window_bounds = array<i64: 32, 32>}, {pipeline_mode = #tpu.pipeline_mode<synchronous>, transform_indices = @transform_2, window_bounds = array<i64: 1, 32>}, {pipeline_mode = #tpu.pipeline_mode<synchronous>, transform_indices = @transform_3, window_bounds = array<i64: 1, 32>}, {transform_indices = @transform_4, window_bounds = array<i64: 456, 32>}]} {
    %c0 = arith.constant 0 : index
    %c0_0 = arith.constant 0 : index
    %0 = vector.load %arg1[%c0, %c0_0] : memref<456x32xbf16, #tpu.memory_space<vmem>>, vector<456x32xbf16>
    %c0_1 = arith.constant 0 : index
    %c0_2 = arith.constant 0 : index
    %1 = vector.load %arg2[%c0_1, %c0_2] : memref<32x32xbf16, #tpu.memory_space<vmem>>, vector<32x32xbf16>
    %cst = arith.constant dense<0.000000e+00> : vector<456x32xf32>
    %2 = tpu.matmul %0, %1, %cst {dimension_numbers = #tpu.dot_dimension_numbers<[1], [0], [0], [1], [0, 0, 1, 1], [], []>} : vector<456x32xbf16>, vector<32x32xbf16>, vector<456x32xf32> -> vector<456x32xf32>
    %c0_3 = arith.constant 0 : index
    %c0_4 = arith.constant 0 : index
    %3 = vector.load %arg3[%c0_3, %c0_4] : memref<1x32xf32, #tpu.memory_space<vmem>>, vector<1x32xf32>
    %4 = vector.broadcast %3 : vector<1x32xf32> to vector<456x32xf32>
    %5 = arith.mulf %2, %4 : vector<456x32xf32>
    %c0_5 = arith.constant 0 : index
    %c0_6 = arith.constant 0 : index
    %6 = vector.load %arg4[%c0_5, %c0_6] : memref<1x32xf32, #tpu.memory_space<vmem>>, vector<1x32xf32>
    %7 = vector.broadcast %6 : vector<1x32xf32> to vector<456x32xf32>
    %8 = arith.addf %5, %7 : vector<456x32xf32>
    %cst_7 = arith.constant 0.000000e+00 : f32
    %9 = vector.broadcast %cst_7 : f32 to vector<456x32xf32>
    %10 = arith.cmpf oge, %8, %9 : vector<456x32xf32>
    %cst_8 = arith.constant 0.00999999977 : f32
    %11 = vector.broadcast %cst_8 : f32 to vector<456x32xf32>
    %12 = arith.mulf %11, %8 : vector<456x32xf32>
    %13 = arith.select %10, %8, %12 : vector<456x32xi1>, vector<456x32xf32>
    %c0_9 = arith.constant 0 : index
    %c0_10 = arith.constant 0 : index
    %14 = vector.load %arg5[%c0_9, %c0_10] : memref<456x32xf32, #tpu.memory_space<vmem>>, vector<456x32xf32>
    tpu.vector_store %arg5[%c0_9, %c0_10], %13 {strides = array<i32>} : memref<456x32xf32, #tpu.memory_space<vmem>>, vector<456x32xf32>,
    return
  }
  func.func @transform_0(%arg0: i32) -> (i32, i32) {
    %c0_i32 = arith.constant 0 : i32
    %c0_i32_0 = arith.constant 0 : i32
    return %arg0, %c0_i32 : i32, i32
  }
  func.func @transform_1(%arg0: i32) -> (i32, i32) {
    %c0_i32 = arith.constant 0 : i32
    %c0_i32_0 = arith.constant 0 : i32
    %c0_i32_1 = arith.constant 0 : i32
    return %c0_i32, %c0_i32_0 : i32, i32
  }
  func.func @transform_2(%arg0: i32) -> (i32, i32) {
    %c0_i32 = arith.constant 0 : i32
    %c0_i32_0 = arith.constant 0 : i32
    %c0_i32_1 = arith.constant 0 : i32
    return %c0_i32, %c0_i32_0 : i32, i32
  }
  func.func @transform_3(%arg0: i32) -> (i32, i32) {
    %c0_i32 = arith.constant 0 : i32
    %c0_i32_0 = arith.constant 0 : i32
    %c0_i32_1 = arith.constant 0 : i32
    return %c0_i32, %c0_i32_0 : i32, i32
  }
  func.func @transform_4(%arg0: i32) -> (i32, i32) {
    %c0_i32 = arith.constant 0 : i32
    %c0_i32_0 = arith.constant 0 : i32
    return %arg0, %c0_i32 : i32, i32
  }
}

</mosaic_0001>

<bundles_post_ra>
// kernel: fwd.5
= control target key start
LH: loop header
LB: loop body
LE: loop exit
PB: predicated region body
PF: predicated region fallthrough
CT: control target
= control target key end

     0   :  { %vm264_vm0 = vcmask 588800   ;;  %vm355_vm1 = vcmask 1043456   ;;  %vm946_vm2 = vcmask 130048   ;;  %s1802_s1 = inlined_call_operand.vmem [shape: bf16[72,16], index: 1, kind: input, shape index: {}]   ;;  %s1803_s0 = inlined_call_operand.vmem [shape: bf16[480,72], index: 0, kind: input, shape index: {}]   ;;  %s1804_s2 = inlined_call_operand.vmem [shape: f32[1,16], index: 2, kind: input, shape index: {}]   ;;  %s1805_s3 = inlined_call_operand.vmem [shape: f32[1,16], index: 3, kind: input, shape index: {}]   ;;  %s1806_s4 = inlined_call_operand.vmem [shape: f32[480,16], index: 4, kind: output, shape index: {}]  }
   0x1   :  { %v1195_v0 = vld [vmem:[%s1802_s1] sm:$0xff]   ;;  %v1196_v1 = vld [vmem:[%s1802_s1 + $0x8] sm:$0xff]   ;;  %v1197_v2 = vld [vmem:[%s1802_s1 + $0x10] sm:$0xff]  }
   0x2   :  { %1113 = vmatprep.subr.bf16.mxu0 %v1195_v0  ;;  %1183 = vmatprep.subr.bf16.mxu1 %v1195_v0  ;;  %v1200_v3 = vld [vmem:[%s1803_s0] sm:$0xff]   ;;  %v1198_v5 = vld [vmem:[%s1802_s1 + $0x18] sm:$0xff]   ;;  %v1201_v8 = vld [vmem:[%s1803_s0 + $0x8] sm:$0xff]  }
   0x3   :  { %1114 = vmatpush3.bf16.msra.mxu0 %v1195_v0  ;;  %1188 = vmatpush3.bf16.msra.mxu1 %v1195_v0  ;;  %v1202_v4 = vld [vmem:[%s1803_s0 + $0x80] sm:$0xff]   ;;  %v1203_v9 = vld [vmem:[%s1803_s0 + $0x88] sm:$0xff]   ;;  %v1204_v10 = vld [vmem:[%s1803_s0 + $0x10] sm:$0xff]  }
   0x4   :  { %1115 = vmatprep.subr.bf16.mxu0 %v1196_v1  ;;  %1184 = vmatprep.subr.bf16.mxu1 %v1196_v1  ;;  %v1199_v6 = vld [vmem:[%s1802_s1 + $0x20] ss:$0 sps:$4 sm:$0xff]   ;;  %v1206_v11 = vld [vmem:[%s1803_s0 + $0x90] sm:$0xff]   ;;  %v1205_v12 = vld [vmem:[%s1803_s0 + $0x18] sm:$0xff]  }
   0x5   :  { %1123 = vmatprep.mubr.msk.bf16.mxu0 %vm264_vm0, %v1200_v3  ;;  %1155 = vmatprep.mubr.msk.bf16.mxu1 %vm264_vm0, %v1202_v4  ;;  %v357_v7 = vsel %vm355_vm1, %v1199_v6, 0  ;;  %v1207_v13 = vld [vmem:[%s1803_s0 + $0x98] sm:$0xff]   ;;  %v1208_v14 = vld [vmem:[%s1803_s0 + $0x20] sm:$0xff]   ;;  %v1209_v16 = vld [vmem:[%s1803_s0 + $0x28] sm:$0xff]  }
   0x6   :  { %v1210_v15 = vld [vmem:[%s1803_s0 + $0xa0] sm:$0xff]   ;;  %v1211_v17 = vld [vmem:[%s1803_s0 + $0xa8] sm:$0xff]   ;;  %v1212_v18 = vld [vmem:[%s1803_s0 + $0x30] sm:$0xff]  }
   0x7   :  { %1116 = vmatpush3.bf16.msra.mxu0 %v1196_v1  ;;  %1189 = vmatpush3.bf16.msra.mxu1 %v1196_v1  ;;  %v1214_v19 = vld [vmem:[%s1803_s0 + $0xb0] sm:$0xff]   ;;  %v1213_v20 = vld [vmem:[%s1803_s0 + $0x38] sm:$0xff]   ;;  %v1216_v22 = vld [vmem:[%s1803_s0 + $0x40] sm:$0xff]  }
   0x8   :  { %1117 = vmatprep.subr.bf16.mxu0 %v1197_v2  ;;  %1185 = vmatprep.subr.bf16.mxu1 %v1197_v2  ;;  %v1215_v21 = vld [vmem:[%s1803_s0 + $0xb8] sm:$0xff]   ;;  %v1218_v23 = vld [vmem:[%s1803_s0 + $0xc0] sm:$0xff]   ;;  %v1217_v24 = vld [vmem:[%s1803_s0 + $0x48] sm:$0xff]  }
   0x9   :  { %v1219_v25 = vld [vmem:[%s1803_s0 + $0xc8] sm:$0xff]   ;;  %v1220_v26 = vld [vmem:[%s1803_s0 + $0x50] sm:$0xff]   ;;  %v1221_v28 = vld [vmem:[%s1803_s0 + $0x58] sm:$0xff]  }
   0xa   :  { %v1222_v27 = vld [vmem:[%s1803_s0 + $0xd0] sm:$0xff]   ;;  %v1223_v29 = vld [vmem:[%s1803_s0 + $0xd8] sm:$0xff]   ;;  %v1224_v30 = vld [vmem:[%s1803_s0 + $0x60] sm:$0xff]  }
   0xb   :  { %1118 = vmatpush3.bf16.msra.mxu0 %v1197_v2  ;;  %1190 = vmatpush3.bf16.msra.mxu1 %v1197_v2  ;;  %v1226_v31 = vld [vmem:[%s1803_s0 + $0xe0] sm:$0xff]   ;;  %v1225_v32 = vld [vmem:[%s1803_s0 + $0x68] sm:$0xff]   ;;  %v1228_v34 = vld [vmem:[%s1803_s0 + $0x70] sm:$0xff]  }
   0xc   :  { %1119 = vmatprep.subr.bf16.mxu0 %v1198_v5  ;;  %1186 = vmatprep.subr.bf16.mxu1 %v1198_v5  ;;  %v1227_v33 = vld [vmem:[%s1803_s0 + $0xe8] sm:$0xff]   ;;  %v1229_v35 = vld [vmem:[%s1803_s0 + $0x78] sm:$0xff]   ;;  %v1393_v36 = vld [vmem:[%s1804_s2] ss:$0 sm:$0xff] }
   0xd   :  { %v1398_v38 = vld [vmem:[%s1805_s3] ss:$0 sm:$0xff] }
   0xf   :  { %1120 = vmatpush3.bf16.msra.mxu0 %v1198_v5  ;;  %1191 = vmatpush3.bf16.msra.mxu1 %v1198_v5 }
  0x10   :  { %1193 = vmatprep.subr.msk.bf16.mxu0 %vm355_vm1, %v1199_v6  ;;  %1194 = vmatprep.subr.msk.bf16.mxu1 %vm355_vm1, %v1199_v6 }
  0x13   :  { %1122 = vmatpush3.bf16.msra.mxu0 %v357_v7  ;;  %1192 = vmatpush3.bf16.msra.mxu1 %v357_v7 }
  0x16   :  { %1124 = vmatmul.mubr.msk.bf16.vlgmr.msra.gmra.mrb[0].mxu0 %vm264_vm0, %v1201_v8  ;;  %1156 = vmatmul.mubr.msk.bf16.vlgmr.msra.gmra.mrb[0].mxu1 %vm264_vm0, %v1203_v9 }
  0x17   :  { %1127 = vmatprep.mubr.msk.bf16.mxu0 %vm264_vm0, %v1204_v10  ;;  %1159 = vmatprep.mubr.msk.bf16.mxu1 %vm264_vm0, %v1206_v11 }
  0x1e   :  { %1128 = vmatmul.mubr.msk.bf16.gmra.mrb[4].mxu0 %vm264_vm0, %v1205_v12  ;;  %1160 = vmatmul.mubr.msk.bf16.gmra.mrb[4].mxu1 %vm264_vm0, %v1207_v13 }
  0x1f   :  { %1131 = vmatprep.mubr.msk.bf16.mxu0 %vm264_vm0, %v1208_v14  ;;  %1163 = vmatprep.mubr.msk.bf16.mxu1 %vm264_vm0, %v1210_v15 }
  0x26   :  { %1132 = vmatmul.mubr.msk.bf16.gmra.mrb[8].mxu0 %vm264_vm0, %v1209_v16  ;;  %1164 = vmatmul.mubr.msk.bf16.gmra.mrb[8].mxu1 %vm264_vm0, %v1211_v17 }
  0x27   :  { %1135 = vmatprep.mubr.msk.bf16.mxu0 %vm264_vm0, %v1212_v18  ;;  %1167 = vmatprep.mubr.msk.bf16.mxu1 %vm264_vm0, %v1214_v19 }
  0x2e   :  { %1136 = vmatmul.mubr.msk.bf16.gmra.mrb[12].mxu0 %vm264_vm0, %v1213_v20  ;;  %1168 = vmatmul.mubr.msk.bf16.gmra.mrb[12].mxu1 %vm264_vm0, %v1215_v21 }
  0x2f   :  { %1139 = vmatprep.mubr.msk.bf16.mxu0 %vm264_vm0, %v1216_v22  ;;  %1171 = vmatprep.mubr.msk.bf16.mxu1 %vm264_vm0, %v1218_v23 }
  0x36   :  { %1140 = vmatmul.mubr.msk.bf16.gmra.mrb[16].mxu0 %vm264_vm0, %v1217_v24  ;;  %1172 = vmatmul.mubr.msk.bf16.gmra.mrb[16].mxu1 %vm264_vm0, %v1219_v25 }
  0x37   :  { %1143 = vmatprep.mubr.msk.bf16.mxu0 %vm264_vm0, %v1220_v26  ;;  %1175 = vmatprep.mubr.msk.bf16.mxu1 %vm264_vm0, %v1222_v27 }
  0x3e   :  { %1144 = vmatmul.mubr.msk.bf16.gmra.mrb[20].mxu0 %vm264_vm0, %v1221_v28  ;;  %1176 = vmatmul.mubr.msk.bf16.gmra.mrb[20].mxu1 %vm264_vm0, %v1223_v29 }
  0x3f   :  { %1147 = vmatprep.mubr.msk.bf16.mxu0 %vm264_vm0, %v1224_v30  ;;  %1179 = vmatprep.mubr.msk.bf16.mxu1 %vm264_vm0, %v1226_v31 }
  0x46   :  { %1148 = vmatmul.mubr.msk.bf16.gmra.mrb[24].mxu0 %vm264_vm0, %v1225_v32  ;;  %1180 = vmatmul.mubr.msk.bf16.gmra.mrb[24].mxu1 %vm264_vm0, %v1227_v33 }
  0x47   :  { %1151 = vmatprep.mubr.msk.bf16.mxu0 %vm264_vm0, %v1228_v34 }
  0x4e   :  { %1152 = vmatmul.mubr.msk.bf16.gmra.mrb[28].mxu0 %vm264_vm0, %v1229_v35 }
  0xe9   :  { %v1125_v37 = vpop.f32.mrb[0].mxu0  ;;  %v1157_v39 = vpop.f32.mrb[0].mxu1 }
  0xea   :  { %v641_v40 = vmul.f32 %v1125_v37, %v1393_v36  ;;  %v393_v41 = vpop.f32.mrb[1].mxu0  ;;  %v673_v42 = vmul.f32 %v1157_v39, %v1393_v36  ;;  %v521_v43 = vpop.f32.mrb[1].mxu1 }
  0xeb   :  { %v639_v44 = vmul.f32 %v1393_v36, %v393_v41  ;;  %v1126_v45 = vpop.f32.mrb[2].mxu0  ;;  %v671_v46 = vmul.f32 %v1393_v36, %v521_v43  ;;  %v1158_v47 = vpop.f32.mrb[2].mxu1 }
  0xec   :  { %v708_v48 = vadd.f32 %v1398_v38, %v641_v40  ;;  %v642_v49 = vmul.f32 %v1126_v45, %v1393_v36  ;;  %v396_v50 = vpop.f32.mrb[3].mxu0  ;;  %v740_v51 = vadd.f32 %v1398_v38, %v673_v42  ;;  %v674_v52 = vmul.f32 %v1158_v47, %v1393_v36  ;;  %v524_v53 = vpop.f32.mrb[3].mxu1 }
  0xed   :  { %v706_v54 = vadd.f32 %v1398_v38, %v639_v44  ;;  %v640_v55 = vmul.f32 %v1393_v36, %v396_v50  ;;  %v738_v56 = vadd.f32 %v1398_v38, %v671_v46  ;;  %v672_v57 = vmul.f32 %v1393_v36, %v524_v53 }
  0xee   :  { %vm768_vm3 = vcmp.ge.f32.partialorder %v708_v48, 0.0  ;;  %v828_v58 = vmul.f32 0.01, %v708_v48  ;;  %v709_v59 = vadd.f32 %v1398_v38, %v642_v49  ;;  %vm800_vm4 = vcmp.ge.f32.partialorder %v740_v51, 0.0 }
  0xef   :  { %vm766_vm5 = vcmp.ge.f32.partialorder %v706_v54, 0.0  ;;  %v826_v60 = vmul.f32 0.01, %v706_v54  ;;  %v707_v61 = vadd.f32 %v1398_v38, %v640_v55  ;;  %v860_v62 = vmul.f32 0.01, %v740_v51 }
  0xf0   :  { %v888_v63 = vsel %vm768_vm3, %v708_v48, %v828_v58  ;;  %vm769_vm6 = vcmp.ge.f32.partialorder %v709_v59, 0.0  ;;  %v829_v0 = vmul.f32 0.01, %v709_v59  ;;  %vm798_vm7 = vcmp.ge.f32.partialorder %v738_v56, 0.0 }
  0xf1   :  { %949 = vst.msk [vmem:[%s1806_s4 + $0x10] sm:$0xff] %vm946_vm2, %v888_v63  ;;  %v886_v1 = vsel %vm766_vm5, %v706_v54, %v826_v60  ;;  %vm767_vm8 = vcmp.ge.f32.partialorder %v707_v61, 0.0  ;;  %v827_v2 = vmul.f32 0.01, %v707_v61  ;;  %v920_v3 = vsel %vm800_vm4, %v740_v51, %v860_v62  ;;  %v1129_v4 = vpop.f32.mrb[4].mxu0  ;;  %v1161_v5 = vpop.f32.mrb[4].mxu1 }
  0xf2   :  { %947 = vst.msk [vmem:[%s1806_s4] sm:$0xff] %vm946_vm2, %v886_v1  ;;  %v889_v6 = vsel %vm769_vm6, %v709_v59, %v829_v0  ;;  %981 = vst.msk [vmem:[%s1806_s4 + $0x110] sm:$0xff] %vm946_vm2, %v920_v3  ;;  %v858_v7 = vmul.f32 0.01, %v738_v56  ;;  %v741_v8 = vadd.f32 %v1398_v38, %v674_v52  ;;  %v739_v9 = vadd.f32 %v1398_v38, %v672_v57  ;;  %v409_v10 = vpop.f32.mrb[5].mxu0  ;;  %v537_v11 = vpop.f32.mrb[5].mxu1 }
  0xf3   :  { %950 = vst.msk [vmem:[%s1806_s4 + $0x18] sm:$0xff] %vm946_vm2, %v889_v6  ;;  %v887_v12 = vsel %vm767_vm8, %v707_v61, %v827_v2  ;;  %v645_v13 = vmul.f32 %v1129_v4, %v1393_v36  ;;  %v643_v14 = vmul.f32 %v1393_v36, %v409_v10  ;;  %v1130_v15 = vpop.f32.mrb[6].mxu0  ;;  %v677_v16 = vmul.f32 %v1161_v5, %v1393_v36  ;;  %v1162_v17 = vpop.f32.mrb[6].mxu1 }
  0xf4   :  { %948 = vst.msk [vmem:[%s1806_s4 + $0x8] sm:$0xff] %vm946_vm2, %v887_v12  ;;  %v918_v18 = vsel %vm798_vm7, %v738_v56, %v858_v7  ;;  %vm801_vm9 = vcmp.ge.f32.partialorder %v741_v8, 0.0  ;;  %v861_v19 = vmul.f32 0.01, %v741_v8  ;;  %vm799_vm10 = vcmp.ge.f32.partialorder %v739_v9, 0.0  ;;  %v412_v20 = vpop.f32.mrb[7].mxu0 }
  0xf5   :  { %v540_v21 = vpop.f32.mrb[7].mxu1  ;;  %979 = vst.msk [vmem:[%s1806_s4 + $0x100] sm:$0xff] %vm946_vm2, %v918_v18  ;;  %v859_v22 = vmul.f32 0.01, %v739_v9  ;;  %v712_v23 = vadd.f32 %v1398_v38, %v645_v13  ;;  %v710_v24 = vadd.f32 %v1398_v38, %v643_v14  ;;  %v646_v25 = vmul.f32 %v1130_v15, %v1393_v36 }
  0xf6   :  { %v921_v26 = vsel %vm801_vm9, %v741_v8, %v861_v19  ;;  %v644_v27 = vmul.f32 %v1393_v36, %v412_v20  ;;  %v744_v28 = vadd.f32 %v1398_v38, %v677_v16  ;;  %v675_v29 = vmul.f32 %v1393_v36, %v537_v11 }
  0xf7   :  { %982 = vst.msk [vmem:[%s1806_s4 + $0x118] sm:$0xff] %vm946_vm2, %v921_v26  ;;  %v919_v30 = vsel %vm799_vm10, %v739_v9, %v859_v22  ;;  %vm772_vm11 = vcmp.ge.f32.partialorder %v712_v23, 0.0  ;;  %v832_v31 = vmul.f32 0.01, %v712_v23  ;;  %vm770_vm12 = vcmp.ge.f32.partialorder %v710_v24, 0.0 }
  0xf8   :  { %980 = vst.msk [vmem:[%s1806_s4 + $0x108] sm:$0xff] %vm946_vm2, %v919_v30  ;;  %v830_v32 = vmul.f32 0.01, %v710_v24  ;;  %v713_v33 = vadd.f32 %v1398_v38, %v646_v25  ;;  %v711_v34 = vadd.f32 %v1398_v38, %v644_v27  ;;  %vm804_vm13 = vcmp.ge.f32.partialorder %v744_v28, 0.0 }
  0xf9   :  { %v892_v35 = vsel %vm772_vm11, %v712_v23, %v832_v31  ;;  %v864_v37 = vmul.f32 0.01, %v744_v28  ;;  %v742_v39 = vadd.f32 %v1398_v38, %v675_v29  ;;  %v678_v40 = vmul.f32 %v1162_v17, %v1393_v36  ;;  %v1133_v41 = vpop.f32.mrb[8].mxu0  ;;  %v1165_v42 = vpop.f32.mrb[8].mxu1 }
  0xfa   :  { %953 = vst.msk [vmem:[%s1806_s4 + $0x30] sm:$0xff] %vm946_vm2, %v892_v35  ;;  %v890_v43 = vsel %vm770_vm12, %v710_v24, %v830_v32  ;;  %vm773_vm14 = vcmp.ge.f32.partialorder %v713_v33, 0.0  ;;  %v833_v44 = vmul.f32 0.01, %v713_v33  ;;  %vm771_vm15 = vcmp.ge.f32.partialorder %v711_v34, 0.0  ;;  %v425_v45 = vpop.f32.mrb[9].mxu0 }
  0xfb   :  { %v553_v46 = vpop.f32.mrb[9].mxu1  ;;  %951 = vst.msk [vmem:[%s1806_s4 + $0x20] sm:$0xff] %vm946_vm2, %v890_v43  ;;  %v831_v47 = vmul.f32 0.01, %v711_v34  ;;  %v924_v48 = vsel %vm804_vm13, %v744_v28, %v864_v37  ;;  %vm802_vm0 = vcmp.ge.f32.partialorder %v742_v39, 0.0  ;;  %v1134_v50 = vpop.f32.mrb[10].mxu0  ;;  %v745_v52 = vadd.f32 %v1398_v38, %v678_v40 }
  0xfc   :  { %v862_v49 = vmul.f32 0.01, %v742_v39  ;;  %v893_v51 = vsel %vm773_vm14, %v713_v33, %v833_v44  ;;  %985 = vst.msk [vmem:[%s1806_s4 + $0x130] sm:$0xff] %vm946_vm2, %v924_v48  ;;  %v676_v53 = vmul.f32 %v1393_v36, %v540_v21  ;;  %v649_v54 = vmul.f32 %v1133_v41, %v1393_v36  ;;  %v428_v55 = vpop.f32.mrb[11].mxu0  ;;  %v1166_v56 = vpop.f32.mrb[10].mxu1 }
  0xfd   :  { %954 = vst.msk [vmem:[%s1806_s4 + $0x38] sm:$0xff] %vm946_vm2, %v893_v51  ;;  %v891_v57 = vsel %vm771_vm15, %v711_v34, %v831_v47  ;;  %v647_v59 = vmul.f32 %v1393_v36, %v425_v45  ;;  %v650_v60 = vmul.f32 %v1134_v50, %v1393_v36  ;;  %v556_v61 = vpop.f32.mrb[11].mxu1  ;;  %vm805_vm1 = vcmp.ge.f32.partialorder %v745_v52, 0.0 }
  0xfe   :  { %v922_v58 = vsel %vm802_vm0, %v742_v39, %v862_v49  ;;  %952 = vst.msk [vmem:[%s1806_s4 + $0x28] sm:$0xff] %vm946_vm2, %v891_v57  ;;  %v865_v62 = vmul.f32 0.01, %v745_v52  ;;  %v743_v63 = vadd.f32 %v1398_v38, %v676_v53  ;;  %v716_v0 = vadd.f32 %v1398_v38, %v649_v54 }
  0xff   :  { %983 = vst.msk [vmem:[%s1806_s4 + $0x120] sm:$0xff] %vm946_vm2, %v922_v58  ;;  %v714_v1 = vadd.f32 %v1398_v38, %v647_v59  ;;  %v717_v2 = vadd.f32 %v1398_v38, %v650_v60  ;;  %v648_v3 = vmul.f32 %v1393_v36, %v428_v55  ;;  %v681_v4 = vmul.f32 %v1165_v42, %v1393_v36 }
 0x100   :  { %v925_v5 = vsel %vm805_vm1, %v745_v52, %v865_v62  ;;  %vm803_vm3 = vcmp.ge.f32.partialorder %v743_v63, 0.0  ;;  %v863_v6 = vmul.f32 0.01, %v743_v63  ;;  %vm776_vm4 = vcmp.ge.f32.partialorder %v716_v0, 0.0 }
 0x101   :  { %986 = vst.msk [vmem:[%s1806_s4 + $0x138] sm:$0xff] %vm946_vm2, %v925_v5  ;;  %v836_v7 = vmul.f32 0.01, %v716_v0  ;;  %vm774_vm5 = vcmp.ge.f32.partialorder %v714_v1, 0.0  ;;  %v834_v8 = vmul.f32 0.01, %v714_v1  ;;  %v715_v11 = vadd.f32 %v1398_v38, %v648_v3 }
 0x102   :  { %vm777_vm6 = vcmp.ge.f32.partialorder %v717_v2, 0.0  ;;  %v923_v9 = vsel %vm803_vm3, %v743_v63, %v863_v6  ;;  %v837_v10 = vmul.f32 0.01, %v717_v2  ;;  %v748_v12 = vadd.f32 %v1398_v38, %v681_v4  ;;  %v1137_v13 = vpop.f32.mrb[12].mxu0  ;;  %v1169_v14 = vpop.f32.mrb[12].mxu1 }
 0x103   :  { %984 = vst.msk [vmem:[%s1806_s4 + $0x128] sm:$0xff] %vm946_vm2, %v923_v9  ;;  %v896_v15 = vsel %vm776_vm4, %v716_v0, %v836_v7  ;;  %v894_v16 = vsel %vm774_vm5, %v714_v1, %v834_v8  ;;  %v679_v17 = vmul.f32 %v1393_v36, %v553_v46  ;;  %v682_v18 = vmul.f32 %v1166_v56, %v1393_v36  ;;  %v441_v19 = vpop.f32.mrb[13].mxu0  ;;  %v569_v20 = vpop.f32.mrb[13].mxu1 }
 0x104   :  { %957 = vst.msk [vmem:[%s1806_s4 + $0x50] sm:$0xff] %vm946_vm2, %v896_v15  ;;  %955 = vst.msk [vmem:[%s1806_s4 + $0x40] sm:$0xff] %vm946_vm2, %v894_v16  ;;  %v897_v21 = vsel %vm777_vm6, %v717_v2, %v837_v10  ;;  %vm775_vm7 = vcmp.ge.f32.partialorder %v715_v11, 0.0  ;;  %v835_v22 = vmul.f32 0.01, %v715_v11  ;;  %vm808_vm8 = vcmp.ge.f32.partialorder %v748_v12, 0.0 }
 0x105   :  { %v1138_v23 = vpop.f32.mrb[14].mxu0  ;;  %v1170_v24 = vpop.f32.mrb[14].mxu1  ;;  %958 = vst.msk [vmem:[%s1806_s4 + $0x58] sm:$0xff] %vm946_vm2, %v897_v21  ;;  %v868_v25 = vmul.f32 0.01, %v748_v12  ;;  %v746_v26 = vadd.f32 %v1398_v38, %v679_v17  ;;  %v749_v27 = vadd.f32 %v1398_v38, %v682_v18  ;;  %v680_v28 = vmul.f32 %v1393_v36, %v556_v61 }
 0x106   :  { %v444_v29 = vpop.f32.mrb[15].mxu0  ;;  %v572_v30 = vpop.f32.mrb[15].mxu1  ;;  %v895_v31 = vsel %vm775_vm7, %v715_v11, %v835_v22  ;;  %v653_v32 = vmul.f32 %v1137_v13, %v1393_v36  ;;  %v651_v33 = vmul.f32 %v1393_v36, %v441_v19  ;;  %v654_v34 = vmul.f32 %v1138_v23, %v1393_v36 }
 0x107   :  { %956 = vst.msk [vmem:[%s1806_s4 + $0x48] sm:$0xff] %vm946_vm2, %v895_v31  ;;  %v928_v35 = vsel %vm808_vm8, %v748_v12, %v868_v25  ;;  %vm806_vm9 = vcmp.ge.f32.partialorder %v746_v26, 0.0  ;;  %v866_v37 = vmul.f32 0.01, %v746_v26  ;;  %vm809_vm10 = vcmp.ge.f32.partialorder %v749_v27, 0.0 }
 0x108   :  { %989 = vst.msk [vmem:[%s1806_s4 + $0x150] sm:$0xff] %vm946_vm2, %v928_v35  ;;  %v869_v39 = vmul.f32 0.01, %v749_v27  ;;  %v747_v40 = vadd.f32 %v1398_v38, %v680_v28  ;;  %v720_v41 = vadd.f32 %v1398_v38, %v653_v32  ;;  %v718_v42 = vadd.f32 %v1398_v38, %v651_v33 }
 0x109   :  { %v926_v43 = vsel %vm806_vm9, %v746_v26, %v866_v37  ;;  %v721_v44 = vadd.f32 %v1398_v38, %v654_v34  ;;  %v652_v45 = vmul.f32 %v1393_v36, %v444_v29  ;;  %v685_v46 = vmul.f32 %v1169_v14, %v1393_v36  ;;  %v1141_v47 = vpop.f32.mrb[16].mxu0  ;;  %v1173_v48 = vpop.f32.mrb[16].mxu1 }
 0x10a   :  { %987 = vst.msk [vmem:[%s1806_s4 + $0x140] sm:$0xff] %vm946_vm2, %v926_v43  ;;  %v929_v49 = vsel %vm809_vm10, %v749_v27, %v869_v39  ;;  %vm807_vm11 = vcmp.ge.f32.partialorder %v747_v40, 0.0  ;;  %v867_v50 = vmul.f32 0.01, %v747_v40  ;;  %vm780_vm12 = vcmp.ge.f32.partialorder %v720_v41, 0.0  ;;  %v457_v51 = vpop.f32.mrb[17].mxu0 }
 0x10b   :  { %v1548_v52 = vpop.f32.mrb[17].mxu1  ;;  %990 = vst.msk [vmem:[%s1806_s4 + $0x158] sm:$0xff] %vm946_vm2, %v929_v49  ;;  %v840_v53 = vmul.f32 0.01, %v720_v41  ;;  %vm778_vm13 = vcmp.ge.f32.partialorder %v718_v42, 0.0  ;;  %vm781_vm14 = vcmp.ge.f32.partialorder %v721_v44, 0.0  ;;  %v719_v57 = vadd.f32 %v1398_v38, %v652_v45 }
 0x10c   :  { %v838_v54 = vmul.f32 0.01, %v718_v42  ;;  %v927_v55 = vsel %vm807_vm11, %v747_v40, %v867_v50  ;;  %v841_v56 = vmul.f32 0.01, %v721_v44  ;;  %v752_v58 = vadd.f32 %v1398_v38, %v685_v46  ;;  %v1142_v59 = vpop.f32.mrb[18].mxu0  ;;  %v1556_v60 = vpop.f32.mrb[18].mxu1 }
 0x10d   :  { %988 = vst.msk [vmem:[%s1806_s4 + $0x148] sm:$0xff] %vm946_vm2, %v927_v55  ;;  %v900_v61 = vsel %vm780_vm12, %v720_v41, %v840_v53  ;;  %v683_v63 = vmul.f32 %v1393_v36, %v569_v20  ;;  %v686_v0 = vmul.f32 %v1170_v24, %v1393_v36  ;;  %v460_v1 = vpop.f32.mrb[19].mxu0  ;;  %v1564_v2 = vpop.f32.mrb[19].mxu1  ;;  %vm779_vm15 = vcmp.ge.f32.partialorder %v719_v57, 0.0 }
 0x10e   :  { %v898_v62 = vsel %vm778_vm13, %v718_v42, %v838_v54  ;;  %961 = vst.msk [vmem:[%s1806_s4 + $0x70] sm:$0xff] %vm946_vm2, %v900_v61  ;;  %v901_v3 = vsel %vm781_vm14, %v721_v44, %v841_v56  ;;  %v839_v4 = vmul.f32 0.01, %v719_v57  ;;  %vm812_vm0 = vcmp.ge.f32.partialorder %v752_v58, 0.0 }
 0x10f   :  { %959 = vst.msk [vmem:[%s1806_s4 + $0x60] sm:$0xff] %vm946_vm2, %v898_v62  ;;  %962 = vst.msk [vmem:[%s1806_s4 + $0x78] sm:$0xff] %vm946_vm2, %v901_v3  ;;  %v872_v5 = vmul.f32 0.01, %v752_v58  ;;  %v750_v6 = vadd.f32 %v1398_v38, %v683_v63  ;;  %v753_v7 = vadd.f32 %v1398_v38, %v686_v0  ;;  %v684_v8 = vmul.f32 %v1393_v36, %v572_v30 }
 0x110   :  { %v899_v9 = vsel %vm779_vm15, %v719_v57, %v839_v4  ;;  %v657_v10 = vmul.f32 %v1141_v47, %v1393_v36  ;;  %v655_v11 = vmul.f32 %v1393_v36, %v457_v51  ;;  %v658_v12 = vmul.f32 %v1142_v59, %v1393_v36 }
 0x111   :  { %960 = vst.msk [vmem:[%s1806_s4 + $0x68] sm:$0xff] %vm946_vm2, %v899_v9  ;;  %v932_v13 = vsel %vm812_vm0, %v752_v58, %v872_v5  ;;  %vm810_vm1 = vcmp.ge.f32.partialorder %v750_v6, 0.0  ;;  %v870_v14 = vmul.f32 0.01, %v750_v6  ;;  %vm813_vm3 = vcmp.ge.f32.partialorder %v753_v7, 0.0  ;;  %v1145_v15 = vpop.f32.mrb[20].mxu0 }
 0x112   :  { %v1589_v16 = vpop.f32.mrb[20].mxu1  ;;  %993 = vst.msk [vmem:[%s1806_s4 + $0x170] sm:$0xff] %vm946_vm2, %v932_v13  ;;  %v873_v17 = vmul.f32 0.01, %v753_v7  ;;  %v751_v18 = vadd.f32 %v1398_v38, %v684_v8  ;;  %v724_v19 = vadd.f32 %v1398_v38, %v657_v10  ;;  %v722_v20 = vadd.f32 %v1398_v38, %v655_v11  ;;  %v473_v21 = vpop.f32.mrb[21].mxu0 }
 0x113   :  { %v1598_v22 = vpop.f32.mrb[21].mxu1  ;;  %v930_v23 = vsel %vm810_vm1, %v750_v6, %v870_v14  ;;  %v725_v24 = vadd.f32 %v1398_v38, %v658_v12  ;;  %v656_v25 = vmul.f32 %v1393_v36, %v460_v1  ;;  %v689_v26 = vmul.f32 %v1173_v48, %v1393_v36  ;;  %v1146_v27 = vpop.f32.mrb[22].mxu0 }
 0x114   :  { %v1603_v28 = vpop.f32.mrb[22].mxu1  ;;  %991 = vst.msk [vmem:[%s1806_s4 + $0x160] sm:$0xff] %vm946_vm2, %v930_v23  ;;  %v933_v29 = vsel %vm813_vm3, %v753_v7, %v873_v17  ;;  %vm811_vm4 = vcmp.ge.f32.partialorder %v751_v18, 0.0  ;;  %v871_v30 = vmul.f32 0.01, %v751_v18  ;;  %vm784_vm5 = vcmp.ge.f32.partialorder %v724_v19, 0.0 }
 0x115   :  { %v476_v31 = vpop.f32.mrb[23].mxu0  ;;  %v1610_v32 = vpop.f32.mrb[23].mxu1  ;;  %994 = vst.msk [vmem:[%s1806_s4 + $0x178] sm:$0xff] %vm946_vm2, %v933_v29  ;;  %v844_v33 = vmul.f32 0.01, %v724_v19  ;;  %vm782_vm6 = vcmp.ge.f32.partialorder %v722_v20, 0.0  ;;  %v723_v39 = vadd.f32 %v1398_v38, %v656_v25  ;;  %v756_v40 = vadd.f32 %v1398_v38, %v689_v26 }
 0x116   :  { %v842_v34 = vmul.f32 0.01, %v722_v20  ;;  %vm785_vm7 = vcmp.ge.f32.partialorder %v725_v24, 0.0  ;;  %v931_v35 = vsel %vm811_vm4, %v751_v18, %v871_v30  ;;  %v845_v37 = vmul.f32 0.01, %v725_v24 }
 0x117   :  { %992 = vst.msk [vmem:[%s1806_s4 + $0x168] sm:$0xff] %vm946_vm2, %v931_v35  ;;  %v904_v41 = vsel %vm784_vm5, %v724_v19, %v844_v33  ;;  %v687_v43 = vmul.f32 %v1393_v36, %v1548_v52  ;;  %v690_v44 = vmul.f32 %v1556_v60, %v1393_v36  ;;  %vm783_vm8 = vcmp.ge.f32.partialorder %v723_v39, 0.0 }
 0x118   :  { %v902_v42 = vsel %vm782_vm6, %v722_v20, %v842_v34  ;;  %965 = vst.msk [vmem:[%s1806_s4 + $0x90] sm:$0xff] %vm946_vm2, %v904_v41  ;;  %v905_v45 = vsel %vm785_vm7, %v725_v24, %v845_v37  ;;  %v843_v46 = vmul.f32 0.01, %v723_v39  ;;  %vm816_vm9 = vcmp.ge.f32.partialorder %v756_v40, 0.0 }
 0x119   :  { %963 = vst.msk [vmem:[%s1806_s4 + $0x80] sm:$0xff] %vm946_vm2, %v902_v42  ;;  %966 = vst.msk [vmem:[%s1806_s4 + $0x98] sm:$0xff] %vm946_vm2, %v905_v45  ;;  %v876_v47 = vmul.f32 0.01, %v756_v40  ;;  %v754_v48 = vadd.f32 %v1398_v38, %v687_v43  ;;  %v757_v49 = vadd.f32 %v1398_v38, %v690_v44  ;;  %v688_v50 = vmul.f32 %v1393_v36, %v1564_v2  ;;  %v1149_v51 = vpop.f32.mrb[24].mxu0  ;;  %v1642_v52 = vpop.f32.mrb[24].mxu1 }
 0x11a   :  { %v903_v53 = vsel %vm783_vm8, %v723_v39, %v843_v46  ;;  %v661_v54 = vmul.f32 %v1145_v15, %v1393_v36  ;;  %v659_v55 = vmul.f32 %v1393_v36, %v473_v21  ;;  %v662_v56 = vmul.f32 %v1146_v27, %v1393_v36  ;;  %v489_v57 = vpop.f32.mrb[25].mxu0  ;;  %v1647_v58 = vpop.f32.mrb[25].mxu1 }
 0x11b   :  { %964 = vst.msk [vmem:[%s1806_s4 + $0x88] sm:$0xff] %vm946_vm2, %v903_v53  ;;  %v936_v59 = vsel %vm816_vm9, %v756_v40, %v876_v47  ;;  %vm814_vm10 = vcmp.ge.f32.partialorder %v754_v48, 0.0  ;;  %v874_v60 = vmul.f32 0.01, %v754_v48  ;;  %vm817_vm11 = vcmp.ge.f32.partialorder %v757_v49, 0.0  ;;  %v1150_v61 = vpop.f32.mrb[26].mxu0 }
 0x11c   :  { %v1653_v62 = vpop.f32.mrb[26].mxu1  ;;  %997 = vst.msk [vmem:[%s1806_s4 + $0x190] sm:$0xff] %vm946_vm2, %v936_v59  ;;  %v877_v63 = vmul.f32 0.01, %v757_v49  ;;  %v755_v0 = vadd.f32 %v1398_v38, %v688_v50  ;;  %v728_v1 = vadd.f32 %v1398_v38, %v661_v54  ;;  %v726_v2 = vadd.f32 %v1398_v38, %v659_v55  ;;  %v492_v3 = vpop.f32.mrb[27].mxu0 }
 0x11d   :  { %v1662_v4 = vpop.f32.mrb[27].mxu1  ;;  %v934_v5 = vsel %vm814_vm10, %v754_v48, %v874_v60  ;;  %v729_v6 = vadd.f32 %v1398_v38, %v662_v56  ;;  %v660_v7 = vmul.f32 %v1393_v36, %v476_v31  ;;  %v693_v8 = vmul.f32 %v1589_v16, %v1393_v36 }
 0x11e   :  { %995 = vst.msk [vmem:[%s1806_s4 + $0x180] sm:$0xff] %vm946_vm2, %v934_v5  ;;  %v937_v9 = vsel %vm817_vm11, %v757_v49, %v877_v63  ;;  %vm815_vm12 = vcmp.ge.f32.partialorder %v755_v0, 0.0  ;;  %v875_v10 = vmul.f32 0.01, %v755_v0  ;;  %vm788_vm13 = vcmp.ge.f32.partialorder %v728_v1, 0.0 }
 0x11f   :  { %998 = vst.msk [vmem:[%s1806_s4 + $0x198] sm:$0xff] %vm946_vm2, %v937_v9  ;;  %v848_v11 = vmul.f32 0.01, %v728_v1  ;;  %vm786_vm14 = vcmp.ge.f32.partialorder %v726_v2, 0.0  ;;  %v846_v12 = vmul.f32 0.01, %v726_v2  ;;  %v727_v15 = vadd.f32 %v1398_v38, %v660_v7 }
 0x120   :  { %vm789_vm15 = vcmp.ge.f32.partialorder %v729_v6, 0.0  ;;  %v935_v13 = vsel %vm815_vm12, %v755_v0, %v875_v10  ;;  %v849_v14 = vmul.f32 0.01, %v729_v6  ;;  %v760_v16 = vadd.f32 %v1398_v38, %v693_v8 }
 0x121   :  { %996 = vst.msk [vmem:[%s1806_s4 + $0x188] sm:$0xff] %vm946_vm2, %v935_v13  ;;  %v908_v17 = vsel %vm788_vm13, %v728_v1, %v848_v11  ;;  %v906_v18 = vsel %vm786_vm14, %v726_v2, %v846_v12  ;;  %v691_v19 = vmul.f32 %v1393_v36, %v1598_v22  ;;  %v694_v20 = vmul.f32 %v1603_v28, %v1393_v36  ;;  %v1686_v21 = vpop.f32.mrb[28].mxu0 }
 0x122   :  { %969 = vst.msk [vmem:[%s1806_s4 + $0xb0] sm:$0xff] %vm946_vm2, %v908_v17  ;;  %967 = vst.msk [vmem:[%s1806_s4 + $0xa0] sm:$0xff] %vm946_vm2, %v906_v18  ;;  %v909_v23 = vsel %vm789_vm15, %v729_v6, %v849_v14  ;;  %vm787_vm0 = vcmp.ge.f32.partialorder %v727_v15, 0.0  ;;  %v847_v24 = vmul.f32 0.01, %v727_v15  ;;  %vm820_vm1 = vcmp.ge.f32.partialorder %v760_v16, 0.0 }
 0x123   :  { %v505_v22 = vpop.f32.mrb[29].mxu0  ;;  %970 = vst.msk [vmem:[%s1806_s4 + $0xb8] sm:$0xff] %vm946_vm2, %v909_v23  ;;  %v880_v25 = vmul.f32 0.01, %v760_v16  ;;  %v758_v26 = vadd.f32 %v1398_v38, %v691_v19  ;;  %v761_v27 = vadd.f32 %v1398_v38, %v694_v20  ;;  %v692_v28 = vmul.f32 %v1393_v36, %v1610_v32 }
 0x124   :  { %v1154_v29 = vpop.f32.mrb[30].mxu0  ;;  %v907_v30 = vsel %vm787_vm0, %v727_v15, %v847_v24  ;;  %v665_v31 = vmul.f32 %v1149_v51, %v1393_v36  ;;  %v663_v33 = vmul.f32 %v1393_v36, %v489_v57  ;;  %v666_v34 = vmul.f32 %v1150_v61, %v1393_v36 }
 0x125   :  { %v508_v35 = vpop.f32.mrb[31].mxu0  ;;  %968 = vst.msk [vmem:[%s1806_s4 + $0xa8] sm:$0xff] %vm946_vm2, %v907_v30  ;;  %v940_v37 = vsel %vm820_vm1, %v760_v16, %v880_v25  ;;  %vm818_vm3 = vcmp.ge.f32.partialorder %v758_v26, 0.0  ;;  %v878_v39 = vmul.f32 0.01, %v758_v26  ;;  %vm821_vm4 = vcmp.ge.f32.partialorder %v761_v27, 0.0 }
 0x126   :  { %1001 = vst.msk [vmem:[%s1806_s4 + $0x1b0] sm:$0xff] %vm946_vm2, %v940_v37  ;;  %v881_v32 = vmul.f32 0.01, %v761_v27  ;;  %v759_v40 = vadd.f32 %v1398_v38, %v692_v28  ;;  %v732_v41 = vadd.f32 %v1398_v38, %v665_v31  ;;  %v730_v42 = vadd.f32 %v1398_v38, %v663_v33 }
 0x127   :  { %v938_v43 = vsel %vm818_vm3, %v758_v26, %v878_v39  ;;  %v733_v44 = vadd.f32 %v1398_v38, %v666_v34  ;;  %v664_v45 = vmul.f32 %v1393_v36, %v492_v3  ;;  %v697_v46 = vmul.f32 %v1642_v52, %v1393_v36 }
 0x128   :  { %999 = vst.msk [vmem:[%s1806_s4 + $0x1a0] sm:$0xff] %vm946_vm2, %v938_v43  ;;  %v941_v47 = vsel %vm821_vm4, %v761_v27, %v881_v32  ;;  %vm819_vm5 = vcmp.ge.f32.partialorder %v759_v40, 0.0  ;;  %v879_v48 = vmul.f32 0.01, %v759_v40  ;;  %vm792_vm6 = vcmp.ge.f32.partialorder %v732_v41, 0.0 }
 0x129   :  { %1002 = vst.msk [vmem:[%s1806_s4 + $0x1b8] sm:$0xff] %vm946_vm2, %v941_v47  ;;  %v852_v49 = vmul.f32 0.01, %v732_v41  ;;  %vm790_vm7 = vcmp.ge.f32.partialorder %v730_v42, 0.0  ;;  %v850_v50 = vmul.f32 0.01, %v730_v42  ;;  %v731_v53 = vadd.f32 %v1398_v38, %v664_v45 }
 0x12a   :  { %vm793_vm8 = vcmp.ge.f32.partialorder %v733_v44, 0.0  ;;  %v939_v51 = vsel %vm819_vm5, %v759_v40, %v879_v48  ;;  %v853_v52 = vmul.f32 0.01, %v733_v44  ;;  %v764_v54 = vadd.f32 %v1398_v38, %v697_v46 }
 0x12b   :  { %1000 = vst.msk [vmem:[%s1806_s4 + $0x1a8] sm:$0xff] %vm946_vm2, %v939_v51  ;;  %v912_v55 = vsel %vm792_vm6, %v732_v41, %v852_v49  ;;  %v910_v56 = vsel %vm790_vm7, %v730_v42, %v850_v50  ;;  %v695_v57 = vmul.f32 %v1393_v36, %v1647_v58  ;;  %v698_v59 = vmul.f32 %v1653_v62, %v1393_v36 }
 0x12c   :  { %973 = vst.msk [vmem:[%s1806_s4 + $0xd0] sm:$0xff] %vm946_vm2, %v912_v55  ;;  %971 = vst.msk [vmem:[%s1806_s4 + $0xc0] sm:$0xff] %vm946_vm2, %v910_v56  ;;  %v913_v60 = vsel %vm793_vm8, %v733_v44, %v853_v52  ;;  %vm791_vm9 = vcmp.ge.f32.partialorder %v731_v53, 0.0  ;;  %v851_v61 = vmul.f32 0.01, %v731_v53  ;;  %vm824_vm10 = vcmp.ge.f32.partialorder %v764_v54, 0.0 }
 0x12d   :  { %974 = vst.msk [vmem:[%s1806_s4 + $0xd8] sm:$0xff] %vm946_vm2, %v913_v60  ;;  %v884_v58 = vmul.f32 0.01, %v764_v54  ;;  %v762_v62 = vadd.f32 %v1398_v38, %v695_v57  ;;  %v765_v63 = vadd.f32 %v1398_v38, %v698_v59  ;;  %v696_v0 = vmul.f32 %v1393_v36, %v1662_v4 }
 0x12e   :  { %v911_v1 = vsel %vm791_vm9, %v731_v53, %v851_v61  ;;  %v669_v2 = vmul.f32 %v1686_v21, %v1393_v36  ;;  %v667_v3 = vmul.f32 %v1393_v36, %v505_v22  ;;  %v670_v5 = vmul.f32 %v1154_v29, %v1393_v36 }
 0x12f   :  { %972 = vst.msk [vmem:[%s1806_s4 + $0xc8] sm:$0xff] %vm946_vm2, %v911_v1  ;;  %v944_v6 = vsel %vm824_vm10, %v764_v54, %v884_v58  ;;  %vm822_vm11 = vcmp.ge.f32.partialorder %v762_v62, 0.0  ;;  %v882_v7 = vmul.f32 0.01, %v762_v62  ;;  %vm825_vm12 = vcmp.ge.f32.partialorder %v765_v63, 0.0 }
 0x130   :  { %1005 = vst.msk [vmem:[%s1806_s4 + $0x1d0] sm:$0xff] %vm946_vm2, %v944_v6  ;;  %v885_v4 = vmul.f32 0.01, %v765_v63  ;;  %v763_v8 = vadd.f32 %v1398_v38, %v696_v0  ;;  %v736_v9 = vadd.f32 %v1398_v38, %v669_v2  ;;  %v734_v10 = vadd.f32 %v1398_v38, %v667_v3 }
 0x131   :  { %v942_v11 = vsel %vm822_vm11, %v762_v62, %v882_v7  ;;  %v737_v12 = vadd.f32 %v1398_v38, %v670_v5  ;;  %v668_v13 = vmul.f32 %v1393_v36, %v508_v35 }
 0x132   :  { %1003 = vst.msk [vmem:[%s1806_s4 + $0x1c0] sm:$0xff] %vm946_vm2, %v942_v11  ;;  %v945_v14 = vsel %vm825_vm12, %v765_v63, %v885_v4  ;;  %vm823_vm13 = vcmp.ge.f32.partialorder %v763_v8, 0.0  ;;  %v883_v15 = vmul.f32 0.01, %v763_v8  ;;  %vm796_vm14 = vcmp.ge.f32.partialorder %v736_v9, 0.0 }
 0x133   :  { %1006 = vst.msk [vmem:[%s1806_s4 + $0x1d8] sm:$0xff] %vm946_vm2, %v945_v14  ;;  %v856_v16 = vmul.f32 0.01, %v736_v9  ;;  %vm794_vm15 = vcmp.ge.f32.partialorder %v734_v10, 0.0  ;;  %v854_v17 = vmul.f32 0.01, %v734_v10  ;;  %v735_v19 = vadd.f32 %v1398_v38, %v668_v13 }
 0x134   :  { %vm797_vm0 = vcmp.ge.f32.partialorder %v737_v12, 0.0  ;;  %v943_v18 = vsel %vm823_vm13, %v763_v8, %v883_v15  ;;  %v857_v36 = vmul.f32 0.01, %v737_v12 }
 0x135   :  { %1004 = vst.msk [vmem:[%s1806_s4 + $0x1c8] sm:$0xff] %vm946_vm2, %v943_v18  ;;  %v916_v20 = vsel %vm796_vm14, %v736_v9, %v856_v16  ;;  %v914_v21 = vsel %vm794_vm15, %v734_v10, %v854_v17  ;;  %vm795_vm1 = vcmp.ge.f32.partialorder %v735_v19, 0.0  ;;  %v855_v38 = vmul.f32 0.01, %v735_v19 }
 0x136   :  { %977 = vst.msk [vmem:[%s1806_s4 + $0xf0] sm:$0xff] %vm946_vm2, %v916_v20  ;;  %975 = vst.msk [vmem:[%s1806_s4 + $0xe0] sm:$0xff] %vm946_vm2, %v914_v21  ;;  %v917_v23 = vsel %vm797_vm0, %v737_v12, %v857_v36 }
 0x137   :  { %978 = vst.msk [vmem:[%s1806_s4 + $0xf8] sm:$0xff] %vm946_vm2, %v917_v23  ;;  %v915_v24 = vsel %vm795_vm1, %v735_v19, %v855_v38 }
 0x138   :  { %976 = vst.msk [vmem:[%s1806_s4 + $0xe8] sm:$0xff] %vm946_vm2, %v915_v24 }

// kernel: fwd.6
= control target key start
LH: loop header
LB: loop body
LE: loop exit
PB: predicated region body
PF: predicated region fallthrough
CT: control target
= control target key end

     0   :  { %vm236_vm0 = vcmask 130048   ;;  %vm914_vm1 = vcmask 261120   ;;  %s1732_s1 = inlined_call_operand.vmem [shape: bf16[16,32], index: 1, kind: input, shape index: {}]   ;;  %s1733_s0 = inlined_call_operand.vmem [shape: bf16[480,16], index: 0, kind: input, shape index: {}]   ;;  %s1734_s2 = inlined_call_operand.vmem [shape: f32[1,32], index: 2, kind: input, shape index: {}]   ;;  %s1735_s3 = inlined_call_operand.vmem [shape: f32[1,32], index: 3, kind: input, shape index: {}]   ;;  %s1736_s4 = inlined_call_operand.vmem [shape: f32[480,32], index: 4, kind: output, shape index: {}]  }
   0x1   :  { %v1137_v0 = vld [vmem:[%s1732_s1] sm:$0xff]   ;;  %v1139_v2 = vld [vmem:[%s1733_s0 + $0x8] sm:$0xff]   ;;  %v1142_v5 = vld [vmem:[%s1733_s0 + $0x10] sm:$0xff]  }
   0x2   :  { %v1138_v1 = vld [vmem:[%s1733_s0] sm:$0xff]   ;;  %1073 = vmatprep.subr.bf16.mxu0 %v1137_v0  ;;  %1135 = vmatprep.subr.bf16.mxu1 %v1137_v0  ;;  %v1141_v4 = vld [vmem:[%s1733_s0 + $0x88] sm:$0xff]   ;;  %v1144_v6 = vld [vmem:[%s1733_s0 + $0x90] sm:$0xff]  }
   0x3   :  { %1074 = vmatpush3.bf16.msra.mxu0 %v1137_v0  ;;  %1075 = vmatprep.mubr.msk.bf16.mxu0 %vm236_vm0, %v1138_v1  ;;  %v1140_v3 = vld [vmem:[%s1733_s0 + $0x80] sm:$0xff]   ;;  %v1143_v7 = vld [vmem:[%s1733_s0 + $0x18] sm:$0xff]   ;;  %v1147_v11 = vld [vmem:[%s1733_s0 + $0x28] sm:$0xff]  }
   0x4   :  { %1136 = vmatpush3.bf16.msra.mxu1 %v1137_v0  ;;  %1107 = vmatprep.mubr.msk.bf16.mxu1 %vm236_vm0, %v1140_v3  ;;  %v1145_v8 = vld [vmem:[%s1733_s0 + $0x98] sm:$0xff]   ;;  %v1146_v9 = vld [vmem:[%s1733_s0 + $0x20] sm:$0xff]   ;;  %v1149_v12 = vld [vmem:[%s1733_s0 + $0xa8] sm:$0xff]  }
   0x5   :  { %v1148_v10 = vld [vmem:[%s1733_s0 + $0xa0] sm:$0xff]   ;;  %v1150_v13 = vld [vmem:[%s1733_s0 + $0x30] sm:$0xff]   ;;  %v1151_v15 = vld [vmem:[%s1733_s0 + $0x38] sm:$0xff]  }
   0x6   :  { %1076 = vmatmul.mubr.msk.bf16.vlgmr.msra.gmra.mrb[0].mxu0 %vm236_vm0, %v1139_v2  ;;  %v1152_v14 = vld [vmem:[%s1733_s0 + $0xb0] sm:$0xff]   ;;  %v1153_v16 = vld [vmem:[%s1733_s0 + $0xb8] sm:$0xff]   ;;  %v1154_v17 = vld [vmem:[%s1733_s0 + $0x40] sm:$0xff]  }
   0x7   :  { %1108 = vmatmul.mubr.msk.bf16.vlgmr.msra.gmra.mrb[0].mxu1 %vm236_vm0, %v1141_v4  ;;  %1079 = vmatprep.mubr.msk.bf16.mxu0 %vm236_vm0, %v1142_v5  ;;  %v1156_v18 = vld [vmem:[%s1733_s0 + $0xc0] sm:$0xff]   ;;  %v1155_v19 = vld [vmem:[%s1733_s0 + $0x48] sm:$0xff]   ;;  %v1158_v21 = vld [vmem:[%s1733_s0 + $0x50] sm:$0xff]  }
   0x8   :  { %1111 = vmatprep.mubr.msk.bf16.mxu1 %vm236_vm0, %v1144_v6  ;;  %v1157_v20 = vld [vmem:[%s1733_s0 + $0xc8] sm:$0xff]   ;;  %v1160_v22 = vld [vmem:[%s1733_s0 + $0xd0] sm:$0xff]   ;;  %v1159_v23 = vld [vmem:[%s1733_s0 + $0x58] sm:$0xff]  }
   0x9   :  { %v1161_v24 = vld [vmem:[%s1733_s0 + $0xd8] sm:$0xff]   ;;  %v1162_v25 = vld [vmem:[%s1733_s0 + $0x60] sm:$0xff]   ;;  %v1163_v27 = vld [vmem:[%s1733_s0 + $0x68] sm:$0xff]  }
   0xa   :  { %v1164_v26 = vld [vmem:[%s1733_s0 + $0xe0] sm:$0xff]   ;;  %v1165_v28 = vld [vmem:[%s1733_s0 + $0xe8] sm:$0xff]   ;;  %v1166_v29 = vld [vmem:[%s1733_s0 + $0x70] sm:$0xff]  }
   0xb   :  { %v1167_v30 = vld [vmem:[%s1733_s0 + $0x78] sm:$0xff]   ;;  %v1319_v31 = vld [vmem:[%s1734_s2] ss:$0 sm:$0xff] }
   0xc   :  { %v1324_v33 = vld [vmem:[%s1735_s3] ss:$0 sm:$0xff] }
   0xe   :  { %1080 = vmatmul.mubr.msk.bf16.gmra.mrb[4].mxu0 %vm236_vm0, %v1143_v7 }
   0xf   :  { %1112 = vmatmul.mubr.msk.bf16.gmra.mrb[4].mxu1 %vm236_vm0, %v1145_v8  ;;  %1083 = vmatprep.mubr.msk.bf16.mxu0 %vm236_vm0, %v1146_v9 }
  0x10   :  { %1115 = vmatprep.mubr.msk.bf16.mxu1 %vm236_vm0, %v1148_v10 }
  0x16   :  { %1084 = vmatmul.mubr.msk.bf16.gmra.mrb[8].mxu0 %vm236_vm0, %v1147_v11 }
  0x17   :  { %1116 = vmatmul.mubr.msk.bf16.gmra.mrb[8].mxu1 %vm236_vm0, %v1149_v12  ;;  %1087 = vmatprep.mubr.msk.bf16.mxu0 %vm236_vm0, %v1150_v13 }
  0x18   :  { %1119 = vmatprep.mubr.msk.bf16.mxu1 %vm236_vm0, %v1152_v14 }
  0x1e   :  { %1088 = vmatmul.mubr.msk.bf16.gmra.mrb[12].mxu0 %vm236_vm0, %v1151_v15 }
  0x1f   :  { %1120 = vmatmul.mubr.msk.bf16.gmra.mrb[12].mxu1 %vm236_vm0, %v1153_v16  ;;  %1091 = vmatprep.mubr.msk.bf16.mxu0 %vm236_vm0, %v1154_v17 }
  0x20   :  { %1123 = vmatprep.mubr.msk.bf16.mxu1 %vm236_vm0, %v1156_v18 }
  0x26   :  { %1092 = vmatmul.mubr.msk.bf16.gmra.mrb[16].mxu0 %vm236_vm0, %v1155_v19 }
  0x27   :  { %1124 = vmatmul.mubr.msk.bf16.gmra.mrb[16].mxu1 %vm236_vm0, %v1157_v20  ;;  %1095 = vmatprep.mubr.msk.bf16.mxu0 %vm236_vm0, %v1158_v21 }
  0x28   :  { %1127 = vmatprep.mubr.msk.bf16.mxu1 %vm236_vm0, %v1160_v22 }
  0x2e   :  { %1096 = vmatmul.mubr.msk.bf16.gmra.mrb[20].mxu0 %vm236_vm0, %v1159_v23 }
  0x2f   :  { %1128 = vmatmul.mubr.msk.bf16.gmra.mrb[20].mxu1 %vm236_vm0, %v1161_v24  ;;  %1099 = vmatprep.mubr.msk.bf16.mxu0 %vm236_vm0, %v1162_v25 }
  0x30   :  { %1131 = vmatprep.mubr.msk.bf16.mxu1 %vm236_vm0, %v1164_v26 }
  0x36   :  { %1100 = vmatmul.mubr.msk.bf16.gmra.mrb[24].mxu0 %vm236_vm0, %v1163_v27 }
  0x37   :  { %1132 = vmatmul.mubr.msk.bf16.gmra.mrb[24].mxu1 %vm236_vm0, %v1165_v28  ;;  %1103 = vmatprep.mubr.msk.bf16.mxu0 %vm236_vm0, %v1166_v29 }
  0x3e   :  { %1104 = vmatmul.mubr.msk.bf16.gmra.mrb[28].mxu0 %vm236_vm0, %v1167_v30 }
  0xd9   :  { %v1077_v32 = vpop.f32.mrb[0].mxu0 }
  0xda   :  { %v609_v34 = vmul.f32 %v1077_v32, %v1319_v31  ;;  %v361_v35 = vpop.f32.mrb[1].mxu0  ;;  %v1109_v36 = vpop.f32.mrb[0].mxu1 }
  0xdb   :  { %v607_v37 = vmul.f32 %v1319_v31, %v361_v35  ;;  %v1078_v38 = vpop.f32.mrb[2].mxu0  ;;  %v641_v39 = vmul.f32 %v1109_v36, %v1319_v31  ;;  %v489_v40 = vpop.f32.mrb[1].mxu1 }
  0xdc   :  { %v676_v41 = vadd.f32 %v1324_v33, %v609_v34  ;;  %v610_v42 = vmul.f32 %v1078_v38, %v1319_v31  ;;  %v364_v43 = vpop.f32.mrb[3].mxu0  ;;  %v639_v44 = vmul.f32 %v1319_v31, %v489_v40  ;;  %v1110_v45 = vpop.f32.mrb[2].mxu1 }
  0xdd   :  { %v674_v46 = vadd.f32 %v1324_v33, %v607_v37  ;;  %v608_v47 = vmul.f32 %v1319_v31, %v364_v43  ;;  %v708_v48 = vadd.f32 %v1324_v33, %v641_v39  ;;  %v642_v49 = vmul.f32 %v1110_v45, %v1319_v31  ;;  %v492_v50 = vpop.f32.mrb[3].mxu1 }
  0xde   :  { %vm736_vm2 = vcmp.ge.f32.partialorder %v676_v41, 0.0  ;;  %v796_v51 = vmul.f32 0.01, %v676_v41  ;;  %v677_v52 = vadd.f32 %v1324_v33, %v610_v42  ;;  %v706_v53 = vadd.f32 %v1324_v33, %v639_v44 }
  0xdf   :  { %vm734_vm3 = vcmp.ge.f32.partialorder %v674_v46, 0.0  ;;  %v794_v54 = vmul.f32 0.01, %v674_v46  ;;  %v675_v55 = vadd.f32 %v1324_v33, %v608_v47  ;;  %vm768_vm4 = vcmp.ge.f32.partialorder %v708_v48, 0.0 }
  0xe0   :  { %v856_v56 = vsel %vm736_vm2, %v676_v41, %v796_v51  ;;  %vm737_vm5 = vcmp.ge.f32.partialorder %v677_v52, 0.0  ;;  %v797_v57 = vmul.f32 0.01, %v677_v52  ;;  %v828_v58 = vmul.f32 0.01, %v708_v48 }
  0xe1   :  { %917 = vst.msk [vmem:[%s1736_s4 + $0x10] sm:$0xff] %vm914_vm1, %v856_v56  ;;  %v854_v59 = vsel %vm734_vm3, %v674_v46, %v794_v54  ;;  %vm735_vm6 = vcmp.ge.f32.partialorder %v675_v55, 0.0  ;;  %v795_v60 = vmul.f32 0.01, %v675_v55  ;;  %vm766_vm7 = vcmp.ge.f32.partialorder %v706_v53, 0.0  ;;  %v1081_v61 = vpop.f32.mrb[4].mxu0 }
  0xe2   :  { %915 = vst.msk [vmem:[%s1736_s4] sm:$0xff] %vm914_vm1, %v854_v59  ;;  %v857_v62 = vsel %vm737_vm5, %v677_v52, %v797_v57  ;;  %v888_v63 = vsel %vm768_vm4, %v708_v48, %v828_v58  ;;  %v826_v0 = vmul.f32 0.01, %v706_v53  ;;  %v709_v1 = vadd.f32 %v1324_v33, %v642_v49  ;;  %v377_v2 = vpop.f32.mrb[5].mxu0  ;;  %v1113_v3 = vpop.f32.mrb[4].mxu1 }
  0xe3   :  { %918 = vst.msk [vmem:[%s1736_s4 + $0x18] sm:$0xff] %vm914_vm1, %v857_v62  ;;  %v855_v4 = vsel %vm735_vm6, %v675_v55, %v795_v60  ;;  %949 = vst.msk [vmem:[%s1736_s4 + $0x110] sm:$0xff] %vm914_vm1, %v888_v63  ;;  %v640_v5 = vmul.f32 %v1319_v31, %v492_v50  ;;  %v613_v6 = vmul.f32 %v1081_v61, %v1319_v31  ;;  %v1082_v8 = vpop.f32.mrb[6].mxu0  ;;  %v505_v9 = vpop.f32.mrb[5].mxu1 }
  0xe4   :  { %v611_v7 = vmul.f32 %v1319_v31, %v377_v2  ;;  %916 = vst.msk [vmem:[%s1736_s4 + $0x8] sm:$0xff] %vm914_vm1, %v855_v4  ;;  %v886_v10 = vsel %vm766_vm7, %v706_v53, %v826_v0  ;;  %vm769_vm8 = vcmp.ge.f32.partialorder %v709_v1, 0.0  ;;  %v829_v11 = vmul.f32 0.01, %v709_v1  ;;  %v380_v13 = vpop.f32.mrb[7].mxu0  ;;  %v1114_v14 = vpop.f32.mrb[6].mxu1 }
  0xe5   :  { %v614_v12 = vmul.f32 %v1082_v8, %v1319_v31  ;;  %947 = vst.msk [vmem:[%s1736_s4 + $0x100] sm:$0xff] %vm914_vm1, %v886_v10  ;;  %v707_v15 = vadd.f32 %v1324_v33, %v640_v5  ;;  %v680_v16 = vadd.f32 %v1324_v33, %v613_v6  ;;  %v612_v18 = vmul.f32 %v1319_v31, %v380_v13  ;;  %v508_v19 = vpop.f32.mrb[7].mxu1 }
  0xe6   :  { %v678_v17 = vadd.f32 %v1324_v33, %v611_v7  ;;  %v889_v20 = vsel %vm769_vm8, %v709_v1, %v829_v11  ;;  %v645_v22 = vmul.f32 %v1113_v3, %v1319_v31  ;;  %v643_v23 = vmul.f32 %v1319_v31, %v505_v9 }
  0xe7   :  { %v681_v21 = vadd.f32 %v1324_v33, %v614_v12  ;;  %950 = vst.msk [vmem:[%s1736_s4 + $0x118] sm:$0xff] %vm914_vm1, %v889_v20  ;;  %vm767_vm9 = vcmp.ge.f32.partialorder %v707_v15, 0.0  ;;  %v827_v24 = vmul.f32 0.01, %v707_v15  ;;  %vm740_vm10 = vcmp.ge.f32.partialorder %v680_v16, 0.0 }
  0xe8   :  { %v800_v25 = vmul.f32 0.01, %v680_v16  ;;  %vm738_vm11 = vcmp.ge.f32.partialorder %v678_v17, 0.0  ;;  %v798_v26 = vmul.f32 0.01, %v678_v17  ;;  %v679_v30 = vadd.f32 %v1324_v33, %v612_v18 }
  0xe9   :  { %vm741_vm12 = vcmp.ge.f32.partialorder %v681_v21, 0.0  ;;  %v801_v27 = vmul.f32 0.01, %v681_v21  ;;  %v887_v28 = vsel %vm767_vm9, %v707_v15, %v827_v24  ;;  %v712_v32 = vadd.f32 %v1324_v33, %v645_v22  ;;  %v1085_v34 = vpop.f32.mrb[8].mxu0 }
  0xea   :  { %v860_v29 = vsel %vm740_vm10, %v680_v16, %v800_v25  ;;  %948 = vst.msk [vmem:[%s1736_s4 + $0x108] sm:$0xff] %vm914_vm1, %v887_v28  ;;  %v858_v35 = vsel %vm738_vm11, %v678_v17, %v798_v26  ;;  %v710_v37 = vadd.f32 %v1324_v33, %v643_v23  ;;  %v646_v38 = vmul.f32 %v1114_v14, %v1319_v31  ;;  %v393_v39 = vpop.f32.mrb[9].mxu0  ;;  %v1117_v40 = vpop.f32.mrb[8].mxu1 }
  0xeb   :  { %921 = vst.msk [vmem:[%s1736_s4 + $0x30] sm:$0xff] %vm914_vm1, %v860_v29  ;;  %v861_v36 = vsel %vm741_vm12, %v681_v21, %v801_v27  ;;  %919 = vst.msk [vmem:[%s1736_s4 + $0x20] sm:$0xff] %vm914_vm1, %v858_v35  ;;  %vm739_vm13 = vcmp.ge.f32.partialorder %v679_v30, 0.0  ;;  %v799_v41 = vmul.f32 0.01, %v679_v30  ;;  %vm772_vm14 = vcmp.ge.f32.partialorder %v712_v32, 0.0 }
  0xec   :  { %922 = vst.msk [vmem:[%s1736_s4 + $0x38] sm:$0xff] %vm914_vm1, %v861_v36  ;;  %v832_v42 = vmul.f32 0.01, %v712_v32  ;;  %vm770_vm15 = vcmp.ge.f32.partialorder %v710_v37, 0.0  ;;  %v830_v43 = vmul.f32 0.01, %v710_v37  ;;  %v713_v44 = vadd.f32 %v1324_v33, %v646_v38 }
  0xed   :  { %v644_v45 = vmul.f32 %v1319_v31, %v508_v19  ;;  %v1086_v46 = vpop.f32.mrb[10].mxu0  ;;  %v521_v47 = vpop.f32.mrb[9].mxu1  ;;  %v859_v48 = vsel %vm739_vm13, %v679_v30, %v799_v41  ;;  %v617_v50 = vmul.f32 %v1085_v34, %v1319_v31  ;;  %v615_v51 = vmul.f32 %v1319_v31, %v393_v39 }
  0xee   :  { %v892_v49 = vsel %vm772_vm14, %v712_v32, %v832_v42  ;;  %v396_v52 = vpop.f32.mrb[11].mxu0  ;;  %v1118_v53 = vpop.f32.mrb[10].mxu1  ;;  %920 = vst.msk [vmem:[%s1736_s4 + $0x28] sm:$0xff] %vm914_vm1, %v859_v48  ;;  %v890_v54 = vsel %vm770_vm15, %v710_v37, %v830_v43  ;;  %vm773_vm0 = vcmp.ge.f32.partialorder %v713_v44, 0.0  ;;  %v833_v55 = vmul.f32 0.01, %v713_v44 }
  0xef   :  { %953 = vst.msk [vmem:[%s1736_s4 + $0x130] sm:$0xff] %vm914_vm1, %v892_v49  ;;  %v711_v56 = vadd.f32 %v1324_v33, %v644_v45  ;;  %v524_v57 = vpop.f32.mrb[11].mxu1  ;;  %951 = vst.msk [vmem:[%s1736_s4 + $0x120] sm:$0xff] %vm914_vm1, %v890_v54  ;;  %v684_v58 = vadd.f32 %v1324_v33, %v617_v50  ;;  %v682_v59 = vadd.f32 %v1324_v33, %v615_v51 }
  0xf0   :  { %v618_v60 = vmul.f32 %v1086_v46, %v1319_v31  ;;  %v616_v61 = vmul.f32 %v1319_v31, %v396_v52  ;;  %v893_v62 = vsel %vm773_vm0, %v713_v44, %v833_v55  ;;  %v649_v0 = vmul.f32 %v1117_v40, %v1319_v31 }
  0xf1   :  { %vm771_vm2 = vcmp.ge.f32.partialorder %v711_v56, 0.0  ;;  %v831_v63 = vmul.f32 0.01, %v711_v56  ;;  %954 = vst.msk [vmem:[%s1736_s4 + $0x138] sm:$0xff] %vm914_vm1, %v893_v62  ;;  %vm744_vm3 = vcmp.ge.f32.partialorder %v684_v58, 0.0  ;;  %vm742_vm4 = vcmp.ge.f32.partialorder %v682_v59, 0.0 }
  0xf2   :  { %v804_v1 = vmul.f32 0.01, %v684_v58  ;;  %v802_v2 = vmul.f32 0.01, %v682_v59  ;;  %v685_v4 = vadd.f32 %v1324_v33, %v618_v60  ;;  %v683_v5 = vadd.f32 %v1324_v33, %v616_v61  ;;  %v1089_v7 = vpop.f32.mrb[12].mxu0  ;;  %v1121_v8 = vpop.f32.mrb[12].mxu1 }
  0xf3   :  { %v891_v3 = vsel %vm771_vm2, %v711_v56, %v831_v63  ;;  %v716_v6 = vadd.f32 %v1324_v33, %v649_v0  ;;  %v647_v11 = vmul.f32 %v1319_v31, %v521_v47  ;;  %v650_v12 = vmul.f32 %v1118_v53, %v1319_v31  ;;  %v409_v13 = vpop.f32.mrb[13].mxu0  ;;  %v537_v14 = vpop.f32.mrb[13].mxu1 }
  0xf4   :  { %952 = vst.msk [vmem:[%s1736_s4 + $0x128] sm:$0xff] %vm914_vm1, %v891_v3  ;;  %v864_v9 = vsel %vm744_vm3, %v684_v58, %v804_v1  ;;  %v862_v10 = vsel %vm742_vm4, %v682_v59, %v802_v2  ;;  %vm745_vm5 = vcmp.ge.f32.partialorder %v685_v4, 0.0  ;;  %v805_v15 = vmul.f32 0.01, %v685_v4  ;;  %v1090_v20 = vpop.f32.mrb[14].mxu0  ;;  %v1122_v21 = vpop.f32.mrb[14].mxu1 }
  0xf5   :  { %925 = vst.msk [vmem:[%s1736_s4 + $0x50] sm:$0xff] %vm914_vm1, %v864_v9  ;;  %923 = vst.msk [vmem:[%s1736_s4 + $0x40] sm:$0xff] %vm914_vm1, %v862_v10  ;;  %vm743_vm6 = vcmp.ge.f32.partialorder %v683_v5, 0.0  ;;  %v803_v16 = vmul.f32 0.01, %v683_v5  ;;  %vm776_vm7 = vcmp.ge.f32.partialorder %v716_v6, 0.0  ;;  %v714_v18 = vadd.f32 %v1324_v33, %v647_v11 }
  0xf6   :  { %v836_v17 = vmul.f32 0.01, %v716_v6  ;;  %v717_v19 = vadd.f32 %v1324_v33, %v650_v12  ;;  %v865_v22 = vsel %vm745_vm5, %v685_v4, %v805_v15  ;;  %v648_v24 = vmul.f32 %v1319_v31, %v524_v57  ;;  %v412_v26 = vpop.f32.mrb[15].mxu0  ;;  %v540_v27 = vpop.f32.mrb[15].mxu1 }
  0xf7   :  { %v863_v23 = vsel %vm743_vm6, %v683_v5, %v803_v16  ;;  %v621_v25 = vmul.f32 %v1089_v7, %v1319_v31  ;;  %926 = vst.msk [vmem:[%s1736_s4 + $0x58] sm:$0xff] %vm914_vm1, %v865_v22  ;;  %vm774_vm8 = vcmp.ge.f32.partialorder %v714_v18, 0.0  ;;  %v834_v29 = vmul.f32 0.01, %v714_v18 }
  0xf8   :  { %924 = vst.msk [vmem:[%s1736_s4 + $0x48] sm:$0xff] %vm914_vm1, %v863_v23  ;;  %v896_v28 = vsel %vm776_vm7, %v716_v6, %v836_v17  ;;  %vm777_vm9 = vcmp.ge.f32.partialorder %v717_v19, 0.0  ;;  %v837_v30 = vmul.f32 0.01, %v717_v19  ;;  %v715_v32 = vadd.f32 %v1324_v33, %v648_v24 }
  0xf9   :  { %957 = vst.msk [vmem:[%s1736_s4 + $0x150] sm:$0xff] %vm914_vm1, %v896_v28  ;;  %v688_v34 = vadd.f32 %v1324_v33, %v621_v25  ;;  %v619_v35 = vmul.f32 %v1319_v31, %v409_v13  ;;  %v894_v36 = vsel %vm774_vm8, %v714_v18, %v834_v29  ;;  %v622_v37 = vmul.f32 %v1090_v20, %v1319_v31  ;;  %v1093_v40 = vpop.f32.mrb[16].mxu0 }
  0xfa   :  { %v620_v38 = vmul.f32 %v1319_v31, %v412_v26  ;;  %v653_v39 = vmul.f32 %v1121_v8, %v1319_v31  ;;  %955 = vst.msk [vmem:[%s1736_s4 + $0x140] sm:$0xff] %vm914_vm1, %v894_v36  ;;  %v897_v41 = vsel %vm777_vm9, %v717_v19, %v837_v30  ;;  %vm775_vm10 = vcmp.ge.f32.partialorder %v715_v32, 0.0  ;;  %v425_v43 = vpop.f32.mrb[17].mxu0  ;;  %v1125_v44 = vpop.f32.mrb[16].mxu1 }
  0xfb   :  { %v835_v42 = vmul.f32 0.01, %v715_v32  ;;  %vm748_vm11 = vcmp.ge.f32.partialorder %v688_v34, 0.0  ;;  %958 = vst.msk [vmem:[%s1736_s4 + $0x158] sm:$0xff] %vm914_vm1, %v897_v41  ;;  %v808_v45 = vmul.f32 0.01, %v688_v34  ;;  %v686_v46 = vadd.f32 %v1324_v33, %v619_v35 }
  0xfc   :  { %v689_v47 = vadd.f32 %v1324_v33, %v622_v37  ;;  %v687_v48 = vadd.f32 %v1324_v33, %v620_v38  ;;  %v1094_v49 = vpop.f32.mrb[18].mxu0  ;;  %v553_v50 = vpop.f32.mrb[17].mxu1  ;;  %v720_v52 = vadd.f32 %v1324_v33, %v653_v39  ;;  %v651_v53 = vmul.f32 %v1319_v31, %v537_v14 }
  0xfd   :  { %v895_v51 = vsel %vm775_vm10, %v715_v32, %v835_v42  ;;  %v654_v54 = vmul.f32 %v1122_v21, %v1319_v31  ;;  %v428_v55 = vpop.f32.mrb[19].mxu0  ;;  %v1126_v56 = vpop.f32.mrb[18].mxu1  ;;  %v868_v57 = vsel %vm748_vm11, %v688_v34, %v808_v45  ;;  %vm746_vm12 = vcmp.ge.f32.partialorder %v686_v46, 0.0 }
  0xfe   :  { %956 = vst.msk [vmem:[%s1736_s4 + $0x148] sm:$0xff] %vm914_vm1, %v895_v51  ;;  %v806_v58 = vmul.f32 0.01, %v686_v46  ;;  %vm749_vm13 = vcmp.ge.f32.partialorder %v689_v47, 0.0  ;;  %v1484_v59 = vpop.f32.mrb[19].mxu1  ;;  %929 = vst.msk [vmem:[%s1736_s4 + $0x70] sm:$0xff] %vm914_vm1, %v868_v57  ;;  %v718_v0 = vadd.f32 %v1324_v33, %v651_v53  ;;  %v652_v4 = vmul.f32 %v1319_v31, %v540_v27 }
  0xff   :  { %v809_v60 = vmul.f32 0.01, %v689_v47  ;;  %vm747_vm14 = vcmp.ge.f32.partialorder %v687_v48, 0.0  ;;  %v807_v61 = vmul.f32 0.01, %v687_v48  ;;  %vm780_vm15 = vcmp.ge.f32.partialorder %v720_v52, 0.0 }
 0x100   :  { %v866_v62 = vsel %vm746_vm12, %v686_v46, %v806_v58  ;;  %v840_v63 = vmul.f32 0.01, %v720_v52  ;;  %v721_v1 = vadd.f32 %v1324_v33, %v654_v54  ;;  %v625_v5 = vmul.f32 %v1093_v40, %v1319_v31 }
 0x101   :  { %927 = vst.msk [vmem:[%s1736_s4 + $0x60] sm:$0xff] %vm914_vm1, %v866_v62  ;;  %v869_v2 = vsel %vm749_vm13, %v689_v47, %v809_v60  ;;  %v867_v3 = vsel %vm747_vm14, %v687_v48, %v807_v61  ;;  %vm778_vm0 = vcmp.ge.f32.partialorder %v718_v0, 0.0  ;;  %v838_v7 = vmul.f32 0.01, %v718_v0  ;;  %v1097_v8 = vpop.f32.mrb[20].mxu0 }
 0x102   :  { %930 = vst.msk [vmem:[%s1736_s4 + $0x78] sm:$0xff] %vm914_vm1, %v869_v2  ;;  %928 = vst.msk [vmem:[%s1736_s4 + $0x68] sm:$0xff] %vm914_vm1, %v867_v3  ;;  %v900_v6 = vsel %vm780_vm15, %v720_v52, %v840_v63  ;;  %vm781_vm2 = vcmp.ge.f32.partialorder %v721_v1, 0.0  ;;  %v841_v9 = vmul.f32 0.01, %v721_v1  ;;  %v719_v10 = vadd.f32 %v1324_v33, %v652_v4  ;;  %v441_v13 = vpop.f32.mrb[21].mxu0 }
 0x103   :  { %961 = vst.msk [vmem:[%s1736_s4 + $0x170] sm:$0xff] %vm914_vm1, %v900_v6  ;;  %v692_v11 = vadd.f32 %v1324_v33, %v625_v5  ;;  %v623_v12 = vmul.f32 %v1319_v31, %v425_v43  ;;  %v1513_v14 = vpop.f32.mrb[20].mxu1  ;;  %v898_v15 = vsel %vm778_vm0, %v718_v0, %v838_v7  ;;  %v626_v16 = vmul.f32 %v1094_v49, %v1319_v31  ;;  %v1098_v19 = vpop.f32.mrb[22].mxu0 }
 0x104   :  { %v624_v17 = vmul.f32 %v1319_v31, %v428_v55  ;;  %v657_v18 = vmul.f32 %v1125_v44, %v1319_v31  ;;  %v1518_v20 = vpop.f32.mrb[21].mxu1  ;;  %959 = vst.msk [vmem:[%s1736_s4 + $0x160] sm:$0xff] %vm914_vm1, %v898_v15  ;;  %v901_v21 = vsel %vm781_vm2, %v721_v1, %v841_v9  ;;  %vm779_vm3 = vcmp.ge.f32.partialorder %v719_v10, 0.0  ;;  %v444_v23 = vpop.f32.mrb[23].mxu0 }
 0x105   :  { %v839_v22 = vmul.f32 0.01, %v719_v10  ;;  %vm752_vm4 = vcmp.ge.f32.partialorder %v692_v11, 0.0  ;;  %v1525_v24 = vpop.f32.mrb[22].mxu1  ;;  %962 = vst.msk [vmem:[%s1736_s4 + $0x178] sm:$0xff] %vm914_vm1, %v901_v21  ;;  %v690_v26 = vadd.f32 %v1324_v33, %v623_v12  ;;  %v693_v27 = vadd.f32 %v1324_v33, %v626_v16 }
 0x106   :  { %v812_v25 = vmul.f32 0.01, %v692_v11  ;;  %v691_v28 = vadd.f32 %v1324_v33, %v624_v17  ;;  %v1534_v29 = vpop.f32.mrb[23].mxu1  ;;  %v724_v32 = vadd.f32 %v1324_v33, %v657_v18  ;;  %v655_v34 = vmul.f32 %v1319_v31, %v553_v50 }
 0x107   :  { %v899_v30 = vsel %vm779_vm3, %v719_v10, %v839_v22  ;;  %v658_v35 = vmul.f32 %v1126_v56, %v1319_v31  ;;  %vm750_vm5 = vcmp.ge.f32.partialorder %v690_v26, 0.0  ;;  %v810_v37 = vmul.f32 0.01, %v690_v26 }
 0x108   :  { %960 = vst.msk [vmem:[%s1736_s4 + $0x168] sm:$0xff] %vm914_vm1, %v899_v30  ;;  %v872_v36 = vsel %vm752_vm4, %v692_v11, %v812_v25  ;;  %vm753_vm6 = vcmp.ge.f32.partialorder %v693_v27, 0.0  ;;  %v813_v38 = vmul.f32 0.01, %v693_v27  ;;  %vm751_vm7 = vcmp.ge.f32.partialorder %v691_v28, 0.0 }
 0x109   :  { %933 = vst.msk [vmem:[%s1736_s4 + $0x90] sm:$0xff] %vm914_vm1, %v872_v36  ;;  %v811_v39 = vmul.f32 0.01, %v691_v28  ;;  %vm784_vm8 = vcmp.ge.f32.partialorder %v724_v32, 0.0  ;;  %v870_v40 = vsel %vm750_vm5, %v690_v26, %v810_v37  ;;  %v844_v41 = vmul.f32 0.01, %v724_v32 }
 0x10a   :  { %v722_v42 = vadd.f32 %v1324_v33, %v655_v34  ;;  %v725_v43 = vadd.f32 %v1324_v33, %v658_v35  ;;  %v1101_v44 = vpop.f32.mrb[24].mxu0  ;;  %931 = vst.msk [vmem:[%s1736_s4 + $0x80] sm:$0xff] %vm914_vm1, %v870_v40  ;;  %v873_v45 = vsel %vm753_vm6, %v693_v27, %v813_v38  ;;  %v656_v47 = vmul.f32 %v1319_v31, %v1484_v59  ;;  %v1558_v50 = vpop.f32.mrb[24].mxu1 }
 0x10b   :  { %v871_v46 = vsel %vm751_vm7, %v691_v28, %v811_v39  ;;  %v629_v48 = vmul.f32 %v1097_v8, %v1319_v31  ;;  %v1556_v49 = vpop.f32.mrb[25].mxu0  ;;  %934 = vst.msk [vmem:[%s1736_s4 + $0x98] sm:$0xff] %vm914_vm1, %v873_v45  ;;  %v904_v51 = vsel %vm784_vm8, %v724_v32, %v844_v41  ;;  %v1570_v54 = vpop.f32.mrb[25].mxu1  ;;  %v627_v58 = vmul.f32 %v1319_v31, %v441_v13 }
 0x10c   :  { %932 = vst.msk [vmem:[%s1736_s4 + $0x88] sm:$0xff] %vm914_vm1, %v871_v46  ;;  %vm782_vm9 = vcmp.ge.f32.partialorder %v722_v42, 0.0  ;;  %v842_v52 = vmul.f32 0.01, %v722_v42  ;;  %vm785_vm10 = vcmp.ge.f32.partialorder %v725_v43, 0.0  ;;  %v1568_v53 = vpop.f32.mrb[26].mxu0  ;;  %v723_v56 = vadd.f32 %v1324_v33, %v656_v47 }
 0x10d   :  { %965 = vst.msk [vmem:[%s1736_s4 + $0x190] sm:$0xff] %vm914_vm1, %v904_v51  ;;  %v845_v55 = vmul.f32 0.01, %v725_v43  ;;  %v696_v57 = vadd.f32 %v1324_v33, %v629_v48  ;;  %v460_v59 = vpop.f32.mrb[27].mxu0  ;;  %v1579_v60 = vpop.f32.mrb[26].mxu1  ;;  %v630_v62 = vmul.f32 %v1098_v19, %v1319_v31  ;;  %v628_v63 = vmul.f32 %v1319_v31, %v444_v23 }
 0x10e   :  { %v902_v61 = vsel %vm782_vm9, %v722_v42, %v842_v52  ;;  %v661_v0 = vmul.f32 %v1513_v14, %v1319_v31  ;;  %v1585_v1 = vpop.f32.mrb[27].mxu1  ;;  %vm783_vm11 = vcmp.ge.f32.partialorder %v723_v56, 0.0  ;;  %v843_v3 = vmul.f32 0.01, %v723_v56 }
 0x10f   :  { %963 = vst.msk [vmem:[%s1736_s4 + $0x180] sm:$0xff] %vm914_vm1, %v902_v61  ;;  %v905_v2 = vsel %vm785_vm10, %v725_v43, %v845_v55  ;;  %vm756_vm12 = vcmp.ge.f32.partialorder %v696_v57, 0.0  ;;  %v816_v4 = vmul.f32 0.01, %v696_v57  ;;  %v694_v5 = vadd.f32 %v1324_v33, %v627_v58 }
 0x110   :  { %966 = vst.msk [vmem:[%s1736_s4 + $0x198] sm:$0xff] %vm914_vm1, %v905_v2  ;;  %v697_v6 = vadd.f32 %v1324_v33, %v630_v62  ;;  %v695_v7 = vadd.f32 %v1324_v33, %v628_v63  ;;  %v903_v8 = vsel %vm783_vm11, %v723_v56, %v843_v3  ;;  %v728_v9 = vadd.f32 %v1324_v33, %v661_v0 }
 0x111   :  { %v659_v10 = vmul.f32 %v1319_v31, %v1518_v20  ;;  %v662_v11 = vmul.f32 %v1525_v24, %v1319_v31  ;;  %964 = vst.msk [vmem:[%s1736_s4 + $0x188] sm:$0xff] %vm914_vm1, %v903_v8  ;;  %v876_v12 = vsel %vm756_vm12, %v696_v57, %v816_v4  ;;  %vm754_vm13 = vcmp.ge.f32.partialorder %v694_v5, 0.0  ;;  %v1608_v14 = vpop.f32.mrb[28].mxu0 }
 0x112   :  { %v814_v13 = vmul.f32 0.01, %v694_v5  ;;  %vm757_vm14 = vcmp.ge.f32.partialorder %v697_v6, 0.0  ;;  %937 = vst.msk [vmem:[%s1736_s4 + $0xb0] sm:$0xff] %vm914_vm1, %v876_v12  ;;  %v817_v15 = vmul.f32 0.01, %v697_v6  ;;  %v660_v24 = vmul.f32 %v1319_v31, %v1534_v29 }
 0x113   :  { %vm755_vm15 = vcmp.ge.f32.partialorder %v695_v7, 0.0  ;;  %v815_v16 = vmul.f32 0.01, %v695_v7  ;;  %vm788_vm0 = vcmp.ge.f32.partialorder %v728_v9, 0.0  ;;  %v848_v18 = vmul.f32 0.01, %v728_v9 }
 0x114   :  { %v874_v17 = vsel %vm754_vm13, %v694_v5, %v814_v13  ;;  %v726_v19 = vadd.f32 %v1324_v33, %v659_v10  ;;  %v729_v20 = vadd.f32 %v1324_v33, %v662_v11  ;;  %v1616_v21 = vpop.f32.mrb[29].mxu0  ;;  %v877_v22 = vsel %vm757_vm14, %v697_v6, %v817_v15 }
 0x115   :  { %935 = vst.msk [vmem:[%s1736_s4 + $0xa0] sm:$0xff] %vm914_vm1, %v874_v17  ;;  %v875_v23 = vsel %vm755_vm15, %v695_v7, %v815_v16  ;;  %v633_v25 = vmul.f32 %v1101_v44, %v1319_v31  ;;  %v1625_v26 = vpop.f32.mrb[30].mxu0  ;;  %938 = vst.msk [vmem:[%s1736_s4 + $0xb8] sm:$0xff] %vm914_vm1, %v877_v22  ;;  %v908_v27 = vsel %vm788_vm0, %v728_v9, %v848_v18 }
 0x116   :  { %936 = vst.msk [vmem:[%s1736_s4 + $0xa8] sm:$0xff] %vm914_vm1, %v875_v23  ;;  %vm786_vm2 = vcmp.ge.f32.partialorder %v726_v19, 0.0  ;;  %v846_v28 = vmul.f32 0.01, %v726_v19  ;;  %vm789_vm3 = vcmp.ge.f32.partialorder %v729_v20, 0.0  ;;  %v476_v30 = vpop.f32.mrb[31].mxu0  ;;  %v727_v32 = vadd.f32 %v1324_v33, %v660_v24 }
 0x117   :  { %969 = vst.msk [vmem:[%s1736_s4 + $0x1b0] sm:$0xff] %vm914_vm1, %v908_v27  ;;  %v849_v29 = vmul.f32 0.01, %v729_v20  ;;  %v700_v34 = vadd.f32 %v1324_v33, %v633_v25  ;;  %v631_v35 = vmul.f32 %v1319_v31, %v1556_v49  ;;  %v634_v37 = vmul.f32 %v1568_v53, %v1319_v31 }
 0x118   :  { %v906_v36 = vsel %vm786_vm2, %v726_v19, %v846_v28  ;;  %v632_v38 = vmul.f32 %v1319_v31, %v460_v59  ;;  %v665_v39 = vmul.f32 %v1558_v50, %v1319_v31  ;;  %vm787_vm4 = vcmp.ge.f32.partialorder %v727_v32, 0.0 }
 0x119   :  { %967 = vst.msk [vmem:[%s1736_s4 + $0x1a0] sm:$0xff] %vm914_vm1, %v906_v36  ;;  %v909_v40 = vsel %vm789_vm3, %v729_v20, %v849_v29  ;;  %v847_v41 = vmul.f32 0.01, %v727_v32  ;;  %vm760_vm5 = vcmp.ge.f32.partialorder %v700_v34, 0.0  ;;  %v820_v42 = vmul.f32 0.01, %v700_v34 }
 0x11a   :  { %970 = vst.msk [vmem:[%s1736_s4 + $0x1b8] sm:$0xff] %vm914_vm1, %v909_v40  ;;  %v698_v43 = vadd.f32 %v1324_v33, %v631_v35  ;;  %v701_v44 = vadd.f32 %v1324_v33, %v634_v37  ;;  %v699_v45 = vadd.f32 %v1324_v33, %v632_v38  ;;  %v732_v47 = vadd.f32 %v1324_v33, %v665_v39 }
 0x11b   :  { %v907_v46 = vsel %vm787_vm4, %v727_v32, %v847_v41  ;;  %v663_v48 = vmul.f32 %v1319_v31, %v1570_v54  ;;  %v666_v49 = vmul.f32 %v1579_v60, %v1319_v31  ;;  %v880_v50 = vsel %vm760_vm5, %v700_v34, %v820_v42 }
 0x11c   :  { %968 = vst.msk [vmem:[%s1736_s4 + $0x1a8] sm:$0xff] %vm914_vm1, %v907_v46  ;;  %vm758_vm6 = vcmp.ge.f32.partialorder %v698_v43, 0.0  ;;  %v818_v51 = vmul.f32 0.01, %v698_v43  ;;  %vm761_vm7 = vcmp.ge.f32.partialorder %v701_v44, 0.0  ;;  %941 = vst.msk [vmem:[%s1736_s4 + $0xd0] sm:$0xff] %vm914_vm1, %v880_v50  ;;  %v664_v60 = vmul.f32 %v1319_v31, %v1585_v1 }
 0x11d   :  { %v821_v52 = vmul.f32 0.01, %v701_v44  ;;  %vm759_vm8 = vcmp.ge.f32.partialorder %v699_v45, 0.0  ;;  %v819_v53 = vmul.f32 0.01, %v699_v45  ;;  %vm792_vm9 = vcmp.ge.f32.partialorder %v732_v47, 0.0 }
 0x11e   :  { %v878_v54 = vsel %vm758_vm6, %v698_v43, %v818_v51  ;;  %v852_v55 = vmul.f32 0.01, %v732_v47  ;;  %v730_v56 = vadd.f32 %v1324_v33, %v663_v48  ;;  %v733_v57 = vadd.f32 %v1324_v33, %v666_v49 }
 0x11f   :  { %939 = vst.msk [vmem:[%s1736_s4 + $0xc0] sm:$0xff] %vm914_vm1, %v878_v54  ;;  %v881_v58 = vsel %vm761_vm7, %v701_v44, %v821_v52  ;;  %v879_v59 = vsel %vm759_vm8, %v699_v45, %v819_v53  ;;  %v637_v61 = vmul.f32 %v1608_v14, %v1319_v31  ;;  %v731_v1 = vadd.f32 %v1324_v33, %v664_v60 }
 0x120   :  { %942 = vst.msk [vmem:[%s1736_s4 + $0xd8] sm:$0xff] %vm914_vm1, %v881_v58  ;;  %940 = vst.msk [vmem:[%s1736_s4 + $0xc8] sm:$0xff] %vm914_vm1, %v879_v59  ;;  %v912_v62 = vsel %vm792_vm9, %v732_v47, %v852_v55  ;;  %vm790_vm10 = vcmp.ge.f32.partialorder %v730_v56, 0.0  ;;  %v850_v63 = vmul.f32 0.01, %v730_v56  ;;  %vm793_vm11 = vcmp.ge.f32.partialorder %v733_v57, 0.0 }
 0x121   :  { %973 = vst.msk [vmem:[%s1736_s4 + $0x1d0] sm:$0xff] %vm914_vm1, %v912_v62  ;;  %v853_v0 = vmul.f32 0.01, %v733_v57  ;;  %v704_v2 = vadd.f32 %v1324_v33, %v637_v61  ;;  %v635_v3 = vmul.f32 %v1319_v31, %v1616_v21  ;;  %v638_v5 = vmul.f32 %v1625_v26, %v1319_v31 }
 0x122   :  { %v910_v4 = vsel %vm790_vm10, %v730_v56, %v850_v63  ;;  %v636_v6 = vmul.f32 %v1319_v31, %v476_v30  ;;  %vm791_vm12 = vcmp.ge.f32.partialorder %v731_v1, 0.0  ;;  %v851_v8 = vmul.f32 0.01, %v731_v1 }
 0x123   :  { %971 = vst.msk [vmem:[%s1736_s4 + $0x1c0] sm:$0xff] %vm914_vm1, %v910_v4  ;;  %v913_v7 = vsel %vm793_vm11, %v733_v57, %v853_v0  ;;  %vm764_vm13 = vcmp.ge.f32.partialorder %v704_v2, 0.0  ;;  %v824_v9 = vmul.f32 0.01, %v704_v2  ;;  %v702_v10 = vadd.f32 %v1324_v33, %v635_v3 }
 0x124   :  { %974 = vst.msk [vmem:[%s1736_s4 + $0x1d8] sm:$0xff] %vm914_vm1, %v913_v7  ;;  %v705_v11 = vadd.f32 %v1324_v33, %v638_v5  ;;  %v703_v31 = vadd.f32 %v1324_v33, %v636_v6  ;;  %v911_v12 = vsel %vm791_vm12, %v731_v1, %v851_v8 }
 0x125   :  { %972 = vst.msk [vmem:[%s1736_s4 + $0x1c8] sm:$0xff] %vm914_vm1, %v911_v12  ;;  %v884_v13 = vsel %vm764_vm13, %v704_v2, %v824_v9  ;;  %vm762_vm14 = vcmp.ge.f32.partialorder %v702_v10, 0.0  ;;  %v822_v14 = vmul.f32 0.01, %v702_v10 }
 0x126   :  { %vm765_vm15 = vcmp.ge.f32.partialorder %v705_v11, 0.0  ;;  %945 = vst.msk [vmem:[%s1736_s4 + $0xf0] sm:$0xff] %vm914_vm1, %v884_v13  ;;  %v825_v15 = vmul.f32 0.01, %v705_v11  ;;  %vm763_vm0 = vcmp.ge.f32.partialorder %v703_v31, 0.0 }
 0x127   :  { %v823_v16 = vmul.f32 0.01, %v703_v31  ;;  %v882_v17 = vsel %vm762_vm14, %v702_v10, %v822_v14 }
 0x128   :  { %943 = vst.msk [vmem:[%s1736_s4 + $0xe0] sm:$0xff] %vm914_vm1, %v882_v17  ;;  %v885_v33 = vsel %vm765_vm15, %v705_v11, %v825_v15 }
 0x129   :  { %v883_v18 = vsel %vm763_vm0, %v703_v31, %v823_v16  ;;  %946 = vst.msk [vmem:[%s1736_s4 + $0xf8] sm:$0xff] %vm914_vm1, %v885_v33 }
 0x12a   :  { %944 = vst.msk [vmem:[%s1736_s4 + $0xe8] sm:$0xff] %vm914_vm1, %v883_v18 }

// kernel: fwd.8
= control target key start
LH: loop header
LB: loop body
LE: loop exit
PB: predicated region body
PF: predicated region fallthrough
CT: control target
= control target key end

     0   :  { %vm244_vm0 = vcmask 261120   ;;  %s1745_s1 = inlined_call_operand.vmem [shape: bf16[32,32], index: 1, kind: input, shape index: {}]   ;;  %s1746_s0 = inlined_call_operand.vmem [shape: bf16[480,32], index: 0, kind: input, shape index: {}]   ;;  %s1747_s2 = inlined_call_operand.vmem [shape: f32[1,32], index: 2, kind: input, shape index: {}]   ;;  %s1748_s3 = inlined_call_operand.vmem [shape: f32[1,32], index: 3, kind: input, shape index: {}]   ;;  %s1749_s4 = inlined_call_operand.vmem [shape: f32[480,32], index: 4, kind: output, shape index: {}]  }
   0x1   :  { %v1150_v0 = vld [vmem:[%s1745_s1] sm:$0xff]   ;;  %v1151_v1 = vld [vmem:[%s1745_s1 + $0x8] sm:$0xff]   ;;  %v1156_v6 = vld [vmem:[%s1746_s0 + $0x10] sm:$0xff]  }
   0x2   :  { %1082 = vmatprep.subr.bf16.mxu0 %v1150_v0  ;;  %1146 = vmatprep.subr.bf16.mxu1 %v1150_v0  ;;  %v1152_v2 = vld [vmem:[%s1746_s0] sm:$0xff]   ;;  %v1153_v4 = vld [vmem:[%s1746_s0 + $0x8] sm:$0xff]   ;;  %v1158_v7 = vld [vmem:[%s1746_s0 + $0x90] sm:$0xff]  }
   0x3   :  { %1083 = vmatpush3.bf16.msra.mxu0 %v1150_v0  ;;  %1148 = vmatpush3.bf16.msra.mxu1 %v1150_v0  ;;  %v1154_v3 = vld [vmem:[%s1746_s0 + $0x80] sm:$0xff]   ;;  %v1155_v5 = vld [vmem:[%s1746_s0 + $0x88] sm:$0xff]   ;;  %v1157_v8 = vld [vmem:[%s1746_s0 + $0x18] sm:$0xff]  }
   0x4   :  { %1084 = vmatprep.subr.bf16.mxu0 %v1151_v1  ;;  %1147 = vmatprep.subr.bf16.mxu1 %v1151_v1  ;;  %v1159_v9 = vld [vmem:[%s1746_s0 + $0x98] sm:$0xff]   ;;  %v1160_v10 = vld [vmem:[%s1746_s0 + $0x20] sm:$0xff]   ;;  %v1161_v12 = vld [vmem:[%s1746_s0 + $0x28] sm:$0xff]  }
   0x5   :  { %1086 = vmatprep.mubr.msk.bf16.mxu0 %vm244_vm0, %v1152_v2  ;;  %1118 = vmatprep.mubr.msk.bf16.mxu1 %vm244_vm0, %v1154_v3  ;;  %v1162_v11 = vld [vmem:[%s1746_s0 + $0xa0] sm:$0xff]   ;;  %v1163_v13 = vld [vmem:[%s1746_s0 + $0xa8] sm:$0xff]   ;;  %v1164_v14 = vld [vmem:[%s1746_s0 + $0x30] sm:$0xff]  }
   0x6   :  { %v1166_v15 = vld [vmem:[%s1746_s0 + $0xb0] sm:$0xff]   ;;  %v1165_v16 = vld [vmem:[%s1746_s0 + $0x38] sm:$0xff]   ;;  %v1168_v18 = vld [vmem:[%s1746_s0 + $0x40] sm:$0xff]  }
   0x7   :  { %1085 = vmatpush3.bf16.msra.mxu0 %v1151_v1  ;;  %1149 = vmatpush3.bf16.msra.mxu1 %v1151_v1  ;;  %v1167_v17 = vld [vmem:[%s1746_s0 + $0xb8] sm:$0xff]   ;;  %v1170_v19 = vld [vmem:[%s1746_s0 + $0xc0] sm:$0xff]   ;;  %v1169_v20 = vld [vmem:[%s1746_s0 + $0x48] sm:$0xff]  }
   0x8   :  { %v1171_v21 = vld [vmem:[%s1746_s0 + $0xc8] sm:$0xff]   ;;  %v1172_v22 = vld [vmem:[%s1746_s0 + $0x50] sm:$0xff]   ;;  %v1173_v24 = vld [vmem:[%s1746_s0 + $0x58] sm:$0xff]  }
   0x9   :  { %v1174_v23 = vld [vmem:[%s1746_s0 + $0xd0] sm:$0xff]   ;;  %v1175_v25 = vld [vmem:[%s1746_s0 + $0xd8] sm:$0xff]   ;;  %v1176_v26 = vld [vmem:[%s1746_s0 + $0x60] sm:$0xff]  }
   0xa   :  { %1087 = vmatmul.mubr.msk.bf16.vlgmr.msra.gmra.mrb[0].mxu0 %vm244_vm0, %v1153_v4  ;;  %1119 = vmatmul.mubr.msk.bf16.vlgmr.msra.gmra.mrb[0].mxu1 %vm244_vm0, %v1155_v5  ;;  %v1178_v27 = vld [vmem:[%s1746_s0 + $0xe0] sm:$0xff]   ;;  %v1177_v28 = vld [vmem:[%s1746_s0 + $0x68] sm:$0xff]   ;;  %v1180_v30 = vld [vmem:[%s1746_s0 + $0x70] sm:$0xff]  }
   0xb   :  { %1090 = vmatprep.mubr.msk.bf16.mxu0 %vm244_vm0, %v1156_v6  ;;  %1122 = vmatprep.mubr.msk.bf16.mxu1 %vm244_vm0, %v1158_v7  ;;  %v1179_v29 = vld [vmem:[%s1746_s0 + $0xe8] sm:$0xff]   ;;  %v1181_v31 = vld [vmem:[%s1746_s0 + $0x78] sm:$0xff]   ;;  %v1336_v32 = vld [vmem:[%s1747_s2] ss:$0 sm:$0xff] }
   0xc   :  { %v1341_v34 = vld [vmem:[%s1748_s3] ss:$0 sm:$0xff] }
  0x12   :  { %1091 = vmatmul.mubr.msk.bf16.gmra.mrb[4].mxu0 %vm244_vm0, %v1157_v8  ;;  %1123 = vmatmul.mubr.msk.bf16.gmra.mrb[4].mxu1 %vm244_vm0, %v1159_v9 }
  0x13   :  { %1094 = vmatprep.mubr.msk.bf16.mxu0 %vm244_vm0, %v1160_v10  ;;  %1126 = vmatprep.mubr.msk.bf16.mxu1 %vm244_vm0, %v1162_v11 }
  0x1a   :  { %1095 = vmatmul.mubr.msk.bf16.gmra.mrb[8].mxu0 %vm244_vm0, %v1161_v12  ;;  %1127 = vmatmul.mubr.msk.bf16.gmra.mrb[8].mxu1 %vm244_vm0, %v1163_v13 }
  0x1b   :  { %1098 = vmatprep.mubr.msk.bf16.mxu0 %vm244_vm0, %v1164_v14  ;;  %1130 = vmatprep.mubr.msk.bf16.mxu1 %vm244_vm0, %v1166_v15 }
  0x22   :  { %1099 = vmatmul.mubr.msk.bf16.gmra.mrb[12].mxu0 %vm244_vm0, %v1165_v16  ;;  %1131 = vmatmul.mubr.msk.bf16.gmra.mrb[12].mxu1 %vm244_vm0, %v1167_v17 }
  0x23   :  { %1102 = vmatprep.mubr.msk.bf16.mxu0 %vm244_vm0, %v1168_v18  ;;  %1134 = vmatprep.mubr.msk.bf16.mxu1 %vm244_vm0, %v1170_v19 }
  0x2a   :  { %1103 = vmatmul.mubr.msk.bf16.gmra.mrb[16].mxu0 %vm244_vm0, %v1169_v20  ;;  %1135 = vmatmul.mubr.msk.bf16.gmra.mrb[16].mxu1 %vm244_vm0, %v1171_v21 }
  0x2b   :  { %1106 = vmatprep.mubr.msk.bf16.mxu0 %vm244_vm0, %v1172_v22  ;;  %1138 = vmatprep.mubr.msk.bf16.mxu1 %vm244_vm0, %v1174_v23 }
  0x32   :  { %1107 = vmatmul.mubr.msk.bf16.gmra.mrb[20].mxu0 %vm244_vm0, %v1173_v24  ;;  %1139 = vmatmul.mubr.msk.bf16.gmra.mrb[20].mxu1 %vm244_vm0, %v1175_v25 }
  0x33   :  { %1110 = vmatprep.mubr.msk.bf16.mxu0 %vm244_vm0, %v1176_v26  ;;  %1142 = vmatprep.mubr.msk.bf16.mxu1 %vm244_vm0, %v1178_v27 }
  0x3a   :  { %1111 = vmatmul.mubr.msk.bf16.gmra.mrb[24].mxu0 %vm244_vm0, %v1177_v28  ;;  %1143 = vmatmul.mubr.msk.bf16.gmra.mrb[24].mxu1 %vm244_vm0, %v1179_v29 }
  0x3b   :  { %1114 = vmatprep.mubr.msk.bf16.mxu0 %vm244_vm0, %v1180_v30 }
  0x42   :  { %1115 = vmatmul.mubr.msk.bf16.gmra.mrb[28].mxu0 %vm244_vm0, %v1181_v31 }
  0xdd   :  { %v1088_v33 = vpop.f32.mrb[0].mxu0  ;;  %v1120_v35 = vpop.f32.mrb[0].mxu1 }
  0xde   :  { %v617_v36 = vmul.f32 %v1088_v33, %v1336_v32  ;;  %v369_v37 = vpop.f32.mrb[1].mxu0  ;;  %v649_v38 = vmul.f32 %v1120_v35, %v1336_v32  ;;  %v497_v39 = vpop.f32.mrb[1].mxu1 }
  0xdf   :  { %v615_v40 = vmul.f32 %v1336_v32, %v369_v37  ;;  %v1089_v41 = vpop.f32.mrb[2].mxu0  ;;  %v647_v42 = vmul.f32 %v1336_v32, %v497_v39  ;;  %v1121_v43 = vpop.f32.mrb[2].mxu1 }
  0xe0   :  { %v684_v44 = vadd.f32 %v1341_v34, %v617_v36  ;;  %v618_v45 = vmul.f32 %v1089_v41, %v1336_v32  ;;  %v372_v46 = vpop.f32.mrb[3].mxu0  ;;  %v716_v47 = vadd.f32 %v1341_v34, %v649_v38  ;;  %v650_v48 = vmul.f32 %v1121_v43, %v1336_v32  ;;  %v500_v49 = vpop.f32.mrb[3].mxu1 }
  0xe1   :  { %v682_v50 = vadd.f32 %v1341_v34, %v615_v40  ;;  %v616_v51 = vmul.f32 %v1336_v32, %v372_v46  ;;  %v714_v52 = vadd.f32 %v1341_v34, %v647_v42  ;;  %v648_v53 = vmul.f32 %v1336_v32, %v500_v49 }
  0xe2   :  { %vm744_vm1 = vcmp.ge.f32.partialorder %v684_v44, 0.0  ;;  %v804_v54 = vmul.f32 0.01, %v684_v44  ;;  %v685_v55 = vadd.f32 %v1341_v34, %v618_v45  ;;  %vm776_vm2 = vcmp.ge.f32.partialorder %v716_v47, 0.0 }
  0xe3   :  { %vm742_vm3 = vcmp.ge.f32.partialorder %v682_v50, 0.0  ;;  %v802_v56 = vmul.f32 0.01, %v682_v50  ;;  %v683_v57 = vadd.f32 %v1341_v34, %v616_v51  ;;  %v836_v58 = vmul.f32 0.01, %v716_v47 }
  0xe4   :  { %v864_v59 = vsel %vm744_vm1, %v684_v44, %v804_v54  ;;  %vm745_vm4 = vcmp.ge.f32.partialorder %v685_v55, 0.0  ;;  %v805_v60 = vmul.f32 0.01, %v685_v55  ;;  %vm774_vm5 = vcmp.ge.f32.partialorder %v714_v52, 0.0 }
  0xe5   :  { %924 = vst.msk [vmem:[%s1749_s4 + $0x10] sm:$0xff] %vm244_vm0, %v864_v59  ;;  %v862_v61 = vsel %vm742_vm3, %v682_v50, %v802_v56  ;;  %vm743_vm6 = vcmp.ge.f32.partialorder %v683_v57, 0.0  ;;  %v803_v62 = vmul.f32 0.01, %v683_v57  ;;  %v896_v63 = vsel %vm776_vm2, %v716_v47, %v836_v58  ;;  %v1092_v0 = vpop.f32.mrb[4].mxu0  ;;  %v1124_v1 = vpop.f32.mrb[4].mxu1 }
  0xe6   :  { %922 = vst.msk [vmem:[%s1749_s4] sm:$0xff] %vm244_vm0, %v862_v61  ;;  %v865_v2 = vsel %vm745_vm4, %v685_v55, %v805_v60  ;;  %956 = vst.msk [vmem:[%s1749_s4 + $0x110] sm:$0xff] %vm244_vm0, %v896_v63  ;;  %v834_v3 = vmul.f32 0.01, %v714_v52  ;;  %v717_v4 = vadd.f32 %v1341_v34, %v650_v48  ;;  %v715_v5 = vadd.f32 %v1341_v34, %v648_v53  ;;  %v385_v6 = vpop.f32.mrb[5].mxu0  ;;  %v513_v7 = vpop.f32.mrb[5].mxu1 }
  0xe7   :  { %925 = vst.msk [vmem:[%s1749_s4 + $0x18] sm:$0xff] %vm244_vm0, %v865_v2  ;;  %v863_v8 = vsel %vm743_vm6, %v683_v57, %v803_v62  ;;  %v621_v9 = vmul.f32 %v1092_v0, %v1336_v32  ;;  %v619_v10 = vmul.f32 %v1336_v32, %v385_v6  ;;  %v1093_v11 = vpop.f32.mrb[6].mxu0  ;;  %v653_v12 = vmul.f32 %v1124_v1, %v1336_v32  ;;  %v1125_v13 = vpop.f32.mrb[6].mxu1 }
  0xe8   :  { %923 = vst.msk [vmem:[%s1749_s4 + $0x8] sm:$0xff] %vm244_vm0, %v863_v8  ;;  %v894_v14 = vsel %vm774_vm5, %v714_v52, %v834_v3  ;;  %vm777_vm7 = vcmp.ge.f32.partialorder %v717_v4, 0.0  ;;  %v837_v15 = vmul.f32 0.01, %v717_v4  ;;  %vm775_vm8 = vcmp.ge.f32.partialorder %v715_v5, 0.0  ;;  %v388_v16 = vpop.f32.mrb[7].mxu0 }
  0xe9   :  { %v516_v17 = vpop.f32.mrb[7].mxu1  ;;  %954 = vst.msk [vmem:[%s1749_s4 + $0x100] sm:$0xff] %vm244_vm0, %v894_v14  ;;  %v835_v18 = vmul.f32 0.01, %v715_v5  ;;  %v688_v19 = vadd.f32 %v1341_v34, %v621_v9  ;;  %v686_v20 = vadd.f32 %v1341_v34, %v619_v10  ;;  %v622_v21 = vmul.f32 %v1093_v11, %v1336_v32 }
  0xea   :  { %v897_v22 = vsel %vm777_vm7, %v717_v4, %v837_v15  ;;  %v620_v23 = vmul.f32 %v1336_v32, %v388_v16  ;;  %v720_v24 = vadd.f32 %v1341_v34, %v653_v12  ;;  %v651_v25 = vmul.f32 %v1336_v32, %v513_v7 }
  0xeb   :  { %957 = vst.msk [vmem:[%s1749_s4 + $0x118] sm:$0xff] %vm244_vm0, %v897_v22  ;;  %v895_v26 = vsel %vm775_vm8, %v715_v5, %v835_v18  ;;  %vm748_vm9 = vcmp.ge.f32.partialorder %v688_v19, 0.0  ;;  %v808_v27 = vmul.f32 0.01, %v688_v19  ;;  %vm746_vm10 = vcmp.ge.f32.partialorder %v686_v20, 0.0 }
  0xec   :  { %955 = vst.msk [vmem:[%s1749_s4 + $0x108] sm:$0xff] %vm244_vm0, %v895_v26  ;;  %v806_v28 = vmul.f32 0.01, %v686_v20  ;;  %v689_v29 = vadd.f32 %v1341_v34, %v622_v21  ;;  %v687_v30 = vadd.f32 %v1341_v34, %v620_v23  ;;  %vm780_vm11 = vcmp.ge.f32.partialorder %v720_v24, 0.0 }
  0xed   :  { %v868_v31 = vsel %vm748_vm9, %v688_v19, %v808_v27  ;;  %v840_v33 = vmul.f32 0.01, %v720_v24  ;;  %v718_v35 = vadd.f32 %v1341_v34, %v651_v25  ;;  %v654_v36 = vmul.f32 %v1125_v13, %v1336_v32  ;;  %v1096_v37 = vpop.f32.mrb[8].mxu0  ;;  %v1128_v38 = vpop.f32.mrb[8].mxu1 }
  0xee   :  { %928 = vst.msk [vmem:[%s1749_s4 + $0x30] sm:$0xff] %vm244_vm0, %v868_v31  ;;  %v866_v39 = vsel %vm746_vm10, %v686_v20, %v806_v28  ;;  %vm749_vm12 = vcmp.ge.f32.partialorder %v689_v29, 0.0  ;;  %v809_v40 = vmul.f32 0.01, %v689_v29  ;;  %vm747_vm13 = vcmp.ge.f32.partialorder %v687_v30, 0.0  ;;  %v401_v41 = vpop.f32.mrb[9].mxu0 }
  0xef   :  { %v529_v42 = vpop.f32.mrb[9].mxu1  ;;  %926 = vst.msk [vmem:[%s1749_s4 + $0x20] sm:$0xff] %vm244_vm0, %v866_v39  ;;  %v807_v43 = vmul.f32 0.01, %v687_v30  ;;  %v900_v44 = vsel %vm780_vm11, %v720_v24, %v840_v33  ;;  %vm778_vm14 = vcmp.ge.f32.partialorder %v718_v35, 0.0  ;;  %v1097_v46 = vpop.f32.mrb[10].mxu0  ;;  %v721_v48 = vadd.f32 %v1341_v34, %v654_v36 }
  0xf0   :  { %v838_v45 = vmul.f32 0.01, %v718_v35  ;;  %v869_v47 = vsel %vm749_vm12, %v689_v29, %v809_v40  ;;  %960 = vst.msk [vmem:[%s1749_s4 + $0x130] sm:$0xff] %vm244_vm0, %v900_v44  ;;  %v652_v49 = vmul.f32 %v1336_v32, %v516_v17  ;;  %v625_v50 = vmul.f32 %v1096_v37, %v1336_v32  ;;  %v404_v51 = vpop.f32.mrb[11].mxu0  ;;  %v1129_v52 = vpop.f32.mrb[10].mxu1 }
  0xf1   :  { %929 = vst.msk [vmem:[%s1749_s4 + $0x38] sm:$0xff] %vm244_vm0, %v869_v47  ;;  %v867_v53 = vsel %vm747_vm13, %v687_v30, %v807_v43  ;;  %v623_v55 = vmul.f32 %v1336_v32, %v401_v41  ;;  %v626_v56 = vmul.f32 %v1097_v46, %v1336_v32  ;;  %v532_v57 = vpop.f32.mrb[11].mxu1  ;;  %vm781_vm15 = vcmp.ge.f32.partialorder %v721_v48, 0.0 }
  0xf2   :  { %v898_v54 = vsel %vm778_vm14, %v718_v35, %v838_v45  ;;  %927 = vst.msk [vmem:[%s1749_s4 + $0x28] sm:$0xff] %vm244_vm0, %v867_v53  ;;  %v841_v58 = vmul.f32 0.01, %v721_v48  ;;  %v719_v59 = vadd.f32 %v1341_v34, %v652_v49  ;;  %v692_v60 = vadd.f32 %v1341_v34, %v625_v50 }
  0xf3   :  { %958 = vst.msk [vmem:[%s1749_s4 + $0x120] sm:$0xff] %vm244_vm0, %v898_v54  ;;  %v690_v61 = vadd.f32 %v1341_v34, %v623_v55  ;;  %v693_v62 = vadd.f32 %v1341_v34, %v626_v56  ;;  %v624_v63 = vmul.f32 %v1336_v32, %v404_v51  ;;  %v657_v0 = vmul.f32 %v1128_v38, %v1336_v32 }
  0xf4   :  { %v901_v1 = vsel %vm781_vm15, %v721_v48, %v841_v58  ;;  %vm779_vm1 = vcmp.ge.f32.partialorder %v719_v59, 0.0  ;;  %v839_v2 = vmul.f32 0.01, %v719_v59  ;;  %vm752_vm2 = vcmp.ge.f32.partialorder %v692_v60, 0.0 }
  0xf5   :  { %961 = vst.msk [vmem:[%s1749_s4 + $0x138] sm:$0xff] %vm244_vm0, %v901_v1  ;;  %v812_v3 = vmul.f32 0.01, %v692_v60  ;;  %vm750_vm3 = vcmp.ge.f32.partialorder %v690_v61, 0.0  ;;  %v810_v4 = vmul.f32 0.01, %v690_v61  ;;  %v691_v7 = vadd.f32 %v1341_v34, %v624_v63 }
  0xf6   :  { %vm753_vm4 = vcmp.ge.f32.partialorder %v693_v62, 0.0  ;;  %v899_v5 = vsel %vm779_vm1, %v719_v59, %v839_v2  ;;  %v813_v6 = vmul.f32 0.01, %v693_v62  ;;  %v724_v8 = vadd.f32 %v1341_v34, %v657_v0  ;;  %v1100_v9 = vpop.f32.mrb[12].mxu0  ;;  %v1132_v10 = vpop.f32.mrb[12].mxu1 }
  0xf7   :  { %959 = vst.msk [vmem:[%s1749_s4 + $0x128] sm:$0xff] %vm244_vm0, %v899_v5  ;;  %v872_v11 = vsel %vm752_vm2, %v692_v60, %v812_v3  ;;  %v870_v12 = vsel %vm750_vm3, %v690_v61, %v810_v4  ;;  %v655_v13 = vmul.f32 %v1336_v32, %v529_v42  ;;  %v658_v14 = vmul.f32 %v1129_v52, %v1336_v32  ;;  %v417_v15 = vpop.f32.mrb[13].mxu0  ;;  %v545_v16 = vpop.f32.mrb[13].mxu1 }
  0xf8   :  { %932 = vst.msk [vmem:[%s1749_s4 + $0x50] sm:$0xff] %vm244_vm0, %v872_v11  ;;  %930 = vst.msk [vmem:[%s1749_s4 + $0x40] sm:$0xff] %vm244_vm0, %v870_v12  ;;  %v873_v17 = vsel %vm753_vm4, %v693_v62, %v813_v6  ;;  %vm751_vm5 = vcmp.ge.f32.partialorder %v691_v7, 0.0  ;;  %v811_v18 = vmul.f32 0.01, %v691_v7  ;;  %vm784_vm6 = vcmp.ge.f32.partialorder %v724_v8, 0.0 }
  0xf9   :  { %v1101_v19 = vpop.f32.mrb[14].mxu0  ;;  %v1133_v20 = vpop.f32.mrb[14].mxu1  ;;  %933 = vst.msk [vmem:[%s1749_s4 + $0x58] sm:$0xff] %vm244_vm0, %v873_v17  ;;  %v844_v21 = vmul.f32 0.01, %v724_v8  ;;  %v722_v22 = vadd.f32 %v1341_v34, %v655_v13  ;;  %v725_v23 = vadd.f32 %v1341_v34, %v658_v14  ;;  %v656_v24 = vmul.f32 %v1336_v32, %v532_v57 }
  0xfa   :  { %v420_v25 = vpop.f32.mrb[15].mxu0  ;;  %v548_v26 = vpop.f32.mrb[15].mxu1  ;;  %v871_v27 = vsel %vm751_vm5, %v691_v7, %v811_v18  ;;  %v629_v28 = vmul.f32 %v1100_v9, %v1336_v32  ;;  %v627_v29 = vmul.f32 %v1336_v32, %v417_v15  ;;  %v630_v30 = vmul.f32 %v1101_v19, %v1336_v32 }
  0xfb   :  { %931 = vst.msk [vmem:[%s1749_s4 + $0x48] sm:$0xff] %vm244_vm0, %v871_v27  ;;  %v904_v31 = vsel %vm784_vm6, %v724_v8, %v844_v21  ;;  %vm782_vm7 = vcmp.ge.f32.partialorder %v722_v22, 0.0  ;;  %v842_v33 = vmul.f32 0.01, %v722_v22  ;;  %vm785_vm8 = vcmp.ge.f32.partialorder %v725_v23, 0.0 }
  0xfc   :  { %964 = vst.msk [vmem:[%s1749_s4 + $0x150] sm:$0xff] %vm244_vm0, %v904_v31  ;;  %v845_v35 = vmul.f32 0.01, %v725_v23  ;;  %v723_v36 = vadd.f32 %v1341_v34, %v656_v24  ;;  %v696_v37 = vadd.f32 %v1341_v34, %v629_v28  ;;  %v694_v38 = vadd.f32 %v1341_v34, %v627_v29 }
  0xfd   :  { %v902_v39 = vsel %vm782_vm7, %v722_v22, %v842_v33  ;;  %v697_v40 = vadd.f32 %v1341_v34, %v630_v30  ;;  %v628_v41 = vmul.f32 %v1336_v32, %v420_v25  ;;  %v661_v42 = vmul.f32 %v1132_v10, %v1336_v32  ;;  %v1104_v43 = vpop.f32.mrb[16].mxu0  ;;  %v1136_v44 = vpop.f32.mrb[16].mxu1 }
  0xfe   :  { %962 = vst.msk [vmem:[%s1749_s4 + $0x140] sm:$0xff] %vm244_vm0, %v902_v39  ;;  %v905_v45 = vsel %vm785_vm8, %v725_v23, %v845_v35  ;;  %vm783_vm9 = vcmp.ge.f32.partialorder %v723_v36, 0.0  ;;  %v843_v46 = vmul.f32 0.01, %v723_v36  ;;  %vm756_vm10 = vcmp.ge.f32.partialorder %v696_v37, 0.0  ;;  %v433_v47 = vpop.f32.mrb[17].mxu0 }
  0xff   :  { %v1491_v48 = vpop.f32.mrb[17].mxu1  ;;  %965 = vst.msk [vmem:[%s1749_s4 + $0x158] sm:$0xff] %vm244_vm0, %v905_v45  ;;  %v816_v49 = vmul.f32 0.01, %v696_v37  ;;  %vm754_vm11 = vcmp.ge.f32.partialorder %v694_v38, 0.0  ;;  %vm757_vm12 = vcmp.ge.f32.partialorder %v697_v40, 0.0  ;;  %v695_v53 = vadd.f32 %v1341_v34, %v628_v41 }
 0x100   :  { %v814_v50 = vmul.f32 0.01, %v694_v38  ;;  %v903_v51 = vsel %vm783_vm9, %v723_v36, %v843_v46  ;;  %v817_v52 = vmul.f32 0.01, %v697_v40  ;;  %v728_v54 = vadd.f32 %v1341_v34, %v661_v42  ;;  %v1105_v55 = vpop.f32.mrb[18].mxu0  ;;  %v1499_v56 = vpop.f32.mrb[18].mxu1 }
 0x101   :  { %963 = vst.msk [vmem:[%s1749_s4 + $0x148] sm:$0xff] %vm244_vm0, %v903_v51  ;;  %v876_v57 = vsel %vm756_vm10, %v696_v37, %v816_v49  ;;  %v659_v59 = vmul.f32 %v1336_v32, %v545_v16  ;;  %v662_v60 = vmul.f32 %v1133_v20, %v1336_v32  ;;  %v436_v61 = vpop.f32.mrb[19].mxu0  ;;  %v1507_v62 = vpop.f32.mrb[19].mxu1  ;;  %vm755_vm13 = vcmp.ge.f32.partialorder %v695_v53, 0.0 }
 0x102   :  { %v874_v58 = vsel %vm754_vm11, %v694_v38, %v814_v50  ;;  %936 = vst.msk [vmem:[%s1749_s4 + $0x70] sm:$0xff] %vm244_vm0, %v876_v57  ;;  %v877_v63 = vsel %vm757_vm12, %v697_v40, %v817_v52  ;;  %v815_v0 = vmul.f32 0.01, %v695_v53  ;;  %vm788_vm14 = vcmp.ge.f32.partialorder %v728_v54, 0.0 }
 0x103   :  { %934 = vst.msk [vmem:[%s1749_s4 + $0x60] sm:$0xff] %vm244_vm0, %v874_v58  ;;  %937 = vst.msk [vmem:[%s1749_s4 + $0x78] sm:$0xff] %vm244_vm0, %v877_v63  ;;  %v848_v1 = vmul.f32 0.01, %v728_v54  ;;  %v726_v2 = vadd.f32 %v1341_v34, %v659_v59  ;;  %v729_v3 = vadd.f32 %v1341_v34, %v662_v60  ;;  %v660_v4 = vmul.f32 %v1336_v32, %v548_v26 }
 0x104   :  { %v875_v5 = vsel %vm755_vm13, %v695_v53, %v815_v0  ;;  %v633_v6 = vmul.f32 %v1104_v43, %v1336_v32  ;;  %v631_v7 = vmul.f32 %v1336_v32, %v433_v47  ;;  %v634_v8 = vmul.f32 %v1105_v55, %v1336_v32 }
 0x105   :  { %935 = vst.msk [vmem:[%s1749_s4 + $0x68] sm:$0xff] %vm244_vm0, %v875_v5  ;;  %v908_v9 = vsel %vm788_vm14, %v728_v54, %v848_v1  ;;  %vm786_vm15 = vcmp.ge.f32.partialorder %v726_v2, 0.0  ;;  %v846_v10 = vmul.f32 0.01, %v726_v2  ;;  %vm789_vm1 = vcmp.ge.f32.partialorder %v729_v3, 0.0  ;;  %v1108_v11 = vpop.f32.mrb[20].mxu0 }
 0x106   :  { %v1532_v12 = vpop.f32.mrb[20].mxu1  ;;  %968 = vst.msk [vmem:[%s1749_s4 + $0x170] sm:$0xff] %vm244_vm0, %v908_v9  ;;  %v849_v13 = vmul.f32 0.01, %v729_v3  ;;  %v727_v14 = vadd.f32 %v1341_v34, %v660_v4  ;;  %v700_v15 = vadd.f32 %v1341_v34, %v633_v6  ;;  %v698_v16 = vadd.f32 %v1341_v34, %v631_v7  ;;  %v449_v17 = vpop.f32.mrb[21].mxu0 }
 0x107   :  { %v1541_v18 = vpop.f32.mrb[21].mxu1  ;;  %v906_v19 = vsel %vm786_vm15, %v726_v2, %v846_v10  ;;  %v701_v20 = vadd.f32 %v1341_v34, %v634_v8  ;;  %v632_v21 = vmul.f32 %v1336_v32, %v436_v61  ;;  %v665_v22 = vmul.f32 %v1136_v44, %v1336_v32  ;;  %v1109_v23 = vpop.f32.mrb[22].mxu0 }
 0x108   :  { %v1546_v24 = vpop.f32.mrb[22].mxu1  ;;  %966 = vst.msk [vmem:[%s1749_s4 + $0x160] sm:$0xff] %vm244_vm0, %v906_v19  ;;  %v909_v25 = vsel %vm789_vm1, %v729_v3, %v849_v13  ;;  %vm787_vm2 = vcmp.ge.f32.partialorder %v727_v14, 0.0  ;;  %v847_v26 = vmul.f32 0.01, %v727_v14  ;;  %vm760_vm3 = vcmp.ge.f32.partialorder %v700_v15, 0.0 }
 0x109   :  { %v452_v27 = vpop.f32.mrb[23].mxu0  ;;  %v1553_v28 = vpop.f32.mrb[23].mxu1  ;;  %969 = vst.msk [vmem:[%s1749_s4 + $0x178] sm:$0xff] %vm244_vm0, %v909_v25  ;;  %v820_v29 = vmul.f32 0.01, %v700_v15  ;;  %vm758_vm4 = vcmp.ge.f32.partialorder %v698_v16, 0.0  ;;  %v699_v35 = vadd.f32 %v1341_v34, %v632_v21  ;;  %v732_v36 = vadd.f32 %v1341_v34, %v665_v22 }
 0x10a   :  { %v818_v30 = vmul.f32 0.01, %v698_v16  ;;  %vm761_vm5 = vcmp.ge.f32.partialorder %v701_v20, 0.0  ;;  %v907_v31 = vsel %vm787_vm2, %v727_v14, %v847_v26  ;;  %v821_v33 = vmul.f32 0.01, %v701_v20 }
 0x10b   :  { %967 = vst.msk [vmem:[%s1749_s4 + $0x168] sm:$0xff] %vm244_vm0, %v907_v31  ;;  %v880_v37 = vsel %vm760_vm3, %v700_v15, %v820_v29  ;;  %v663_v39 = vmul.f32 %v1336_v32, %v1491_v48  ;;  %v666_v40 = vmul.f32 %v1499_v56, %v1336_v32  ;;  %vm759_vm6 = vcmp.ge.f32.partialorder %v699_v35, 0.0 }
 0x10c   :  { %v878_v38 = vsel %vm758_vm4, %v698_v16, %v818_v30  ;;  %940 = vst.msk [vmem:[%s1749_s4 + $0x90] sm:$0xff] %vm244_vm0, %v880_v37  ;;  %v881_v41 = vsel %vm761_vm5, %v701_v20, %v821_v33  ;;  %v819_v42 = vmul.f32 0.01, %v699_v35  ;;  %vm792_vm7 = vcmp.ge.f32.partialorder %v732_v36, 0.0 }
 0x10d   :  { %938 = vst.msk [vmem:[%s1749_s4 + $0x80] sm:$0xff] %vm244_vm0, %v878_v38  ;;  %941 = vst.msk [vmem:[%s1749_s4 + $0x98] sm:$0xff] %vm244_vm0, %v881_v41  ;;  %v852_v43 = vmul.f32 0.01, %v732_v36  ;;  %v730_v44 = vadd.f32 %v1341_v34, %v663_v39  ;;  %v733_v45 = vadd.f32 %v1341_v34, %v666_v40  ;;  %v664_v46 = vmul.f32 %v1336_v32, %v1507_v62  ;;  %v1112_v47 = vpop.f32.mrb[24].mxu0  ;;  %v1585_v48 = vpop.f32.mrb[24].mxu1 }
 0x10e   :  { %v879_v49 = vsel %vm759_vm6, %v699_v35, %v819_v42  ;;  %v637_v50 = vmul.f32 %v1108_v11, %v1336_v32  ;;  %v635_v51 = vmul.f32 %v1336_v32, %v449_v17  ;;  %v638_v52 = vmul.f32 %v1109_v23, %v1336_v32  ;;  %v465_v53 = vpop.f32.mrb[25].mxu0  ;;  %v1590_v54 = vpop.f32.mrb[25].mxu1 }
 0x10f   :  { %939 = vst.msk [vmem:[%s1749_s4 + $0x88] sm:$0xff] %vm244_vm0, %v879_v49  ;;  %v912_v55 = vsel %vm792_vm7, %v732_v36, %v852_v43  ;;  %vm790_vm8 = vcmp.ge.f32.partialorder %v730_v44, 0.0  ;;  %v850_v56 = vmul.f32 0.01, %v730_v44  ;;  %vm793_vm9 = vcmp.ge.f32.partialorder %v733_v45, 0.0  ;;  %v1113_v57 = vpop.f32.mrb[26].mxu0 }
 0x110   :  { %v1596_v58 = vpop.f32.mrb[26].mxu1  ;;  %972 = vst.msk [vmem:[%s1749_s4 + $0x190] sm:$0xff] %vm244_vm0, %v912_v55  ;;  %v853_v59 = vmul.f32 0.01, %v733_v45  ;;  %v731_v60 = vadd.f32 %v1341_v34, %v664_v46  ;;  %v704_v61 = vadd.f32 %v1341_v34, %v637_v50  ;;  %v702_v62 = vadd.f32 %v1341_v34, %v635_v51  ;;  %v468_v63 = vpop.f32.mrb[27].mxu0 }
 0x111   :  { %v1605_v0 = vpop.f32.mrb[27].mxu1  ;;  %v910_v1 = vsel %vm790_vm8, %v730_v44, %v850_v56  ;;  %v705_v2 = vadd.f32 %v1341_v34, %v638_v52  ;;  %v636_v3 = vmul.f32 %v1336_v32, %v452_v27  ;;  %v669_v4 = vmul.f32 %v1532_v12, %v1336_v32 }
 0x112   :  { %970 = vst.msk [vmem:[%s1749_s4 + $0x180] sm:$0xff] %vm244_vm0, %v910_v1  ;;  %v913_v5 = vsel %vm793_vm9, %v733_v45, %v853_v59  ;;  %vm791_vm10 = vcmp.ge.f32.partialorder %v731_v60, 0.0  ;;  %v851_v6 = vmul.f32 0.01, %v731_v60  ;;  %vm764_vm11 = vcmp.ge.f32.partialorder %v704_v61, 0.0 }
 0x113   :  { %973 = vst.msk [vmem:[%s1749_s4 + $0x198] sm:$0xff] %vm244_vm0, %v913_v5  ;;  %v824_v7 = vmul.f32 0.01, %v704_v61  ;;  %vm762_vm12 = vcmp.ge.f32.partialorder %v702_v62, 0.0  ;;  %v822_v8 = vmul.f32 0.01, %v702_v62  ;;  %v703_v11 = vadd.f32 %v1341_v34, %v636_v3 }
 0x114   :  { %vm765_vm13 = vcmp.ge.f32.partialorder %v705_v2, 0.0  ;;  %v911_v9 = vsel %vm791_vm10, %v731_v60, %v851_v6  ;;  %v825_v10 = vmul.f32 0.01, %v705_v2  ;;  %v736_v12 = vadd.f32 %v1341_v34, %v669_v4 }
 0x115   :  { %971 = vst.msk [vmem:[%s1749_s4 + $0x188] sm:$0xff] %vm244_vm0, %v911_v9  ;;  %v884_v13 = vsel %vm764_vm11, %v704_v61, %v824_v7  ;;  %v882_v14 = vsel %vm762_vm12, %v702_v62, %v822_v8  ;;  %v667_v15 = vmul.f32 %v1336_v32, %v1541_v18  ;;  %v670_v16 = vmul.f32 %v1546_v24, %v1336_v32  ;;  %v1629_v17 = vpop.f32.mrb[28].mxu0 }
 0x116   :  { %944 = vst.msk [vmem:[%s1749_s4 + $0xb0] sm:$0xff] %vm244_vm0, %v884_v13  ;;  %942 = vst.msk [vmem:[%s1749_s4 + $0xa0] sm:$0xff] %vm244_vm0, %v882_v14  ;;  %v885_v19 = vsel %vm765_vm13, %v705_v2, %v825_v10  ;;  %vm763_vm14 = vcmp.ge.f32.partialorder %v703_v11, 0.0  ;;  %v823_v20 = vmul.f32 0.01, %v703_v11  ;;  %vm796_vm15 = vcmp.ge.f32.partialorder %v736_v12, 0.0 }
 0x117   :  { %v481_v18 = vpop.f32.mrb[29].mxu0  ;;  %945 = vst.msk [vmem:[%s1749_s4 + $0xb8] sm:$0xff] %vm244_vm0, %v885_v19  ;;  %v856_v21 = vmul.f32 0.01, %v736_v12  ;;  %v734_v22 = vadd.f32 %v1341_v34, %v667_v15  ;;  %v737_v23 = vadd.f32 %v1341_v34, %v670_v16  ;;  %v668_v24 = vmul.f32 %v1336_v32, %v1553_v28 }
 0x118   :  { %v1117_v25 = vpop.f32.mrb[30].mxu0  ;;  %v883_v26 = vsel %vm763_vm14, %v703_v11, %v823_v20  ;;  %v641_v27 = vmul.f32 %v1112_v47, %v1336_v32  ;;  %v639_v29 = vmul.f32 %v1336_v32, %v465_v53  ;;  %v642_v30 = vmul.f32 %v1113_v57, %v1336_v32 }
 0x119   :  { %v484_v31 = vpop.f32.mrb[31].mxu0  ;;  %943 = vst.msk [vmem:[%s1749_s4 + $0xa8] sm:$0xff] %vm244_vm0, %v883_v26  ;;  %v916_v33 = vsel %vm796_vm15, %v736_v12, %v856_v21  ;;  %vm794_vm1 = vcmp.ge.f32.partialorder %v734_v22, 0.0  ;;  %v854_v35 = vmul.f32 0.01, %v734_v22  ;;  %vm797_vm2 = vcmp.ge.f32.partialorder %v737_v23, 0.0 }
 0x11a   :  { %976 = vst.msk [vmem:[%s1749_s4 + $0x1b0] sm:$0xff] %vm244_vm0, %v916_v33  ;;  %v857_v28 = vmul.f32 0.01, %v737_v23  ;;  %v735_v36 = vadd.f32 %v1341_v34, %v668_v24  ;;  %v708_v37 = vadd.f32 %v1341_v34, %v641_v27  ;;  %v706_v38 = vadd.f32 %v1341_v34, %v639_v29 }
 0x11b   :  { %v914_v39 = vsel %vm794_vm1, %v734_v22, %v854_v35  ;;  %v709_v40 = vadd.f32 %v1341_v34, %v642_v30  ;;  %v640_v41 = vmul.f32 %v1336_v32, %v468_v63  ;;  %v673_v42 = vmul.f32 %v1585_v48, %v1336_v32 }
 0x11c   :  { %974 = vst.msk [vmem:[%s1749_s4 + $0x1a0] sm:$0xff] %vm244_vm0, %v914_v39  ;;  %v917_v43 = vsel %vm797_vm2, %v737_v23, %v857_v28  ;;  %vm795_vm3 = vcmp.ge.f32.partialorder %v735_v36, 0.0  ;;  %v855_v44 = vmul.f32 0.01, %v735_v36  ;;  %vm768_vm4 = vcmp.ge.f32.partialorder %v708_v37, 0.0 }
 0x11d   :  { %977 = vst.msk [vmem:[%s1749_s4 + $0x1b8] sm:$0xff] %vm244_vm0, %v917_v43  ;;  %v828_v45 = vmul.f32 0.01, %v708_v37  ;;  %vm766_vm5 = vcmp.ge.f32.partialorder %v706_v38, 0.0  ;;  %v826_v46 = vmul.f32 0.01, %v706_v38  ;;  %v707_v49 = vadd.f32 %v1341_v34, %v640_v41 }
 0x11e   :  { %vm769_vm6 = vcmp.ge.f32.partialorder %v709_v40, 0.0  ;;  %v915_v47 = vsel %vm795_vm3, %v735_v36, %v855_v44  ;;  %v829_v48 = vmul.f32 0.01, %v709_v40  ;;  %v740_v50 = vadd.f32 %v1341_v34, %v673_v42 }
 0x11f   :  { %975 = vst.msk [vmem:[%s1749_s4 + $0x1a8] sm:$0xff] %vm244_vm0, %v915_v47  ;;  %v888_v51 = vsel %vm768_vm4, %v708_v37, %v828_v45  ;;  %v886_v52 = vsel %vm766_vm5, %v706_v38, %v826_v46  ;;  %v671_v53 = vmul.f32 %v1336_v32, %v1590_v54  ;;  %v674_v55 = vmul.f32 %v1596_v58, %v1336_v32 }
 0x120   :  { %948 = vst.msk [vmem:[%s1749_s4 + $0xd0] sm:$0xff] %vm244_vm0, %v888_v51  ;;  %946 = vst.msk [vmem:[%s1749_s4 + $0xc0] sm:$0xff] %vm244_vm0, %v886_v52  ;;  %v889_v56 = vsel %vm769_vm6, %v709_v40, %v829_v48  ;;  %vm767_vm7 = vcmp.ge.f32.partialorder %v707_v49, 0.0  ;;  %v827_v57 = vmul.f32 0.01, %v707_v49  ;;  %vm800_vm8 = vcmp.ge.f32.partialorder %v740_v50, 0.0 }
 0x121   :  { %949 = vst.msk [vmem:[%s1749_s4 + $0xd8] sm:$0xff] %vm244_vm0, %v889_v56  ;;  %v860_v54 = vmul.f32 0.01, %v740_v50  ;;  %v738_v58 = vadd.f32 %v1341_v34, %v671_v53  ;;  %v741_v59 = vadd.f32 %v1341_v34, %v674_v55  ;;  %v672_v60 = vmul.f32 %v1336_v32, %v1605_v0 }
 0x122   :  { %v887_v61 = vsel %vm767_vm7, %v707_v49, %v827_v57  ;;  %v645_v62 = vmul.f32 %v1629_v17, %v1336_v32  ;;  %v643_v63 = vmul.f32 %v1336_v32, %v481_v18  ;;  %v646_v1 = vmul.f32 %v1117_v25, %v1336_v32 }
 0x123   :  { %947 = vst.msk [vmem:[%s1749_s4 + $0xc8] sm:$0xff] %vm244_vm0, %v887_v61  ;;  %v920_v2 = vsel %vm800_vm8, %v740_v50, %v860_v54  ;;  %vm798_vm9 = vcmp.ge.f32.partialorder %v738_v58, 0.0  ;;  %v858_v3 = vmul.f32 0.01, %v738_v58  ;;  %vm801_vm10 = vcmp.ge.f32.partialorder %v741_v59, 0.0 }
 0x124   :  { %980 = vst.msk [vmem:[%s1749_s4 + $0x1d0] sm:$0xff] %vm244_vm0, %v920_v2  ;;  %v861_v0 = vmul.f32 0.01, %v741_v59  ;;  %v739_v4 = vadd.f32 %v1341_v34, %v672_v60  ;;  %v712_v5 = vadd.f32 %v1341_v34, %v645_v62  ;;  %v710_v6 = vadd.f32 %v1341_v34, %v643_v63 }
 0x125   :  { %v918_v7 = vsel %vm798_vm9, %v738_v58, %v858_v3  ;;  %v713_v8 = vadd.f32 %v1341_v34, %v646_v1  ;;  %v644_v9 = vmul.f32 %v1336_v32, %v484_v31 }
 0x126   :  { %978 = vst.msk [vmem:[%s1749_s4 + $0x1c0] sm:$0xff] %vm244_vm0, %v918_v7  ;;  %v921_v10 = vsel %vm801_vm10, %v741_v59, %v861_v0  ;;  %vm799_vm11 = vcmp.ge.f32.partialorder %v739_v4, 0.0  ;;  %v859_v11 = vmul.f32 0.01, %v739_v4  ;;  %vm772_vm12 = vcmp.ge.f32.partialorder %v712_v5, 0.0 }
 0x127   :  { %981 = vst.msk [vmem:[%s1749_s4 + $0x1d8] sm:$0xff] %vm244_vm0, %v921_v10  ;;  %v832_v12 = vmul.f32 0.01, %v712_v5  ;;  %vm770_vm13 = vcmp.ge.f32.partialorder %v710_v6, 0.0  ;;  %v830_v13 = vmul.f32 0.01, %v710_v6  ;;  %v711_v15 = vadd.f32 %v1341_v34, %v644_v9 }
 0x128   :  { %vm773_vm14 = vcmp.ge.f32.partialorder %v713_v8, 0.0  ;;  %v919_v14 = vsel %vm799_vm11, %v739_v4, %v859_v11  ;;  %v833_v32 = vmul.f32 0.01, %v713_v8 }
 0x129   :  { %979 = vst.msk [vmem:[%s1749_s4 + $0x1c8] sm:$0xff] %vm244_vm0, %v919_v14  ;;  %v892_v16 = vsel %vm772_vm12, %v712_v5, %v832_v12  ;;  %v890_v17 = vsel %vm770_vm13, %v710_v6, %v830_v13  ;;  %vm771_vm15 = vcmp.ge.f32.partialorder %v711_v15, 0.0  ;;  %v831_v34 = vmul.f32 0.01, %v711_v15 }
 0x12a   :  { %952 = vst.msk [vmem:[%s1749_s4 + $0xf0] sm:$0xff] %vm244_vm0, %v892_v16  ;;  %950 = vst.msk [vmem:[%s1749_s4 + $0xe0] sm:$0xff] %vm244_vm0, %v890_v17  ;;  %v893_v19 = vsel %vm773_vm14, %v713_v8, %v833_v32 }
 0x12b   :  { %953 = vst.msk [vmem:[%s1749_s4 + $0xf8] sm:$0xff] %vm244_vm0, %v893_v19  ;;  %v891_v20 = vsel %vm771_vm15, %v711_v15, %v831_v34 }
 0x12c   :  { %951 = vst.msk [vmem:[%s1749_s4 + $0xe8] sm:$0xff] %vm244_vm0, %v891_v20 }

// kernel: fwd.9
= control target key start
LH: loop header
LB: loop body
LE: loop exit
PB: predicated region body
PF: predicated region fallthrough
CT: control target
= control target key end

     0   :  { %v1227_v0 = vmov 0.0   ;;  %vm1228_vm0 = vmmov 0   ;;  %vm250_vm1 = vcmask 523264   ;;  %vm901_vm2 = vcmask 261120   ;;  %s1800_s1 = inlined_call_operand.vmem [shape: bf16[64,32], index: 1, kind: input, shape index: {}]   ;;  %s1801_s0 = inlined_call_operand.vmem [shape: bf16[456,64], index: 0, kind: input, shape index: {}]   ;;  %s1802_s2 = inlined_call_operand.vmem [shape: f32[1,32], index: 2, kind: input, shape index: {}]   ;;  %s1803_s3 = inlined_call_operand.vmem [shape: f32[1,32], index: 3, kind: input, shape index: {}]   ;;  %s1804_s4 = inlined_call_operand.vmem [shape: f32[456,32], index: 4, kind: output, shape index: {}]  }
   0x1   :  { %1060 = vmatprep.subr.bf16.mxu0 %v1227_v0  ;;  %v1194_v1 = vld [vmem:[%s1800_s1] sm:$0xff]   ;;  %1184 = vmatprep.subr.bf16.mxu1 %v1227_v0  ;;  %v1195_v2 = vld [vmem:[%s1800_s1 + $0x8] sm:$0xff]   ;;  %v1196_v3 = vld [vmem:[%s1800_s1 + $0x10] sm:$0xff]  }
   0x2   :  { %1068 = vmatprep.mubr.msk.bf16.mxu0 %vm1228_vm0, %v1227_v0  ;;  %1128 = vmatprep.mubr.msk.bf16.mxu1 %vm1228_vm0, %v1227_v0  ;;  %v1197_v4 = vld [vmem:[%s1800_s1 + $0x18] sm:$0xff]   ;;  %v1198_v5 = vld [vmem:[%s1801_s0] sm:$0xff]   ;;  %v1200_v7 = vld [vmem:[%s1801_s0 + $0x8] sm:$0xff]  }
   0x3   :  { %1061 = vmatpush3.bf16.msra.mxu0 %v1194_v1  ;;  %1188 = vmatpush3.bf16.msra.mxu1 %v1194_v1  ;;  %v1199_v6 = vld [vmem:[%s1801_s0 + $0x78] sm:$0xff]   ;;  %v1201_v8 = vld [vmem:[%s1801_s0 + $0x80] sm:$0xff]   ;;  %v1202_v9 = vld [vmem:[%s1801_s0 + $0x10] sm:$0xff]  }
   0x4   :  { %1062 = vmatprep.subr.bf16.mxu0 %v1227_v0  ;;  %1185 = vmatprep.subr.bf16.mxu1 %v1227_v0  ;;  %v1203_v10 = vld [vmem:[%s1801_s0 + $0x88] sm:$0xff]   ;;  %v1204_v11 = vld [vmem:[%s1801_s0 + $0x18] sm:$0xff]   ;;  %v1205_v12 = vld [vmem:[%s1801_s0 + $0x90] sm:$0xff]  }
   0x5   :  { %v1206_v13 = vld [vmem:[%s1801_s0 + $0x20] sm:$0xff]   ;;  %v1207_v14 = vld [vmem:[%s1801_s0 + $0x98] sm:$0xff]   ;;  %v1208_v15 = vld [vmem:[%s1801_s0 + $0x28] sm:$0xff]  }
   0x6   :  { %v1209_v16 = vld [vmem:[%s1801_s0 + $0xa0] sm:$0xff]   ;;  %v1210_v17 = vld [vmem:[%s1801_s0 + $0x30] sm:$0xff]   ;;  %v1211_v18 = vld [vmem:[%s1801_s0 + $0xa8] sm:$0xff]  }
   0x7   :  { %1063 = vmatpush3.bf16.msra.mxu0 %v1195_v2  ;;  %1189 = vmatpush3.bf16.msra.mxu1 %v1195_v2  ;;  %v1212_v19 = vld [vmem:[%s1801_s0 + $0x38] sm:$0xff]   ;;  %v1213_v20 = vld [vmem:[%s1801_s0 + $0xb0] sm:$0xff]   ;;  %v1214_v21 = vld [vmem:[%s1801_s0 + $0x40] sm:$0xff]  }
   0x8   :  { %1064 = vmatprep.subr.bf16.mxu0 %v1227_v0  ;;  %1186 = vmatprep.subr.bf16.mxu1 %v1227_v0  ;;  %v1215_v22 = vld [vmem:[%s1801_s0 + $0xb8] sm:$0xff]   ;;  %v1216_v23 = vld [vmem:[%s1801_s0 + $0x48] sm:$0xff]   ;;  %v1217_v24 = vld [vmem:[%s1801_s0 + $0xc0] sm:$0xff]  }
   0x9   :  { %v1218_v25 = vld [vmem:[%s1801_s0 + $0x50] sm:$0xff]   ;;  %v1219_v26 = vld [vmem:[%s1801_s0 + $0xc8] sm:$0xff]   ;;  %v1220_v27 = vld [vmem:[%s1801_s0 + $0x58] sm:$0xff]  }
   0xa   :  { %v1221_v28 = vld [vmem:[%s1801_s0 + $0xd0] sm:$0xff]   ;;  %v1222_v29 = vld [vmem:[%s1801_s0 + $0x60] sm:$0xff]   ;;  %v1223_v30 = vld [vmem:[%s1801_s0 + $0xd8] sm:$0xff]  }
   0xb   :  { %1065 = vmatpush3.bf16.msra.mxu0 %v1196_v3  ;;  %1190 = vmatpush3.bf16.msra.mxu1 %v1196_v3  ;;  %v1224_v31 = vld [vmem:[%s1801_s0 + $0x68] sm:$0xff]   ;;  %v1225_v32 = vld [vmem:[%s1801_s0 + $0xe0] ss:$0 sps:$4 sm:$0xff]   ;;  %v1226_v33 = vld [vmem:[%s1801_s0 + $0x70] sm:$0xff]  }
   0xc   :  { %1066 = vmatprep.subr.bf16.mxu0 %v1227_v0  ;;  %1187 = vmatprep.subr.bf16.mxu1 %v1227_v0  ;;  %v1451_v34 = vld [vmem:[%s1802_s2] ss:$0 sm:$0xff] }
   0xd   :  { %v1456_v36 = vld [vmem:[%s1803_s3] ss:$0 sm:$0xff] }
   0xf   :  { %1067 = vmatpush3.bf16.msra.mxu0 %v1197_v4  ;;  %1191 = vmatpush3.bf16.msra.mxu1 %v1197_v4 }
  0x12   :  { %1069 = vmatmul.mubr.msk.bf16.vlgmr.msra.gmra.mrb[0].mxu0 %vm250_vm1, %v1198_v5  ;;  %1129 = vmatmul.mubr.msk.bf16.vlgmr.msra.gmra.mrb[0].mxu1 %vm250_vm1, %v1199_v6 }
  0x13   :  { %1072 = vmatprep.mubr.msk.bf16.mxu0 %vm1228_vm0, %v1227_v0  ;;  %1132 = vmatprep.mubr.msk.bf16.mxu1 %vm1228_vm0, %v1227_v0 }
  0x1a   :  { %1073 = vmatmul.mubr.msk.bf16.gmra.mrb[4].mxu0 %vm250_vm1, %v1200_v7  ;;  %1133 = vmatmul.mubr.msk.bf16.gmra.mrb[4].mxu1 %vm250_vm1, %v1201_v8 }
  0x1b   :  { %1076 = vmatprep.mubr.msk.bf16.mxu0 %vm1228_vm0, %v1227_v0  ;;  %1136 = vmatprep.mubr.msk.bf16.mxu1 %vm1228_vm0, %v1227_v0 }
  0x22   :  { %1077 = vmatmul.mubr.msk.bf16.gmra.mrb[8].mxu0 %vm250_vm1, %v1202_v9  ;;  %1137 = vmatmul.mubr.msk.bf16.gmra.mrb[8].mxu1 %vm250_vm1, %v1203_v10 }
  0x23   :  { %1080 = vmatprep.mubr.msk.bf16.mxu0 %vm1228_vm0, %v1227_v0  ;;  %1140 = vmatprep.mubr.msk.bf16.mxu1 %vm1228_vm0, %v1227_v0 }
  0x2a   :  { %1081 = vmatmul.mubr.msk.bf16.gmra.mrb[12].mxu0 %vm250_vm1, %v1204_v11  ;;  %1141 = vmatmul.mubr.msk.bf16.gmra.mrb[12].mxu1 %vm250_vm1, %v1205_v12 }
  0x2b   :  { %1084 = vmatprep.mubr.msk.bf16.mxu0 %vm1228_vm0, %v1227_v0  ;;  %1144 = vmatprep.mubr.msk.bf16.mxu1 %vm1228_vm0, %v1227_v0 }
  0x32   :  { %1085 = vmatmul.mubr.msk.bf16.gmra.mrb[16].mxu0 %vm250_vm1, %v1206_v13  ;;  %1145 = vmatmul.mubr.msk.bf16.gmra.mrb[16].mxu1 %vm250_vm1, %v1207_v14 }
  0x33   :  { %1088 = vmatprep.mubr.msk.bf16.mxu0 %vm1228_vm0, %v1227_v0  ;;  %1148 = vmatprep.mubr.msk.bf16.mxu1 %vm1228_vm0, %v1227_v0 }
  0x3a   :  { %1089 = vmatmul.mubr.msk.bf16.gmra.mrb[20].mxu0 %vm250_vm1, %v1208_v15  ;;  %1149 = vmatmul.mubr.msk.bf16.gmra.mrb[20].mxu1 %vm250_vm1, %v1209_v16 }
  0x3b   :  { %1092 = vmatprep.mubr.msk.bf16.mxu0 %vm1228_vm0, %v1227_v0  ;;  %1152 = vmatprep.mubr.msk.bf16.mxu1 %vm1228_vm0, %v1227_v0 }
  0x42   :  { %1093 = vmatmul.mubr.msk.bf16.gmra.mrb[24].mxu0 %vm250_vm1, %v1210_v17  ;;  %1153 = vmatmul.mubr.msk.bf16.gmra.mrb[24].mxu1 %vm250_vm1, %v1211_v18 }
  0x43   :  { %1096 = vmatprep.mubr.msk.bf16.mxu0 %vm1228_vm0, %v1227_v0  ;;  %1156 = vmatprep.mubr.msk.bf16.mxu1 %vm1228_vm0, %v1227_v0 }
  0x4a   :  { %1097 = vmatmul.mubr.msk.bf16.gmra.mrb[28].mxu0 %vm250_vm1, %v1212_v19  ;;  %1157 = vmatmul.mubr.msk.bf16.gmra.mrb[28].mxu1 %vm250_vm1, %v1213_v20 }
  0x4b   :  { %1100 = vmatprep.mubr.msk.bf16.mxu0 %vm1228_vm0, %v1227_v0  ;;  %1160 = vmatprep.mubr.msk.bf16.mxu1 %vm1228_vm0, %v1227_v0 }
  0x52   :  { %1101 = vmatmul.mubr.msk.bf16.gmra.mrb[32].mxu0 %vm250_vm1, %v1214_v21  ;;  %1161 = vmatmul.mubr.msk.bf16.gmra.mrb[32].mxu1 %vm250_vm1, %v1215_v22 }
  0x53   :  { %1104 = vmatprep.mubr.msk.bf16.mxu0 %vm1228_vm0, %v1227_v0  ;;  %1164 = vmatprep.mubr.msk.bf16.mxu1 %vm1228_vm0, %v1227_v0 }
  0x5a   :  { %1105 = vmatmul.mubr.msk.bf16.gmra.mrb[36].mxu0 %vm250_vm1, %v1216_v23  ;;  %1165 = vmatmul.mubr.msk.bf16.gmra.mrb[36].mxu1 %vm250_vm1, %v1217_v24 }
  0x5b   :  { %1108 = vmatprep.mubr.msk.bf16.mxu0 %vm1228_vm0, %v1227_v0  ;;  %1168 = vmatprep.mubr.msk.bf16.mxu1 %vm1228_vm0, %v1227_v0 }
  0x62   :  { %1109 = vmatmul.mubr.msk.bf16.gmra.mrb[40].mxu0 %vm250_vm1, %v1218_v25  ;;  %1169 = vmatmul.mubr.msk.bf16.gmra.mrb[40].mxu1 %vm250_vm1, %v1219_v26 }
  0x63   :  { %1112 = vmatprep.mubr.msk.bf16.mxu0 %vm1228_vm0, %v1227_v0  ;;  %1172 = vmatprep.mubr.msk.bf16.mxu1 %vm1228_vm0, %v1227_v0 }
  0x6a   :  { %1113 = vmatmul.mubr.msk.bf16.gmra.mrb[44].mxu0 %vm250_vm1, %v1220_v27  ;;  %1173 = vmatmul.mubr.msk.bf16.gmra.mrb[44].mxu1 %vm250_vm1, %v1221_v28 }
  0x6b   :  { %1116 = vmatprep.mubr.msk.bf16.mxu0 %vm1228_vm0, %v1227_v0  ;;  %1176 = vmatprep.mubr.msk.bf16.mxu1 %vm1228_vm0, %v1227_v0 }
  0x72   :  { %1117 = vmatmul.mubr.msk.bf16.gmra.mrb[48].mxu0 %vm250_vm1, %v1222_v29  ;;  %1177 = vmatmul.mubr.msk.bf16.gmra.mrb[48].mxu1 %vm250_vm1, %v1223_v30 }
  0x73   :  { %1120 = vmatprep.mubr.msk.bf16.mxu0 %vm1228_vm0, %v1227_v0  ;;  %1180 = vmatprep.mubr.msk.bf16.mxu1 %vm1228_vm0, %v1227_v0 }
  0x7a   :  { %1121 = vmatmul.mubr.msk.bf16.gmra.mrb[52].mxu0 %vm250_vm1, %v1224_v31  ;;  %1181 = vmatmul.mubr.msk.bf16.gmra.mrb[52].mxu1 %vm250_vm1, %v1225_v32 }
  0x7b   :  { %1124 = vmatprep.mubr.msk.bf16.mxu0 %vm1228_vm0, %v1227_v0 }
  0x82   :  { %1125 = vmatmul.mubr.msk.bf16.gmra.mrb[56].mxu0 %vm250_vm1, %v1226_v33 }
  0xe5   :  { %v372_v35 = vpop.f32.mrb[0].mxu0  ;;  %v492_v37 = vpop.f32.mrb[0].mxu1 }
  0xe6   :  { %v609_v38 = vmul.f32 %v1451_v34, %v372_v35  ;;  %v1070_v39 = vpop.f32.mrb[1].mxu0  ;;  %v639_v40 = vmul.f32 %v1451_v34, %v492_v37  ;;  %v1130_v41 = vpop.f32.mrb[1].mxu1 }
  0xe7   :  { %v375_v42 = vpop.f32.mrb[2].mxu0  ;;  %v495_v43 = vpop.f32.mrb[2].mxu1 }
  0xe8   :  { %v673_v44 = vadd.f32 %v1456_v36, %v609_v38  ;;  %v610_v45 = vmul.f32 %v1451_v34, %v375_v42  ;;  %v1071_v46 = vpop.f32.mrb[3].mxu0  ;;  %v703_v47 = vadd.f32 %v1456_v36, %v639_v40  ;;  %v640_v48 = vmul.f32 %v1451_v34, %v495_v43  ;;  %v1131_v49 = vpop.f32.mrb[3].mxu1 }
  0xea   :  { %vm730_vm3 = vcmp.ge.f32.partialorder %v673_v44, 0.0  ;;  %v787_v50 = vmul.f32 0.01, %v673_v44  ;;  %v674_v51 = vadd.f32 %v1456_v36, %v610_v45  ;;  %vm760_vm4 = vcmp.ge.f32.partialorder %v703_v47, 0.0 }
  0xeb   :  { %v817_v52 = vmul.f32 0.01, %v703_v47  ;;  %v704_v53 = vadd.f32 %v1456_v36, %v640_v48 }
  0xec   :  { %v844_v54 = vsel %vm730_vm3, %v673_v44, %v787_v50  ;;  %vm731_vm5 = vcmp.ge.f32.partialorder %v674_v51, 0.0  ;;  %v788_v55 = vmul.f32 0.01, %v674_v51 }
  0xed   :  { %902 = vst.msk [vmem:[%s1804_s4] sm:$0xff] %vm901_vm2, %v844_v54  ;;  %v874_v56 = vsel %vm760_vm4, %v703_v47, %v817_v52  ;;  %v380_v57 = vpop.f32.mrb[4].mxu0  ;;  %vm761_vm6 = vcmp.ge.f32.partialorder %v704_v53, 0.0  ;;  %v818_v58 = vmul.f32 0.01, %v704_v53  ;;  %v500_v59 = vpop.f32.mrb[4].mxu1 }
  0xee   :  { %v845_v60 = vsel %vm731_vm5, %v674_v51, %v788_v55  ;;  %932 = vst.msk [vmem:[%s1804_s4 + $0xf0] sm:$0xff] %vm901_vm2, %v874_v56  ;;  %v611_v61 = vmul.f32 %v1451_v34, %v380_v57  ;;  %v1074_v62 = vpop.f32.mrb[5].mxu0  ;;  %v641_v63 = vmul.f32 %v1451_v34, %v500_v59  ;;  %v1134_v0 = vpop.f32.mrb[5].mxu1 }
  0xef   :  { %903 = vst.msk [vmem:[%s1804_s4 + $0x8] sm:$0xff] %vm901_vm2, %v845_v60  ;;  %v875_v1 = vsel %vm761_vm6, %v704_v53, %v818_v58  ;;  %v383_v2 = vpop.f32.mrb[6].mxu0  ;;  %v503_v3 = vpop.f32.mrb[6].mxu1 }
  0xf0   :  { %v675_v4 = vadd.f32 %v1456_v36, %v611_v61  ;;  %933 = vst.msk [vmem:[%s1804_s4 + $0xf8] sm:$0xff] %vm901_vm2, %v875_v1  ;;  %v612_v5 = vmul.f32 %v1451_v34, %v383_v2  ;;  %v1075_v6 = vpop.f32.mrb[7].mxu0  ;;  %v705_v7 = vadd.f32 %v1456_v36, %v641_v63  ;;  %v642_v8 = vmul.f32 %v1451_v34, %v503_v3  ;;  %v1135_v9 = vpop.f32.mrb[7].mxu1 }
  0xf2   :  { %vm732_vm7 = vcmp.ge.f32.partialorder %v675_v4, 0.0  ;;  %v789_v10 = vmul.f32 0.01, %v675_v4  ;;  %v676_v11 = vadd.f32 %v1456_v36, %v612_v5  ;;  %vm762_vm8 = vcmp.ge.f32.partialorder %v705_v7, 0.0 }
  0xf3   :  { %v819_v12 = vmul.f32 0.01, %v705_v7  ;;  %v706_v13 = vadd.f32 %v1456_v36, %v642_v8 }
  0xf4   :  { %v846_v14 = vsel %vm732_vm7, %v675_v4, %v789_v10  ;;  %vm733_vm9 = vcmp.ge.f32.partialorder %v676_v11, 0.0  ;;  %v790_v15 = vmul.f32 0.01, %v676_v11 }
  0xf5   :  { %904 = vst.msk [vmem:[%s1804_s4 + $0x10] sm:$0xff] %vm901_vm2, %v846_v14  ;;  %v876_v16 = vsel %vm762_vm8, %v705_v7, %v819_v12  ;;  %v388_v17 = vpop.f32.mrb[8].mxu0  ;;  %vm763_vm10 = vcmp.ge.f32.partialorder %v706_v13, 0.0  ;;  %v820_v18 = vmul.f32 0.01, %v706_v13  ;;  %v508_v19 = vpop.f32.mrb[8].mxu1 }
  0xf6   :  { %v847_v20 = vsel %vm733_vm9, %v676_v11, %v790_v15  ;;  %934 = vst.msk [vmem:[%s1804_s4 + $0x100] sm:$0xff] %vm901_vm2, %v876_v16  ;;  %v613_v21 = vmul.f32 %v1451_v34, %v388_v17  ;;  %v1078_v22 = vpop.f32.mrb[9].mxu0  ;;  %v643_v23 = vmul.f32 %v1451_v34, %v508_v19  ;;  %v1138_v24 = vpop.f32.mrb[9].mxu1 }
  0xf7   :  { %905 = vst.msk [vmem:[%s1804_s4 + $0x18] sm:$0xff] %vm901_vm2, %v847_v20  ;;  %v877_v25 = vsel %vm763_vm10, %v706_v13, %v820_v18  ;;  %v391_v26 = vpop.f32.mrb[10].mxu0  ;;  %v511_v27 = vpop.f32.mrb[10].mxu1 }
  0xf8   :  { %v677_v28 = vadd.f32 %v1456_v36, %v613_v21  ;;  %935 = vst.msk [vmem:[%s1804_s4 + $0x108] sm:$0xff] %vm901_vm2, %v877_v25  ;;  %v614_v29 = vmul.f32 %v1451_v34, %v391_v26  ;;  %v1079_v30 = vpop.f32.mrb[11].mxu0  ;;  %v707_v31 = vadd.f32 %v1456_v36, %v643_v23  ;;  %v644_v32 = vmul.f32 %v1451_v34, %v511_v27  ;;  %v1139_v33 = vpop.f32.mrb[11].mxu1 }
  0xfa   :  { %vm734_vm11 = vcmp.ge.f32.partialorder %v677_v28, 0.0  ;;  %v791_v35 = vmul.f32 0.01, %v677_v28  ;;  %v678_v37 = vadd.f32 %v1456_v36, %v614_v29  ;;  %vm764_vm12 = vcmp.ge.f32.partialorder %v707_v31, 0.0 }
  0xfb   :  { %v821_v38 = vmul.f32 0.01, %v707_v31  ;;  %v708_v39 = vadd.f32 %v1456_v36, %v644_v32 }
  0xfc   :  { %v848_v40 = vsel %vm734_vm11, %v677_v28, %v791_v35  ;;  %vm735_vm13 = vcmp.ge.f32.partialorder %v678_v37, 0.0  ;;  %v792_v41 = vmul.f32 0.01, %v678_v37 }
  0xfd   :  { %906 = vst.msk [vmem:[%s1804_s4 + $0x20] sm:$0xff] %vm901_vm2, %v848_v40  ;;  %v878_v42 = vsel %vm764_vm12, %v707_v31, %v821_v38  ;;  %v396_v43 = vpop.f32.mrb[12].mxu0  ;;  %vm765_vm14 = vcmp.ge.f32.partialorder %v708_v39, 0.0  ;;  %v822_v44 = vmul.f32 0.01, %v708_v39  ;;  %v516_v45 = vpop.f32.mrb[12].mxu1 }
  0xfe   :  { %v849_v46 = vsel %vm735_vm13, %v678_v37, %v792_v41  ;;  %936 = vst.msk [vmem:[%s1804_s4 + $0x110] sm:$0xff] %vm901_vm2, %v878_v42  ;;  %v615_v47 = vmul.f32 %v1451_v34, %v396_v43  ;;  %v1082_v48 = vpop.f32.mrb[13].mxu0  ;;  %v645_v49 = vmul.f32 %v1451_v34, %v516_v45  ;;  %v1142_v50 = vpop.f32.mrb[13].mxu1 }
  0xff   :  { %907 = vst.msk [vmem:[%s1804_s4 + $0x28] sm:$0xff] %vm901_vm2, %v849_v46  ;;  %v879_v51 = vsel %vm765_vm14, %v708_v39, %v822_v44  ;;  %v399_v52 = vpop.f32.mrb[14].mxu0  ;;  %v519_v53 = vpop.f32.mrb[14].mxu1 }
 0x100   :  { %v679_v54 = vadd.f32 %v1456_v36, %v615_v47  ;;  %937 = vst.msk [vmem:[%s1804_s4 + $0x118] sm:$0xff] %vm901_vm2, %v879_v51  ;;  %v616_v55 = vmul.f32 %v1451_v34, %v399_v52  ;;  %v1083_v56 = vpop.f32.mrb[15].mxu0  ;;  %v709_v57 = vadd.f32 %v1456_v36, %v645_v49  ;;  %v646_v58 = vmul.f32 %v1451_v34, %v519_v53  ;;  %v1143_v59 = vpop.f32.mrb[15].mxu1 }
 0x102   :  { %vm736_vm15 = vcmp.ge.f32.partialorder %v679_v54, 0.0  ;;  %v793_v60 = vmul.f32 0.01, %v679_v54  ;;  %v680_v61 = vadd.f32 %v1456_v36, %v616_v55  ;;  %vm766_vm0 = vcmp.ge.f32.partialorder %v709_v57, 0.0 }
 0x103   :  { %v823_v62 = vmul.f32 0.01, %v709_v57  ;;  %v710_v63 = vadd.f32 %v1456_v36, %v646_v58 }
 0x104   :  { %v850_v0 = vsel %vm736_vm15, %v679_v54, %v793_v60  ;;  %vm737_vm1 = vcmp.ge.f32.partialorder %v680_v61, 0.0  ;;  %v794_v1 = vmul.f32 0.01, %v680_v61 }
 0x105   :  { %908 = vst.msk [vmem:[%s1804_s4 + $0x30] sm:$0xff] %vm901_vm2, %v850_v0  ;;  %v880_v2 = vsel %vm766_vm0, %v709_v57, %v823_v62  ;;  %v404_v3 = vpop.f32.mrb[16].mxu0  ;;  %vm767_vm3 = vcmp.ge.f32.partialorder %v710_v63, 0.0  ;;  %v824_v4 = vmul.f32 0.01, %v710_v63  ;;  %v524_v5 = vpop.f32.mrb[16].mxu1 }
 0x106   :  { %v851_v6 = vsel %vm737_vm1, %v680_v61, %v794_v1  ;;  %938 = vst.msk [vmem:[%s1804_s4 + $0x120] sm:$0xff] %vm901_vm2, %v880_v2  ;;  %v617_v7 = vmul.f32 %v1451_v34, %v404_v3  ;;  %v1086_v8 = vpop.f32.mrb[17].mxu0  ;;  %v647_v9 = vmul.f32 %v1451_v34, %v524_v5  ;;  %v1146_v10 = vpop.f32.mrb[17].mxu1 }
 0x107   :  { %909 = vst.msk [vmem:[%s1804_s4 + $0x38] sm:$0xff] %vm901_vm2, %v851_v6  ;;  %v881_v11 = vsel %vm767_vm3, %v710_v63, %v824_v4  ;;  %v407_v12 = vpop.f32.mrb[18].mxu0  ;;  %v527_v13 = vpop.f32.mrb[18].mxu1 }
 0x108   :  { %v681_v14 = vadd.f32 %v1456_v36, %v617_v7  ;;  %939 = vst.msk [vmem:[%s1804_s4 + $0x128] sm:$0xff] %vm901_vm2, %v881_v11  ;;  %v618_v15 = vmul.f32 %v1451_v34, %v407_v12  ;;  %v1087_v16 = vpop.f32.mrb[19].mxu0  ;;  %v711_v17 = vadd.f32 %v1456_v36, %v647_v9  ;;  %v648_v18 = vmul.f32 %v1451_v34, %v527_v13  ;;  %v1147_v19 = vpop.f32.mrb[19].mxu1 }
 0x10a   :  { %vm738_vm4 = vcmp.ge.f32.partialorder %v681_v14, 0.0  ;;  %v795_v20 = vmul.f32 0.01, %v681_v14  ;;  %v682_v21 = vadd.f32 %v1456_v36, %v618_v15  ;;  %vm768_vm5 = vcmp.ge.f32.partialorder %v711_v17, 0.0 }
 0x10b   :  { %v825_v22 = vmul.f32 0.01, %v711_v17  ;;  %v712_v23 = vadd.f32 %v1456_v36, %v648_v18 }
 0x10c   :  { %v852_v24 = vsel %vm738_vm4, %v681_v14, %v795_v20  ;;  %vm739_vm6 = vcmp.ge.f32.partialorder %v682_v21, 0.0  ;;  %v796_v25 = vmul.f32 0.01, %v682_v21 }
 0x10d   :  { %910 = vst.msk [vmem:[%s1804_s4 + $0x40] sm:$0xff] %vm901_vm2, %v852_v24  ;;  %v882_v26 = vsel %vm768_vm5, %v711_v17, %v825_v22  ;;  %v412_v27 = vpop.f32.mrb[20].mxu0  ;;  %vm769_vm7 = vcmp.ge.f32.partialorder %v712_v23, 0.0  ;;  %v826_v28 = vmul.f32 0.01, %v712_v23  ;;  %v532_v29 = vpop.f32.mrb[20].mxu1 }
 0x10e   :  { %v853_v30 = vsel %vm739_vm6, %v682_v21, %v796_v25  ;;  %940 = vst.msk [vmem:[%s1804_s4 + $0x130] sm:$0xff] %vm901_vm2, %v882_v26  ;;  %v619_v31 = vmul.f32 %v1451_v34, %v412_v27  ;;  %v1090_v32 = vpop.f32.mrb[21].mxu0  ;;  %v649_v33 = vmul.f32 %v1451_v34, %v532_v29  ;;  %v1150_v35 = vpop.f32.mrb[21].mxu1 }
 0x10f   :  { %911 = vst.msk [vmem:[%s1804_s4 + $0x48] sm:$0xff] %vm901_vm2, %v853_v30  ;;  %v883_v37 = vsel %vm769_vm7, %v712_v23, %v826_v28  ;;  %v415_v38 = vpop.f32.mrb[22].mxu0  ;;  %v535_v39 = vpop.f32.mrb[22].mxu1 }
 0x110   :  { %v683_v40 = vadd.f32 %v1456_v36, %v619_v31  ;;  %941 = vst.msk [vmem:[%s1804_s4 + $0x138] sm:$0xff] %vm901_vm2, %v883_v37  ;;  %v620_v41 = vmul.f32 %v1451_v34, %v415_v38  ;;  %v1091_v42 = vpop.f32.mrb[23].mxu0  ;;  %v713_v43 = vadd.f32 %v1456_v36, %v649_v33  ;;  %v650_v44 = vmul.f32 %v1451_v34, %v535_v39  ;;  %v1151_v45 = vpop.f32.mrb[23].mxu1 }
 0x112   :  { %vm740_vm8 = vcmp.ge.f32.partialorder %v683_v40, 0.0  ;;  %v797_v46 = vmul.f32 0.01, %v683_v40  ;;  %v684_v47 = vadd.f32 %v1456_v36, %v620_v41  ;;  %vm770_vm9 = vcmp.ge.f32.partialorder %v713_v43, 0.0 }
 0x113   :  { %v827_v48 = vmul.f32 0.01, %v713_v43  ;;  %v714_v49 = vadd.f32 %v1456_v36, %v650_v44 }
 0x114   :  { %v854_v50 = vsel %vm740_vm8, %v683_v40, %v797_v46  ;;  %vm741_vm10 = vcmp.ge.f32.partialorder %v684_v47, 0.0  ;;  %v798_v51 = vmul.f32 0.01, %v684_v47 }
 0x115   :  { %912 = vst.msk [vmem:[%s1804_s4 + $0x50] sm:$0xff] %vm901_vm2, %v854_v50  ;;  %v884_v52 = vsel %vm770_vm9, %v713_v43, %v827_v48  ;;  %v420_v53 = vpop.f32.mrb[24].mxu0  ;;  %vm771_vm11 = vcmp.ge.f32.partialorder %v714_v49, 0.0  ;;  %v828_v54 = vmul.f32 0.01, %v714_v49  ;;  %v540_v55 = vpop.f32.mrb[24].mxu1 }
 0x116   :  { %v855_v56 = vsel %vm741_vm10, %v684_v47, %v798_v51  ;;  %942 = vst.msk [vmem:[%s1804_s4 + $0x140] sm:$0xff] %vm901_vm2, %v884_v52  ;;  %v621_v57 = vmul.f32 %v1451_v34, %v420_v53  ;;  %v1094_v58 = vpop.f32.mrb[25].mxu0  ;;  %v651_v59 = vmul.f32 %v1451_v34, %v540_v55  ;;  %v1154_v60 = vpop.f32.mrb[25].mxu1 }
 0x117   :  { %913 = vst.msk [vmem:[%s1804_s4 + $0x58] sm:$0xff] %vm901_vm2, %v855_v56  ;;  %v885_v61 = vsel %vm771_vm11, %v714_v49, %v828_v54  ;;  %v423_v62 = vpop.f32.mrb[26].mxu0  ;;  %v543_v63 = vpop.f32.mrb[26].mxu1 }
 0x118   :  { %v685_v0 = vadd.f32 %v1456_v36, %v621_v57  ;;  %943 = vst.msk [vmem:[%s1804_s4 + $0x148] sm:$0xff] %vm901_vm2, %v885_v61  ;;  %v622_v1 = vmul.f32 %v1451_v34, %v423_v62  ;;  %v1095_v2 = vpop.f32.mrb[27].mxu0  ;;  %v715_v3 = vadd.f32 %v1456_v36, %v651_v59  ;;  %v652_v4 = vmul.f32 %v1451_v34, %v543_v63  ;;  %v1155_v5 = vpop.f32.mrb[27].mxu1 }
 0x11a   :  { %vm742_vm12 = vcmp.ge.f32.partialorder %v685_v0, 0.0  ;;  %v799_v6 = vmul.f32 0.01, %v685_v0  ;;  %v686_v7 = vadd.f32 %v1456_v36, %v622_v1  ;;  %vm772_vm13 = vcmp.ge.f32.partialorder %v715_v3, 0.0 }
 0x11b   :  { %v829_v8 = vmul.f32 0.01, %v715_v3  ;;  %v716_v9 = vadd.f32 %v1456_v36, %v652_v4 }
 0x11c   :  { %v856_v10 = vsel %vm742_vm12, %v685_v0, %v799_v6  ;;  %vm743_vm14 = vcmp.ge.f32.partialorder %v686_v7, 0.0  ;;  %v800_v11 = vmul.f32 0.01, %v686_v7 }
 0x11d   :  { %914 = vst.msk [vmem:[%s1804_s4 + $0x60] sm:$0xff] %vm901_vm2, %v856_v10  ;;  %v886_v12 = vsel %vm772_vm13, %v715_v3, %v829_v8  ;;  %v428_v13 = vpop.f32.mrb[28].mxu0  ;;  %vm773_vm15 = vcmp.ge.f32.partialorder %v716_v9, 0.0  ;;  %v830_v14 = vmul.f32 0.01, %v716_v9  ;;  %v548_v15 = vpop.f32.mrb[28].mxu1 }
 0x11e   :  { %v857_v16 = vsel %vm743_vm14, %v686_v7, %v800_v11  ;;  %944 = vst.msk [vmem:[%s1804_s4 + $0x150] sm:$0xff] %vm901_vm2, %v886_v12  ;;  %v623_v17 = vmul.f32 %v1451_v34, %v428_v13  ;;  %v1098_v18 = vpop.f32.mrb[29].mxu0  ;;  %v653_v19 = vmul.f32 %v1451_v34, %v548_v15  ;;  %v1158_v20 = vpop.f32.mrb[29].mxu1 }
 0x11f   :  { %915 = vst.msk [vmem:[%s1804_s4 + $0x68] sm:$0xff] %vm901_vm2, %v857_v16  ;;  %v887_v21 = vsel %vm773_vm15, %v716_v9, %v830_v14  ;;  %v431_v22 = vpop.f32.mrb[30].mxu0  ;;  %v551_v23 = vpop.f32.mrb[30].mxu1 }
 0x120   :  { %v687_v24 = vadd.f32 %v1456_v36, %v623_v17  ;;  %945 = vst.msk [vmem:[%s1804_s4 + $0x158] sm:$0xff] %vm901_vm2, %v887_v21  ;;  %v624_v25 = vmul.f32 %v1451_v34, %v431_v22  ;;  %v1099_v26 = vpop.f32.mrb[31].mxu0  ;;  %v717_v27 = vadd.f32 %v1456_v36, %v653_v19  ;;  %v654_v28 = vmul.f32 %v1451_v34, %v551_v23  ;;  %v1159_v29 = vpop.f32.mrb[31].mxu1 }
 0x122   :  { %vm744_vm0 = vcmp.ge.f32.partialorder %v687_v24, 0.0  ;;  %v801_v30 = vmul.f32 0.01, %v687_v24  ;;  %v688_v31 = vadd.f32 %v1456_v36, %v624_v25  ;;  %vm774_vm1 = vcmp.ge.f32.partialorder %v717_v27, 0.0 }
 0x123   :  { %v831_v32 = vmul.f32 0.01, %v717_v27  ;;  %v718_v33 = vadd.f32 %v1456_v36, %v654_v28 }
 0x124   :  { %v858_v35 = vsel %vm744_vm0, %v687_v24, %v801_v30  ;;  %vm745_vm3 = vcmp.ge.f32.partialorder %v688_v31, 0.0  ;;  %v802_v37 = vmul.f32 0.01, %v688_v31 }
 0x125   :  { %916 = vst.msk [vmem:[%s1804_s4 + $0x70] sm:$0xff] %vm901_vm2, %v858_v35  ;;  %v888_v38 = vsel %vm774_vm1, %v717_v27, %v831_v32  ;;  %v436_v39 = vpop.f32.mrb[32].mxu0  ;;  %vm775_vm4 = vcmp.ge.f32.partialorder %v718_v33, 0.0  ;;  %v832_v40 = vmul.f32 0.01, %v718_v33  ;;  %v556_v41 = vpop.f32.mrb[32].mxu1 }
 0x126   :  { %v859_v42 = vsel %vm745_vm3, %v688_v31, %v802_v37  ;;  %946 = vst.msk [vmem:[%s1804_s4 + $0x160] sm:$0xff] %vm901_vm2, %v888_v38  ;;  %v625_v43 = vmul.f32 %v1451_v34, %v436_v39  ;;  %v1102_v44 = vpop.f32.mrb[33].mxu0  ;;  %v655_v45 = vmul.f32 %v1451_v34, %v556_v41  ;;  %v1162_v46 = vpop.f32.mrb[33].mxu1 }
 0x127   :  { %917 = vst.msk [vmem:[%s1804_s4 + $0x78] sm:$0xff] %vm901_vm2, %v859_v42  ;;  %v889_v47 = vsel %vm775_vm4, %v718_v33, %v832_v40  ;;  %v439_v48 = vpop.f32.mrb[34].mxu0  ;;  %v559_v49 = vpop.f32.mrb[34].mxu1 }
 0x128   :  { %v689_v50 = vadd.f32 %v1456_v36, %v625_v43  ;;  %947 = vst.msk [vmem:[%s1804_s4 + $0x168] sm:$0xff] %vm901_vm2, %v889_v47  ;;  %v626_v51 = vmul.f32 %v1451_v34, %v439_v48  ;;  %v1103_v52 = vpop.f32.mrb[35].mxu0  ;;  %v719_v53 = vadd.f32 %v1456_v36, %v655_v45  ;;  %v656_v54 = vmul.f32 %v1451_v34, %v559_v49  ;;  %v1163_v55 = vpop.f32.mrb[35].mxu1 }
 0x12a   :  { %vm746_vm5 = vcmp.ge.f32.partialorder %v689_v50, 0.0  ;;  %v803_v56 = vmul.f32 0.01, %v689_v50  ;;  %v690_v57 = vadd.f32 %v1456_v36, %v626_v51  ;;  %vm776_vm6 = vcmp.ge.f32.partialorder %v719_v53, 0.0 }
 0x12b   :  { %v833_v58 = vmul.f32 0.01, %v719_v53  ;;  %v720_v59 = vadd.f32 %v1456_v36, %v656_v54 }
 0x12c   :  { %v860_v60 = vsel %vm746_vm5, %v689_v50, %v803_v56  ;;  %vm747_vm7 = vcmp.ge.f32.partialorder %v690_v57, 0.0  ;;  %v804_v61 = vmul.f32 0.01, %v690_v57 }
 0x12d   :  { %918 = vst.msk [vmem:[%s1804_s4 + $0x80] sm:$0xff] %vm901_vm2, %v860_v60  ;;  %v890_v62 = vsel %vm776_vm6, %v719_v53, %v833_v58  ;;  %v444_v63 = vpop.f32.mrb[36].mxu0  ;;  %vm777_vm8 = vcmp.ge.f32.partialorder %v720_v59, 0.0  ;;  %v834_v0 = vmul.f32 0.01, %v720_v59  ;;  %v564_v1 = vpop.f32.mrb[36].mxu1 }
 0x12e   :  { %v861_v2 = vsel %vm747_vm7, %v690_v57, %v804_v61  ;;  %948 = vst.msk [vmem:[%s1804_s4 + $0x170] sm:$0xff] %vm901_vm2, %v890_v62  ;;  %v627_v3 = vmul.f32 %v1451_v34, %v444_v63  ;;  %v1106_v4 = vpop.f32.mrb[37].mxu0  ;;  %v657_v5 = vmul.f32 %v1451_v34, %v564_v1  ;;  %v1166_v6 = vpop.f32.mrb[37].mxu1 }
 0x12f   :  { %919 = vst.msk [vmem:[%s1804_s4 + $0x88] sm:$0xff] %vm901_vm2, %v861_v2  ;;  %v891_v7 = vsel %vm777_vm8, %v720_v59, %v834_v0  ;;  %v447_v8 = vpop.f32.mrb[38].mxu0  ;;  %v567_v9 = vpop.f32.mrb[38].mxu1 }
 0x130   :  { %v691_v10 = vadd.f32 %v1456_v36, %v627_v3  ;;  %949 = vst.msk [vmem:[%s1804_s4 + $0x178] sm:$0xff] %vm901_vm2, %v891_v7  ;;  %v628_v11 = vmul.f32 %v1451_v34, %v447_v8  ;;  %v1107_v12 = vpop.f32.mrb[39].mxu0  ;;  %v721_v13 = vadd.f32 %v1456_v36, %v657_v5  ;;  %v658_v14 = vmul.f32 %v1451_v34, %v567_v9  ;;  %v1167_v15 = vpop.f32.mrb[39].mxu1 }
 0x132   :  { %vm748_vm9 = vcmp.ge.f32.partialorder %v691_v10, 0.0  ;;  %v805_v16 = vmul.f32 0.01, %v691_v10  ;;  %v692_v17 = vadd.f32 %v1456_v36, %v628_v11  ;;  %vm778_vm10 = vcmp.ge.f32.partialorder %v721_v13, 0.0 }
 0x133   :  { %v835_v18 = vmul.f32 0.01, %v721_v13  ;;  %v722_v19 = vadd.f32 %v1456_v36, %v658_v14 }
 0x134   :  { %v862_v20 = vsel %vm748_vm9, %v691_v10, %v805_v16  ;;  %vm749_vm11 = vcmp.ge.f32.partialorder %v692_v17, 0.0  ;;  %v806_v21 = vmul.f32 0.01, %v692_v17 }
 0x135   :  { %920 = vst.msk [vmem:[%s1804_s4 + $0x90] sm:$0xff] %vm901_vm2, %v862_v20  ;;  %v892_v22 = vsel %vm778_vm10, %v721_v13, %v835_v18  ;;  %v452_v23 = vpop.f32.mrb[40].mxu0  ;;  %vm779_vm12 = vcmp.ge.f32.partialorder %v722_v19, 0.0  ;;  %v836_v24 = vmul.f32 0.01, %v722_v19  ;;  %v572_v25 = vpop.f32.mrb[40].mxu1 }
 0x136   :  { %v863_v26 = vsel %vm749_vm11, %v692_v17, %v806_v21  ;;  %950 = vst.msk [vmem:[%s1804_s4 + $0x180] sm:$0xff] %vm901_vm2, %v892_v22  ;;  %v629_v27 = vmul.f32 %v1451_v34, %v452_v23  ;;  %v1110_v28 = vpop.f32.mrb[41].mxu0  ;;  %v659_v29 = vmul.f32 %v1451_v34, %v572_v25  ;;  %v1170_v30 = vpop.f32.mrb[41].mxu1 }
 0x137   :  { %921 = vst.msk [vmem:[%s1804_s4 + $0x98] sm:$0xff] %vm901_vm2, %v863_v26  ;;  %v893_v31 = vsel %vm779_vm12, %v722_v19, %v836_v24  ;;  %v455_v32 = vpop.f32.mrb[42].mxu0  ;;  %v575_v33 = vpop.f32.mrb[42].mxu1 }
 0x138   :  { %v693_v35 = vadd.f32 %v1456_v36, %v629_v27  ;;  %951 = vst.msk [vmem:[%s1804_s4 + $0x188] sm:$0xff] %vm901_vm2, %v893_v31  ;;  %v630_v37 = vmul.f32 %v1451_v34, %v455_v32  ;;  %v1111_v38 = vpop.f32.mrb[43].mxu0  ;;  %v723_v39 = vadd.f32 %v1456_v36, %v659_v29  ;;  %v660_v40 = vmul.f32 %v1451_v34, %v575_v33  ;;  %v1171_v41 = vpop.f32.mrb[43].mxu1 }
 0x13a   :  { %vm750_vm13 = vcmp.ge.f32.partialorder %v693_v35, 0.0  ;;  %v807_v42 = vmul.f32 0.01, %v693_v35  ;;  %v694_v43 = vadd.f32 %v1456_v36, %v630_v37  ;;  %vm780_vm14 = vcmp.ge.f32.partialorder %v723_v39, 0.0 }
 0x13b   :  { %v837_v44 = vmul.f32 0.01, %v723_v39  ;;  %v724_v45 = vadd.f32 %v1456_v36, %v660_v40 }
 0x13c   :  { %v864_v46 = vsel %vm750_vm13, %v693_v35, %v807_v42  ;;  %vm751_vm15 = vcmp.ge.f32.partialorder %v694_v43, 0.0  ;;  %v808_v47 = vmul.f32 0.01, %v694_v43 }
 0x13d   :  { %922 = vst.msk [vmem:[%s1804_s4 + $0xa0] sm:$0xff] %vm901_vm2, %v864_v46  ;;  %v894_v48 = vsel %vm780_vm14, %v723_v39, %v837_v44  ;;  %v460_v49 = vpop.f32.mrb[44].mxu0  ;;  %vm781_vm0 = vcmp.ge.f32.partialorder %v724_v45, 0.0  ;;  %v838_v50 = vmul.f32 0.01, %v724_v45  ;;  %v580_v51 = vpop.f32.mrb[44].mxu1 }
 0x13e   :  { %v865_v52 = vsel %vm751_vm15, %v694_v43, %v808_v47  ;;  %952 = vst.msk [vmem:[%s1804_s4 + $0x190] sm:$0xff] %vm901_vm2, %v894_v48  ;;  %v631_v53 = vmul.f32 %v1451_v34, %v460_v49  ;;  %v1114_v54 = vpop.f32.mrb[45].mxu0  ;;  %v661_v55 = vmul.f32 %v1451_v34, %v580_v51  ;;  %v1174_v56 = vpop.f32.mrb[45].mxu1 }
 0x13f   :  { %923 = vst.msk [vmem:[%s1804_s4 + $0xa8] sm:$0xff] %vm901_vm2, %v865_v52  ;;  %v895_v57 = vsel %vm781_vm0, %v724_v45, %v838_v50  ;;  %v463_v58 = vpop.f32.mrb[46].mxu0  ;;  %v583_v59 = vpop.f32.mrb[46].mxu1 }
 0x140   :  { %v695_v60 = vadd.f32 %v1456_v36, %v631_v53  ;;  %953 = vst.msk [vmem:[%s1804_s4 + $0x198] sm:$0xff] %vm901_vm2, %v895_v57  ;;  %v632_v61 = vmul.f32 %v1451_v34, %v463_v58  ;;  %v1115_v62 = vpop.f32.mrb[47].mxu0  ;;  %v725_v63 = vadd.f32 %v1456_v36, %v661_v55  ;;  %v662_v0 = vmul.f32 %v1451_v34, %v583_v59  ;;  %v1175_v1 = vpop.f32.mrb[47].mxu1 }
 0x142   :  { %vm752_vm1 = vcmp.ge.f32.partialorder %v695_v60, 0.0  ;;  %v809_v2 = vmul.f32 0.01, %v695_v60  ;;  %v696_v3 = vadd.f32 %v1456_v36, %v632_v61  ;;  %vm782_vm3 = vcmp.ge.f32.partialorder %v725_v63, 0.0 }
 0x143   :  { %v839_v4 = vmul.f32 0.01, %v725_v63  ;;  %v726_v5 = vadd.f32 %v1456_v36, %v662_v0 }
 0x144   :  { %v866_v6 = vsel %vm752_vm1, %v695_v60, %v809_v2  ;;  %vm753_vm4 = vcmp.ge.f32.partialorder %v696_v3, 0.0  ;;  %v810_v7 = vmul.f32 0.01, %v696_v3 }
 0x145   :  { %924 = vst.msk [vmem:[%s1804_s4 + $0xb0] sm:$0xff] %vm901_vm2, %v866_v6  ;;  %v896_v8 = vsel %vm782_vm3, %v725_v63, %v839_v4  ;;  %v468_v9 = vpop.f32.mrb[48].mxu0  ;;  %vm783_vm5 = vcmp.ge.f32.partialorder %v726_v5, 0.0  ;;  %v840_v10 = vmul.f32 0.01, %v726_v5  ;;  %v588_v11 = vpop.f32.mrb[48].mxu1 }
 0x146   :  { %v867_v12 = vsel %vm753_vm4, %v696_v3, %v810_v7  ;;  %954 = vst.msk [vmem:[%s1804_s4 + $0x1a0] sm:$0xff] %vm901_vm2, %v896_v8  ;;  %v633_v13 = vmul.f32 %v1451_v34, %v468_v9  ;;  %v1118_v14 = vpop.f32.mrb[49].mxu0  ;;  %v663_v15 = vmul.f32 %v1451_v34, %v588_v11  ;;  %v1178_v16 = vpop.f32.mrb[49].mxu1 }
 0x147   :  { %925 = vst.msk [vmem:[%s1804_s4 + $0xb8] sm:$0xff] %vm901_vm2, %v867_v12  ;;  %v897_v17 = vsel %vm783_vm5, %v726_v5, %v840_v10  ;;  %v471_v18 = vpop.f32.mrb[50].mxu0  ;;  %v591_v19 = vpop.f32.mrb[50].mxu1 }
 0x148   :  { %v697_v20 = vadd.f32 %v1456_v36, %v633_v13  ;;  %955 = vst.msk [vmem:[%s1804_s4 + $0x1a8] sm:$0xff] %vm901_vm2, %v897_v17  ;;  %v634_v21 = vmul.f32 %v1451_v34, %v471_v18  ;;  %v1119_v22 = vpop.f32.mrb[51].mxu0  ;;  %v727_v23 = vadd.f32 %v1456_v36, %v663_v15  ;;  %v664_v24 = vmul.f32 %v1451_v34, %v591_v19  ;;  %v1179_v25 = vpop.f32.mrb[51].mxu1 }
 0x14a   :  { %vm754_vm6 = vcmp.ge.f32.partialorder %v697_v20, 0.0  ;;  %v811_v26 = vmul.f32 0.01, %v697_v20  ;;  %v698_v27 = vadd.f32 %v1456_v36, %v634_v21  ;;  %vm784_vm7 = vcmp.ge.f32.partialorder %v727_v23, 0.0 }
 0x14b   :  { %v841_v28 = vmul.f32 0.01, %v727_v23  ;;  %v728_v29 = vadd.f32 %v1456_v36, %v664_v24 }
 0x14c   :  { %v868_v30 = vsel %vm754_vm6, %v697_v20, %v811_v26  ;;  %vm755_vm8 = vcmp.ge.f32.partialorder %v698_v27, 0.0  ;;  %v812_v31 = vmul.f32 0.01, %v698_v27 }
 0x14d   :  { %926 = vst.msk [vmem:[%s1804_s4 + $0xc0] sm:$0xff] %vm901_vm2, %v868_v30  ;;  %v898_v32 = vsel %vm784_vm7, %v727_v23, %v841_v28  ;;  %v476_v33 = vpop.f32.mrb[52].mxu0  ;;  %vm785_vm9 = vcmp.ge.f32.partialorder %v728_v29, 0.0  ;;  %v842_v35 = vmul.f32 0.01, %v728_v29  ;;  %v596_v37 = vpop.f32.mrb[52].mxu1 }
 0x14e   :  { %v869_v38 = vsel %vm755_vm8, %v698_v27, %v812_v31  ;;  %956 = vst.msk [vmem:[%s1804_s4 + $0x1b0] sm:$0xff] %vm901_vm2, %v898_v32  ;;  %v635_v39 = vmul.f32 %v1451_v34, %v476_v33  ;;  %v1122_v40 = vpop.f32.mrb[53].mxu0  ;;  %v665_v41 = vmul.f32 %v1451_v34, %v596_v37  ;;  %v1182_v42 = vpop.f32.mrb[53].mxu1 }
 0x14f   :  { %927 = vst.msk [vmem:[%s1804_s4 + $0xc8] sm:$0xff] %vm901_vm2, %v869_v38  ;;  %v899_v43 = vsel %vm785_vm9, %v728_v29, %v842_v35  ;;  %v479_v44 = vpop.f32.mrb[54].mxu0  ;;  %v599_v45 = vpop.f32.mrb[54].mxu1 }
 0x150   :  { %v699_v46 = vadd.f32 %v1456_v36, %v635_v39  ;;  %957 = vst.msk [vmem:[%s1804_s4 + $0x1b8] sm:$0xff] %vm901_vm2, %v899_v43  ;;  %v636_v47 = vmul.f32 %v1451_v34, %v479_v44  ;;  %v1123_v48 = vpop.f32.mrb[55].mxu0  ;;  %v729_v49 = vadd.f32 %v1456_v36, %v665_v41  ;;  %v1183_v50 = vpop.f32.mrb[55].mxu1 }
 0x152   :  { %vm756_vm10 = vcmp.ge.f32.partialorder %v699_v46, 0.0  ;;  %v813_v51 = vmul.f32 0.01, %v699_v46  ;;  %v700_v52 = vadd.f32 %v1456_v36, %v636_v47  ;;  %vm786_vm11 = vcmp.ge.f32.partialorder %v729_v49, 0.0 }
 0x153   :  { %v843_v53 = vmul.f32 0.01, %v729_v49 }
 0x154   :  { %v870_v54 = vsel %vm756_vm10, %v699_v46, %v813_v51  ;;  %vm757_vm12 = vcmp.ge.f32.partialorder %v700_v52, 0.0  ;;  %v814_v55 = vmul.f32 0.01, %v700_v52 }
 0x155   :  { %928 = vst.msk [vmem:[%s1804_s4 + $0xd0] sm:$0xff] %vm901_vm2, %v870_v54  ;;  %v900_v56 = vsel %vm786_vm11, %v729_v49, %v843_v53  ;;  %v484_v57 = vpop.f32.mrb[56].mxu0 }
 0x156   :  { %v871_v58 = vsel %vm757_vm12, %v700_v52, %v814_v55  ;;  %958 = vst.msk [vmem:[%s1804_s4 + $0x1c0] sm:$0xff] %vm901_vm2, %v900_v56  ;;  %v637_v59 = vmul.f32 %v1451_v34, %v484_v57  ;;  %v1126_v60 = vpop.f32.mrb[57].mxu0 }
 0x157   :  { %929 = vst.msk [vmem:[%s1804_s4 + $0xd8] sm:$0xff] %vm901_vm2, %v871_v58  ;;  %v487_v61 = vpop.f32.mrb[58].mxu0 }
 0x158   :  { %v701_v62 = vadd.f32 %v1456_v36, %v637_v59  ;;  %v638_v63 = vmul.f32 %v1451_v34, %v487_v61  ;;  %v1127_v0 = vpop.f32.mrb[59].mxu0 }
 0x15a   :  { %vm758_vm13 = vcmp.ge.f32.partialorder %v701_v62, 0.0  ;;  %v815_v1 = vmul.f32 0.01, %v701_v62  ;;  %v702_v2 = vadd.f32 %v1456_v36, %v638_v63 }
 0x15c   :  { %v872_v3 = vsel %vm758_vm13, %v701_v62, %v815_v1  ;;  %vm759_vm14 = vcmp.ge.f32.partialorder %v702_v2, 0.0  ;;  %v816_v4 = vmul.f32 0.01, %v702_v2 }
 0x15d   :  { %930 = vst.msk [vmem:[%s1804_s4 + $0xe0] sm:$0xff] %vm901_vm2, %v872_v3 }
 0x15e   :  { %v873_v5 = vsel %vm759_vm14, %v702_v2, %v816_v4 }
 0x15f   :  { %931 = vst.msk [vmem:[%s1804_s4 + $0xe8] sm:$0xff] %vm901_vm2, %v873_v5 }

// kernel: fwd.7
= control target key start
LH: loop header
LB: loop body
LE: loop exit
PB: predicated region body
PF: predicated region fallthrough
CT: control target
= control target key end

     0   :  { %v1196_v0 = vmov 0.0   ;;  %vm1197_vm0 = vmmov 0   ;;  %vm234_vm1 = vcmask 261120   ;;  %s1759_s1 = inlined_call_operand.vmem [shape: bf16[32,32], index: 1, kind: input, shape index: {}]   ;;  %s1760_s0 = inlined_call_operand.vmem [shape: bf16[456,32], index: 0, kind: input, shape index: {}]   ;;  %s1761_s2 = inlined_call_operand.vmem [shape: f32[1,32], index: 2, kind: input, shape index: {}]   ;;  %s1762_s3 = inlined_call_operand.vmem [shape: f32[1,32], index: 3, kind: input, shape index: {}]   ;;  %s1763_s4 = inlined_call_operand.vmem [shape: f32[456,32], index: 4, kind: output, shape index: {}]  }
   0x1   :  { %1039 = vmatprep.subr.bf16.mxu0 %v1196_v0  ;;  %v1165_v1 = vld [vmem:[%s1759_s1] sm:$0xff]   ;;  %1159 = vmatprep.subr.bf16.mxu1 %v1196_v0  ;;  %v1166_v2 = vld [vmem:[%s1759_s1 + $0x8] sm:$0xff]   ;;  %v1168_v4 = vld [vmem:[%s1760_s0 + $0x78] sm:$0xff]  }
   0x2   :  { %1043 = vmatprep.mubr.msk.bf16.mxu0 %vm1197_vm0, %v1196_v0  ;;  %1103 = vmatprep.mubr.msk.bf16.mxu1 %vm1197_vm0, %v1196_v0  ;;  %v1167_v3 = vld [vmem:[%s1760_s0] sm:$0xff]   ;;  %v1169_v5 = vld [vmem:[%s1760_s0 + $0x8] sm:$0xff]   ;;  %v1171_v7 = vld [vmem:[%s1760_s0 + $0x10] sm:$0xff]  }
   0x3   :  { %1040 = vmatpush3.bf16.msra.mxu0 %v1165_v1  ;;  %1161 = vmatpush3.bf16.msra.mxu1 %v1165_v1  ;;  %v1170_v6 = vld [vmem:[%s1760_s0 + $0x80] sm:$0xff]   ;;  %v1172_v8 = vld [vmem:[%s1760_s0 + $0x88] sm:$0xff]   ;;  %v1173_v9 = vld [vmem:[%s1760_s0 + $0x18] sm:$0xff]  }
   0x4   :  { %1041 = vmatprep.subr.bf16.mxu0 %v1196_v0  ;;  %1160 = vmatprep.subr.bf16.mxu1 %v1196_v0  ;;  %v1174_v10 = vld [vmem:[%s1760_s0 + $0x90] sm:$0xff]   ;;  %v1175_v11 = vld [vmem:[%s1760_s0 + $0x20] sm:$0xff]   ;;  %v1176_v12 = vld [vmem:[%s1760_s0 + $0x98] sm:$0xff]  }
   0x5   :  { %v1177_v13 = vld [vmem:[%s1760_s0 + $0x28] sm:$0xff]   ;;  %v1178_v14 = vld [vmem:[%s1760_s0 + $0xa0] sm:$0xff]   ;;  %v1179_v15 = vld [vmem:[%s1760_s0 + $0x30] sm:$0xff]  }
   0x6   :  { %v1180_v16 = vld [vmem:[%s1760_s0 + $0xa8] sm:$0xff]   ;;  %v1181_v17 = vld [vmem:[%s1760_s0 + $0x38] sm:$0xff]   ;;  %v1182_v18 = vld [vmem:[%s1760_s0 + $0xb0] sm:$0xff]  }
   0x7   :  { %1042 = vmatpush3.bf16.msra.mxu0 %v1166_v2  ;;  %1162 = vmatpush3.bf16.msra.mxu1 %v1166_v2  ;;  %v1183_v19 = vld [vmem:[%s1760_s0 + $0x40] sm:$0xff]   ;;  %v1184_v20 = vld [vmem:[%s1760_s0 + $0xb8] sm:$0xff]   ;;  %v1185_v21 = vld [vmem:[%s1760_s0 + $0x48] sm:$0xff]  }
   0x8   :  { %v1186_v22 = vld [vmem:[%s1760_s0 + $0xc0] sm:$0xff]   ;;  %v1187_v23 = vld [vmem:[%s1760_s0 + $0x50] sm:$0xff]   ;;  %v1188_v24 = vld [vmem:[%s1760_s0 + $0xc8] sm:$0xff]  }
   0x9   :  { %v1189_v25 = vld [vmem:[%s1760_s0 + $0x58] sm:$0xff]   ;;  %v1190_v26 = vld [vmem:[%s1760_s0 + $0xd0] sm:$0xff]   ;;  %v1191_v27 = vld [vmem:[%s1760_s0 + $0x60] sm:$0xff]  }
   0xa   :  { %1044 = vmatmul.mubr.msk.bf16.vlgmr.msra.gmra.mrb[0].mxu0 %vm234_vm1, %v1167_v3  ;;  %1104 = vmatmul.mubr.msk.bf16.vlgmr.msra.gmra.mrb[0].mxu1 %vm234_vm1, %v1168_v4  ;;  %v1192_v28 = vld [vmem:[%s1760_s0 + $0xd8] sm:$0xff]   ;;  %v1193_v29 = vld [vmem:[%s1760_s0 + $0x68] sm:$0xff]   ;;  %v1194_v30 = vld [vmem:[%s1760_s0 + $0xe0] ss:$0 sps:$4 sm:$0xff]  }
   0xb   :  { %1047 = vmatprep.mubr.msk.bf16.mxu0 %vm1197_vm0, %v1196_v0  ;;  %1107 = vmatprep.mubr.msk.bf16.mxu1 %vm1197_vm0, %v1196_v0  ;;  %v1195_v31 = vld [vmem:[%s1760_s0 + $0x70] sm:$0xff]   ;;  %v1410_v32 = vld [vmem:[%s1761_s2] ss:$0 sm:$0xff] }
   0xc   :  { %v1415_v34 = vld [vmem:[%s1762_s3] ss:$0 sm:$0xff] }
  0x12   :  { %1048 = vmatmul.mubr.msk.bf16.gmra.mrb[4].mxu0 %vm234_vm1, %v1169_v5  ;;  %1108 = vmatmul.mubr.msk.bf16.gmra.mrb[4].mxu1 %vm234_vm1, %v1170_v6 }
  0x13   :  { %1051 = vmatprep.mubr.msk.bf16.mxu0 %vm1197_vm0, %v1196_v0  ;;  %1111 = vmatprep.mubr.msk.bf16.mxu1 %vm1197_vm0, %v1196_v0 }
  0x1a   :  { %1052 = vmatmul.mubr.msk.bf16.gmra.mrb[8].mxu0 %vm234_vm1, %v1171_v7  ;;  %1112 = vmatmul.mubr.msk.bf16.gmra.mrb[8].mxu1 %vm234_vm1, %v1172_v8 }
  0x1b   :  { %1055 = vmatprep.mubr.msk.bf16.mxu0 %vm1197_vm0, %v1196_v0  ;;  %1115 = vmatprep.mubr.msk.bf16.mxu1 %vm1197_vm0, %v1196_v0 }
  0x22   :  { %1056 = vmatmul.mubr.msk.bf16.gmra.mrb[12].mxu0 %vm234_vm1, %v1173_v9  ;;  %1116 = vmatmul.mubr.msk.bf16.gmra.mrb[12].mxu1 %vm234_vm1, %v1174_v10 }
  0x23   :  { %1059 = vmatprep.mubr.msk.bf16.mxu0 %vm1197_vm0, %v1196_v0  ;;  %1119 = vmatprep.mubr.msk.bf16.mxu1 %vm1197_vm0, %v1196_v0 }
  0x2a   :  { %1060 = vmatmul.mubr.msk.bf16.gmra.mrb[16].mxu0 %vm234_vm1, %v1175_v11  ;;  %1120 = vmatmul.mubr.msk.bf16.gmra.mrb[16].mxu1 %vm234_vm1, %v1176_v12 }
  0x2b   :  { %1063 = vmatprep.mubr.msk.bf16.mxu0 %vm1197_vm0, %v1196_v0  ;;  %1123 = vmatprep.mubr.msk.bf16.mxu1 %vm1197_vm0, %v1196_v0 }
  0x32   :  { %1064 = vmatmul.mubr.msk.bf16.gmra.mrb[20].mxu0 %vm234_vm1, %v1177_v13  ;;  %1124 = vmatmul.mubr.msk.bf16.gmra.mrb[20].mxu1 %vm234_vm1, %v1178_v14 }
  0x33   :  { %1067 = vmatprep.mubr.msk.bf16.mxu0 %vm1197_vm0, %v1196_v0  ;;  %1127 = vmatprep.mubr.msk.bf16.mxu1 %vm1197_vm0, %v1196_v0 }
  0x3a   :  { %1068 = vmatmul.mubr.msk.bf16.gmra.mrb[24].mxu0 %vm234_vm1, %v1179_v15  ;;  %1128 = vmatmul.mubr.msk.bf16.gmra.mrb[24].mxu1 %vm234_vm1, %v1180_v16 }
  0x3b   :  { %1071 = vmatprep.mubr.msk.bf16.mxu0 %vm1197_vm0, %v1196_v0  ;;  %1131 = vmatprep.mubr.msk.bf16.mxu1 %vm1197_vm0, %v1196_v0 }
  0x42   :  { %1072 = vmatmul.mubr.msk.bf16.gmra.mrb[28].mxu0 %vm234_vm1, %v1181_v17  ;;  %1132 = vmatmul.mubr.msk.bf16.gmra.mrb[28].mxu1 %vm234_vm1, %v1182_v18 }
  0x43   :  { %1075 = vmatprep.mubr.msk.bf16.mxu0 %vm1197_vm0, %v1196_v0  ;;  %1135 = vmatprep.mubr.msk.bf16.mxu1 %vm1197_vm0, %v1196_v0 }
  0x4a   :  { %1076 = vmatmul.mubr.msk.bf16.gmra.mrb[32].mxu0 %vm234_vm1, %v1183_v19  ;;  %1136 = vmatmul.mubr.msk.bf16.gmra.mrb[32].mxu1 %vm234_vm1, %v1184_v20 }
  0x4b   :  { %1079 = vmatprep.mubr.msk.bf16.mxu0 %vm1197_vm0, %v1196_v0  ;;  %1139 = vmatprep.mubr.msk.bf16.mxu1 %vm1197_vm0, %v1196_v0 }
  0x52   :  { %1080 = vmatmul.mubr.msk.bf16.gmra.mrb[36].mxu0 %vm234_vm1, %v1185_v21  ;;  %1140 = vmatmul.mubr.msk.bf16.gmra.mrb[36].mxu1 %vm234_vm1, %v1186_v22 }
  0x53   :  { %1083 = vmatprep.mubr.msk.bf16.mxu0 %vm1197_vm0, %v1196_v0  ;;  %1143 = vmatprep.mubr.msk.bf16.mxu1 %vm1197_vm0, %v1196_v0 }
  0x5a   :  { %1084 = vmatmul.mubr.msk.bf16.gmra.mrb[40].mxu0 %vm234_vm1, %v1187_v23  ;;  %1144 = vmatmul.mubr.msk.bf16.gmra.mrb[40].mxu1 %vm234_vm1, %v1188_v24 }
  0x5b   :  { %1087 = vmatprep.mubr.msk.bf16.mxu0 %vm1197_vm0, %v1196_v0  ;;  %1147 = vmatprep.mubr.msk.bf16.mxu1 %vm1197_vm0, %v1196_v0 }
  0x62   :  { %1088 = vmatmul.mubr.msk.bf16.gmra.mrb[44].mxu0 %vm234_vm1, %v1189_v25  ;;  %1148 = vmatmul.mubr.msk.bf16.gmra.mrb[44].mxu1 %vm234_vm1, %v1190_v26 }
  0x63   :  { %1091 = vmatprep.mubr.msk.bf16.mxu0 %vm1197_vm0, %v1196_v0  ;;  %1151 = vmatprep.mubr.msk.bf16.mxu1 %vm1197_vm0, %v1196_v0 }
  0x6a   :  { %1092 = vmatmul.mubr.msk.bf16.gmra.mrb[48].mxu0 %vm234_vm1, %v1191_v27  ;;  %1152 = vmatmul.mubr.msk.bf16.gmra.mrb[48].mxu1 %vm234_vm1, %v1192_v28 }
  0x6b   :  { %1095 = vmatprep.mubr.msk.bf16.mxu0 %vm1197_vm0, %v1196_v0  ;;  %1155 = vmatprep.mubr.msk.bf16.mxu1 %vm1197_vm0, %v1196_v0 }
  0x72   :  { %1096 = vmatmul.mubr.msk.bf16.gmra.mrb[52].mxu0 %vm234_vm1, %v1193_v29  ;;  %1156 = vmatmul.mubr.msk.bf16.gmra.mrb[52].mxu1 %vm234_vm1, %v1194_v30 }
  0x73   :  { %1099 = vmatprep.mubr.msk.bf16.mxu0 %vm1197_vm0, %v1196_v0 }
  0x7a   :  { %1100 = vmatmul.mubr.msk.bf16.gmra.mrb[56].mxu0 %vm234_vm1, %v1195_v31 }
  0xdd   :  { %v356_v33 = vpop.f32.mrb[0].mxu0  ;;  %v476_v35 = vpop.f32.mrb[0].mxu1 }
  0xde   :  { %v593_v36 = vmul.f32 %v1410_v32, %v356_v33  ;;  %v1045_v37 = vpop.f32.mrb[1].mxu0  ;;  %v623_v38 = vmul.f32 %v1410_v32, %v476_v35  ;;  %v1105_v39 = vpop.f32.mrb[1].mxu1 }
  0xdf   :  { %v359_v40 = vpop.f32.mrb[2].mxu0  ;;  %v479_v41 = vpop.f32.mrb[2].mxu1 }
  0xe0   :  { %v657_v42 = vadd.f32 %v1415_v34, %v593_v36  ;;  %v594_v43 = vmul.f32 %v1410_v32, %v359_v40  ;;  %v1046_v44 = vpop.f32.mrb[3].mxu0  ;;  %v687_v45 = vadd.f32 %v1415_v34, %v623_v38  ;;  %v624_v46 = vmul.f32 %v1410_v32, %v479_v41  ;;  %v1106_v47 = vpop.f32.mrb[3].mxu1 }
  0xe2   :  { %vm714_vm2 = vcmp.ge.f32.partialorder %v657_v42, 0.0  ;;  %v771_v48 = vmul.f32 0.01, %v657_v42  ;;  %v658_v49 = vadd.f32 %v1415_v34, %v594_v43  ;;  %vm744_vm3 = vcmp.ge.f32.partialorder %v687_v45, 0.0 }
  0xe3   :  { %v801_v50 = vmul.f32 0.01, %v687_v45  ;;  %v688_v51 = vadd.f32 %v1415_v34, %v624_v46 }
  0xe4   :  { %v828_v52 = vsel %vm714_vm2, %v657_v42, %v771_v48  ;;  %vm715_vm4 = vcmp.ge.f32.partialorder %v658_v49, 0.0  ;;  %v772_v53 = vmul.f32 0.01, %v658_v49 }
  0xe5   :  { %885 = vst.msk [vmem:[%s1763_s4] sm:$0xff] %vm234_vm1, %v828_v52  ;;  %v858_v54 = vsel %vm744_vm3, %v687_v45, %v801_v50  ;;  %v364_v55 = vpop.f32.mrb[4].mxu0  ;;  %vm745_vm5 = vcmp.ge.f32.partialorder %v688_v51, 0.0  ;;  %v802_v56 = vmul.f32 0.01, %v688_v51  ;;  %v484_v57 = vpop.f32.mrb[4].mxu1 }
  0xe6   :  { %v829_v58 = vsel %vm715_vm4, %v658_v49, %v772_v53  ;;  %915 = vst.msk [vmem:[%s1763_s4 + $0xf0] sm:$0xff] %vm234_vm1, %v858_v54  ;;  %v595_v59 = vmul.f32 %v1410_v32, %v364_v55  ;;  %v1049_v60 = vpop.f32.mrb[5].mxu0  ;;  %v625_v61 = vmul.f32 %v1410_v32, %v484_v57  ;;  %v1109_v62 = vpop.f32.mrb[5].mxu1 }
  0xe7   :  { %886 = vst.msk [vmem:[%s1763_s4 + $0x8] sm:$0xff] %vm234_vm1, %v829_v58  ;;  %v859_v63 = vsel %vm745_vm5, %v688_v51, %v802_v56  ;;  %v367_v0 = vpop.f32.mrb[6].mxu0  ;;  %v487_v1 = vpop.f32.mrb[6].mxu1 }
  0xe8   :  { %v659_v2 = vadd.f32 %v1415_v34, %v595_v59  ;;  %916 = vst.msk [vmem:[%s1763_s4 + $0xf8] sm:$0xff] %vm234_vm1, %v859_v63  ;;  %v596_v3 = vmul.f32 %v1410_v32, %v367_v0  ;;  %v1050_v4 = vpop.f32.mrb[7].mxu0  ;;  %v689_v5 = vadd.f32 %v1415_v34, %v625_v61  ;;  %v626_v6 = vmul.f32 %v1410_v32, %v487_v1  ;;  %v1110_v7 = vpop.f32.mrb[7].mxu1 }
  0xea   :  { %vm716_vm6 = vcmp.ge.f32.partialorder %v659_v2, 0.0  ;;  %v773_v8 = vmul.f32 0.01, %v659_v2  ;;  %v660_v9 = vadd.f32 %v1415_v34, %v596_v3  ;;  %vm746_vm7 = vcmp.ge.f32.partialorder %v689_v5, 0.0 }
  0xeb   :  { %v803_v10 = vmul.f32 0.01, %v689_v5  ;;  %v690_v11 = vadd.f32 %v1415_v34, %v626_v6 }
  0xec   :  { %v830_v12 = vsel %vm716_vm6, %v659_v2, %v773_v8  ;;  %vm717_vm8 = vcmp.ge.f32.partialorder %v660_v9, 0.0  ;;  %v774_v13 = vmul.f32 0.01, %v660_v9 }
  0xed   :  { %887 = vst.msk [vmem:[%s1763_s4 + $0x10] sm:$0xff] %vm234_vm1, %v830_v12  ;;  %v860_v14 = vsel %vm746_vm7, %v689_v5, %v803_v10  ;;  %v372_v15 = vpop.f32.mrb[8].mxu0  ;;  %vm747_vm9 = vcmp.ge.f32.partialorder %v690_v11, 0.0  ;;  %v804_v16 = vmul.f32 0.01, %v690_v11  ;;  %v492_v17 = vpop.f32.mrb[8].mxu1 }
  0xee   :  { %v831_v18 = vsel %vm717_vm8, %v660_v9, %v774_v13  ;;  %917 = vst.msk [vmem:[%s1763_s4 + $0x100] sm:$0xff] %vm234_vm1, %v860_v14  ;;  %v597_v19 = vmul.f32 %v1410_v32, %v372_v15  ;;  %v1053_v20 = vpop.f32.mrb[9].mxu0  ;;  %v627_v21 = vmul.f32 %v1410_v32, %v492_v17  ;;  %v1113_v22 = vpop.f32.mrb[9].mxu1 }
  0xef   :  { %888 = vst.msk [vmem:[%s1763_s4 + $0x18] sm:$0xff] %vm234_vm1, %v831_v18  ;;  %v861_v23 = vsel %vm747_vm9, %v690_v11, %v804_v16  ;;  %v375_v24 = vpop.f32.mrb[10].mxu0  ;;  %v495_v25 = vpop.f32.mrb[10].mxu1 }
  0xf0   :  { %v661_v26 = vadd.f32 %v1415_v34, %v597_v19  ;;  %918 = vst.msk [vmem:[%s1763_s4 + $0x108] sm:$0xff] %vm234_vm1, %v861_v23  ;;  %v598_v27 = vmul.f32 %v1410_v32, %v375_v24  ;;  %v1054_v28 = vpop.f32.mrb[11].mxu0  ;;  %v691_v29 = vadd.f32 %v1415_v34, %v627_v21  ;;  %v628_v30 = vmul.f32 %v1410_v32, %v495_v25  ;;  %v1114_v31 = vpop.f32.mrb[11].mxu1 }
  0xf2   :  { %vm718_vm10 = vcmp.ge.f32.partialorder %v661_v26, 0.0  ;;  %v775_v33 = vmul.f32 0.01, %v661_v26  ;;  %v662_v35 = vadd.f32 %v1415_v34, %v598_v27  ;;  %vm748_vm11 = vcmp.ge.f32.partialorder %v691_v29, 0.0 }
  0xf3   :  { %v805_v36 = vmul.f32 0.01, %v691_v29  ;;  %v692_v37 = vadd.f32 %v1415_v34, %v628_v30 }
  0xf4   :  { %v832_v38 = vsel %vm718_vm10, %v661_v26, %v775_v33  ;;  %vm719_vm12 = vcmp.ge.f32.partialorder %v662_v35, 0.0  ;;  %v776_v39 = vmul.f32 0.01, %v662_v35 }
  0xf5   :  { %889 = vst.msk [vmem:[%s1763_s4 + $0x20] sm:$0xff] %vm234_vm1, %v832_v38  ;;  %v862_v40 = vsel %vm748_vm11, %v691_v29, %v805_v36  ;;  %v380_v41 = vpop.f32.mrb[12].mxu0  ;;  %vm749_vm13 = vcmp.ge.f32.partialorder %v692_v37, 0.0  ;;  %v806_v42 = vmul.f32 0.01, %v692_v37  ;;  %v500_v43 = vpop.f32.mrb[12].mxu1 }
  0xf6   :  { %v833_v44 = vsel %vm719_vm12, %v662_v35, %v776_v39  ;;  %919 = vst.msk [vmem:[%s1763_s4 + $0x110] sm:$0xff] %vm234_vm1, %v862_v40  ;;  %v599_v45 = vmul.f32 %v1410_v32, %v380_v41  ;;  %v1057_v46 = vpop.f32.mrb[13].mxu0  ;;  %v629_v47 = vmul.f32 %v1410_v32, %v500_v43  ;;  %v1117_v48 = vpop.f32.mrb[13].mxu1 }
  0xf7   :  { %890 = vst.msk [vmem:[%s1763_s4 + $0x28] sm:$0xff] %vm234_vm1, %v833_v44  ;;  %v863_v49 = vsel %vm749_vm13, %v692_v37, %v806_v42  ;;  %v383_v50 = vpop.f32.mrb[14].mxu0  ;;  %v503_v51 = vpop.f32.mrb[14].mxu1 }
  0xf8   :  { %v663_v52 = vadd.f32 %v1415_v34, %v599_v45  ;;  %920 = vst.msk [vmem:[%s1763_s4 + $0x118] sm:$0xff] %vm234_vm1, %v863_v49  ;;  %v600_v53 = vmul.f32 %v1410_v32, %v383_v50  ;;  %v1058_v54 = vpop.f32.mrb[15].mxu0  ;;  %v693_v55 = vadd.f32 %v1415_v34, %v629_v47  ;;  %v630_v56 = vmul.f32 %v1410_v32, %v503_v51  ;;  %v1118_v57 = vpop.f32.mrb[15].mxu1 }
  0xfa   :  { %vm720_vm14 = vcmp.ge.f32.partialorder %v663_v52, 0.0  ;;  %v777_v58 = vmul.f32 0.01, %v663_v52  ;;  %v664_v59 = vadd.f32 %v1415_v34, %v600_v53  ;;  %vm750_vm15 = vcmp.ge.f32.partialorder %v693_v55, 0.0 }
  0xfb   :  { %v807_v60 = vmul.f32 0.01, %v693_v55  ;;  %v694_v61 = vadd.f32 %v1415_v34, %v630_v56 }
  0xfc   :  { %v834_v62 = vsel %vm720_vm14, %v663_v52, %v777_v58  ;;  %vm721_vm0 = vcmp.ge.f32.partialorder %v664_v59, 0.0  ;;  %v778_v63 = vmul.f32 0.01, %v664_v59 }
  0xfd   :  { %891 = vst.msk [vmem:[%s1763_s4 + $0x30] sm:$0xff] %vm234_vm1, %v834_v62  ;;  %v864_v0 = vsel %vm750_vm15, %v693_v55, %v807_v60  ;;  %v388_v1 = vpop.f32.mrb[16].mxu0  ;;  %vm751_vm2 = vcmp.ge.f32.partialorder %v694_v61, 0.0  ;;  %v808_v2 = vmul.f32 0.01, %v694_v61  ;;  %v508_v3 = vpop.f32.mrb[16].mxu1 }
  0xfe   :  { %v835_v4 = vsel %vm721_vm0, %v664_v59, %v778_v63  ;;  %921 = vst.msk [vmem:[%s1763_s4 + $0x120] sm:$0xff] %vm234_vm1, %v864_v0  ;;  %v601_v5 = vmul.f32 %v1410_v32, %v388_v1  ;;  %v1061_v6 = vpop.f32.mrb[17].mxu0  ;;  %v631_v7 = vmul.f32 %v1410_v32, %v508_v3  ;;  %v1121_v8 = vpop.f32.mrb[17].mxu1 }
  0xff   :  { %892 = vst.msk [vmem:[%s1763_s4 + $0x38] sm:$0xff] %vm234_vm1, %v835_v4  ;;  %v865_v9 = vsel %vm751_vm2, %v694_v61, %v808_v2  ;;  %v391_v10 = vpop.f32.mrb[18].mxu0  ;;  %v511_v11 = vpop.f32.mrb[18].mxu1 }
 0x100   :  { %v665_v12 = vadd.f32 %v1415_v34, %v601_v5  ;;  %922 = vst.msk [vmem:[%s1763_s4 + $0x128] sm:$0xff] %vm234_vm1, %v865_v9  ;;  %v602_v13 = vmul.f32 %v1410_v32, %v391_v10  ;;  %v1062_v14 = vpop.f32.mrb[19].mxu0  ;;  %v695_v15 = vadd.f32 %v1415_v34, %v631_v7  ;;  %v632_v16 = vmul.f32 %v1410_v32, %v511_v11  ;;  %v1122_v17 = vpop.f32.mrb[19].mxu1 }
 0x102   :  { %vm722_vm3 = vcmp.ge.f32.partialorder %v665_v12, 0.0  ;;  %v779_v18 = vmul.f32 0.01, %v665_v12  ;;  %v666_v19 = vadd.f32 %v1415_v34, %v602_v13  ;;  %vm752_vm4 = vcmp.ge.f32.partialorder %v695_v15, 0.0 }
 0x103   :  { %v809_v20 = vmul.f32 0.01, %v695_v15  ;;  %v696_v21 = vadd.f32 %v1415_v34, %v632_v16 }
 0x104   :  { %v836_v22 = vsel %vm722_vm3, %v665_v12, %v779_v18  ;;  %vm723_vm5 = vcmp.ge.f32.partialorder %v666_v19, 0.0  ;;  %v780_v23 = vmul.f32 0.01, %v666_v19 }
 0x105   :  { %893 = vst.msk [vmem:[%s1763_s4 + $0x40] sm:$0xff] %vm234_vm1, %v836_v22  ;;  %v866_v24 = vsel %vm752_vm4, %v695_v15, %v809_v20  ;;  %v396_v25 = vpop.f32.mrb[20].mxu0  ;;  %vm753_vm6 = vcmp.ge.f32.partialorder %v696_v21, 0.0  ;;  %v810_v26 = vmul.f32 0.01, %v696_v21  ;;  %v516_v27 = vpop.f32.mrb[20].mxu1 }
 0x106   :  { %v837_v28 = vsel %vm723_vm5, %v666_v19, %v780_v23  ;;  %923 = vst.msk [vmem:[%s1763_s4 + $0x130] sm:$0xff] %vm234_vm1, %v866_v24  ;;  %v603_v29 = vmul.f32 %v1410_v32, %v396_v25  ;;  %v1065_v30 = vpop.f32.mrb[21].mxu0  ;;  %v633_v31 = vmul.f32 %v1410_v32, %v516_v27  ;;  %v1125_v33 = vpop.f32.mrb[21].mxu1 }
 0x107   :  { %894 = vst.msk [vmem:[%s1763_s4 + $0x48] sm:$0xff] %vm234_vm1, %v837_v28  ;;  %v867_v35 = vsel %vm753_vm6, %v696_v21, %v810_v26  ;;  %v399_v36 = vpop.f32.mrb[22].mxu0  ;;  %v519_v37 = vpop.f32.mrb[22].mxu1 }
 0x108   :  { %v667_v38 = vadd.f32 %v1415_v34, %v603_v29  ;;  %924 = vst.msk [vmem:[%s1763_s4 + $0x138] sm:$0xff] %vm234_vm1, %v867_v35  ;;  %v604_v39 = vmul.f32 %v1410_v32, %v399_v36  ;;  %v1066_v40 = vpop.f32.mrb[23].mxu0  ;;  %v697_v41 = vadd.f32 %v1415_v34, %v633_v31  ;;  %v634_v42 = vmul.f32 %v1410_v32, %v519_v37  ;;  %v1126_v43 = vpop.f32.mrb[23].mxu1 }
 0x10a   :  { %vm724_vm7 = vcmp.ge.f32.partialorder %v667_v38, 0.0  ;;  %v781_v44 = vmul.f32 0.01, %v667_v38  ;;  %v668_v45 = vadd.f32 %v1415_v34, %v604_v39  ;;  %vm754_vm8 = vcmp.ge.f32.partialorder %v697_v41, 0.0 }
 0x10b   :  { %v811_v46 = vmul.f32 0.01, %v697_v41  ;;  %v698_v47 = vadd.f32 %v1415_v34, %v634_v42 }
 0x10c   :  { %v838_v48 = vsel %vm724_vm7, %v667_v38, %v781_v44  ;;  %vm725_vm9 = vcmp.ge.f32.partialorder %v668_v45, 0.0  ;;  %v782_v49 = vmul.f32 0.01, %v668_v45 }
 0x10d   :  { %895 = vst.msk [vmem:[%s1763_s4 + $0x50] sm:$0xff] %vm234_vm1, %v838_v48  ;;  %v868_v50 = vsel %vm754_vm8, %v697_v41, %v811_v46  ;;  %v404_v51 = vpop.f32.mrb[24].mxu0  ;;  %vm755_vm10 = vcmp.ge.f32.partialorder %v698_v47, 0.0  ;;  %v812_v52 = vmul.f32 0.01, %v698_v47  ;;  %v524_v53 = vpop.f32.mrb[24].mxu1 }
 0x10e   :  { %v839_v54 = vsel %vm725_vm9, %v668_v45, %v782_v49  ;;  %925 = vst.msk [vmem:[%s1763_s4 + $0x140] sm:$0xff] %vm234_vm1, %v868_v50  ;;  %v605_v55 = vmul.f32 %v1410_v32, %v404_v51  ;;  %v1069_v56 = vpop.f32.mrb[25].mxu0  ;;  %v635_v57 = vmul.f32 %v1410_v32, %v524_v53  ;;  %v1129_v58 = vpop.f32.mrb[25].mxu1 }
 0x10f   :  { %896 = vst.msk [vmem:[%s1763_s4 + $0x58] sm:$0xff] %vm234_vm1, %v839_v54  ;;  %v869_v59 = vsel %vm755_vm10, %v698_v47, %v812_v52  ;;  %v407_v60 = vpop.f32.mrb[26].mxu0  ;;  %v527_v61 = vpop.f32.mrb[26].mxu1 }
 0x110   :  { %v669_v62 = vadd.f32 %v1415_v34, %v605_v55  ;;  %926 = vst.msk [vmem:[%s1763_s4 + $0x148] sm:$0xff] %vm234_vm1, %v869_v59  ;;  %v606_v63 = vmul.f32 %v1410_v32, %v407_v60  ;;  %v1070_v0 = vpop.f32.mrb[27].mxu0  ;;  %v699_v1 = vadd.f32 %v1415_v34, %v635_v57  ;;  %v636_v2 = vmul.f32 %v1410_v32, %v527_v61  ;;  %v1130_v3 = vpop.f32.mrb[27].mxu1 }
 0x112   :  { %vm726_vm11 = vcmp.ge.f32.partialorder %v669_v62, 0.0  ;;  %v783_v4 = vmul.f32 0.01, %v669_v62  ;;  %v670_v5 = vadd.f32 %v1415_v34, %v606_v63  ;;  %vm756_vm12 = vcmp.ge.f32.partialorder %v699_v1, 0.0 }
 0x113   :  { %v813_v6 = vmul.f32 0.01, %v699_v1  ;;  %v700_v7 = vadd.f32 %v1415_v34, %v636_v2 }
 0x114   :  { %v840_v8 = vsel %vm726_vm11, %v669_v62, %v783_v4  ;;  %vm727_vm13 = vcmp.ge.f32.partialorder %v670_v5, 0.0  ;;  %v784_v9 = vmul.f32 0.01, %v670_v5 }
 0x115   :  { %897 = vst.msk [vmem:[%s1763_s4 + $0x60] sm:$0xff] %vm234_vm1, %v840_v8  ;;  %v870_v10 = vsel %vm756_vm12, %v699_v1, %v813_v6  ;;  %v412_v11 = vpop.f32.mrb[28].mxu0  ;;  %vm757_vm14 = vcmp.ge.f32.partialorder %v700_v7, 0.0  ;;  %v814_v12 = vmul.f32 0.01, %v700_v7  ;;  %v532_v13 = vpop.f32.mrb[28].mxu1 }
 0x116   :  { %v841_v14 = vsel %vm727_vm13, %v670_v5, %v784_v9  ;;  %927 = vst.msk [vmem:[%s1763_s4 + $0x150] sm:$0xff] %vm234_vm1, %v870_v10  ;;  %v607_v15 = vmul.f32 %v1410_v32, %v412_v11  ;;  %v1073_v16 = vpop.f32.mrb[29].mxu0  ;;  %v637_v17 = vmul.f32 %v1410_v32, %v532_v13  ;;  %v1133_v18 = vpop.f32.mrb[29].mxu1 }
 0x117   :  { %898 = vst.msk [vmem:[%s1763_s4 + $0x68] sm:$0xff] %vm234_vm1, %v841_v14  ;;  %v871_v19 = vsel %vm757_vm14, %v700_v7, %v814_v12  ;;  %v415_v20 = vpop.f32.mrb[30].mxu0  ;;  %v535_v21 = vpop.f32.mrb[30].mxu1 }
 0x118   :  { %v671_v22 = vadd.f32 %v1415_v34, %v607_v15  ;;  %928 = vst.msk [vmem:[%s1763_s4 + $0x158] sm:$0xff] %vm234_vm1, %v871_v19  ;;  %v608_v23 = vmul.f32 %v1410_v32, %v415_v20  ;;  %v1074_v24 = vpop.f32.mrb[31].mxu0  ;;  %v701_v25 = vadd.f32 %v1415_v34, %v637_v17  ;;  %v638_v26 = vmul.f32 %v1410_v32, %v535_v21  ;;  %v1134_v27 = vpop.f32.mrb[31].mxu1 }
 0x11a   :  { %vm728_vm15 = vcmp.ge.f32.partialorder %v671_v22, 0.0  ;;  %v785_v28 = vmul.f32 0.01, %v671_v22  ;;  %v672_v29 = vadd.f32 %v1415_v34, %v608_v23  ;;  %vm758_vm0 = vcmp.ge.f32.partialorder %v701_v25, 0.0 }
 0x11b   :  { %v815_v30 = vmul.f32 0.01, %v701_v25  ;;  %v702_v31 = vadd.f32 %v1415_v34, %v638_v26 }
 0x11c   :  { %v842_v33 = vsel %vm728_vm15, %v671_v22, %v785_v28  ;;  %vm729_vm2 = vcmp.ge.f32.partialorder %v672_v29, 0.0  ;;  %v786_v35 = vmul.f32 0.01, %v672_v29 }
 0x11d   :  { %899 = vst.msk [vmem:[%s1763_s4 + $0x70] sm:$0xff] %vm234_vm1, %v842_v33  ;;  %v872_v36 = vsel %vm758_vm0, %v701_v25, %v815_v30  ;;  %v420_v37 = vpop.f32.mrb[32].mxu0  ;;  %vm759_vm3 = vcmp.ge.f32.partialorder %v702_v31, 0.0  ;;  %v816_v38 = vmul.f32 0.01, %v702_v31  ;;  %v540_v39 = vpop.f32.mrb[32].mxu1 }
 0x11e   :  { %v843_v40 = vsel %vm729_vm2, %v672_v29, %v786_v35  ;;  %929 = vst.msk [vmem:[%s1763_s4 + $0x160] sm:$0xff] %vm234_vm1, %v872_v36  ;;  %v609_v41 = vmul.f32 %v1410_v32, %v420_v37  ;;  %v1077_v42 = vpop.f32.mrb[33].mxu0  ;;  %v639_v43 = vmul.f32 %v1410_v32, %v540_v39  ;;  %v1137_v44 = vpop.f32.mrb[33].mxu1 }
 0x11f   :  { %900 = vst.msk [vmem:[%s1763_s4 + $0x78] sm:$0xff] %vm234_vm1, %v843_v40  ;;  %v873_v45 = vsel %vm759_vm3, %v702_v31, %v816_v38  ;;  %v423_v46 = vpop.f32.mrb[34].mxu0  ;;  %v543_v47 = vpop.f32.mrb[34].mxu1 }
 0x120   :  { %v673_v48 = vadd.f32 %v1415_v34, %v609_v41  ;;  %930 = vst.msk [vmem:[%s1763_s4 + $0x168] sm:$0xff] %vm234_vm1, %v873_v45  ;;  %v610_v49 = vmul.f32 %v1410_v32, %v423_v46  ;;  %v1078_v50 = vpop.f32.mrb[35].mxu0  ;;  %v703_v51 = vadd.f32 %v1415_v34, %v639_v43  ;;  %v640_v52 = vmul.f32 %v1410_v32, %v543_v47  ;;  %v1138_v53 = vpop.f32.mrb[35].mxu1 }
 0x122   :  { %vm730_vm4 = vcmp.ge.f32.partialorder %v673_v48, 0.0  ;;  %v787_v54 = vmul.f32 0.01, %v673_v48  ;;  %v674_v55 = vadd.f32 %v1415_v34, %v610_v49  ;;  %vm760_vm5 = vcmp.ge.f32.partialorder %v703_v51, 0.0 }
 0x123   :  { %v817_v56 = vmul.f32 0.01, %v703_v51  ;;  %v704_v57 = vadd.f32 %v1415_v34, %v640_v52 }
 0x124   :  { %v844_v58 = vsel %vm730_vm4, %v673_v48, %v787_v54  ;;  %vm731_vm6 = vcmp.ge.f32.partialorder %v674_v55, 0.0  ;;  %v788_v59 = vmul.f32 0.01, %v674_v55 }
 0x125   :  { %901 = vst.msk [vmem:[%s1763_s4 + $0x80] sm:$0xff] %vm234_vm1, %v844_v58  ;;  %v874_v60 = vsel %vm760_vm5, %v703_v51, %v817_v56  ;;  %v428_v61 = vpop.f32.mrb[36].mxu0  ;;  %vm761_vm7 = vcmp.ge.f32.partialorder %v704_v57, 0.0  ;;  %v818_v62 = vmul.f32 0.01, %v704_v57  ;;  %v548_v63 = vpop.f32.mrb[36].mxu1 }
 0x126   :  { %v845_v0 = vsel %vm731_vm6, %v674_v55, %v788_v59  ;;  %931 = vst.msk [vmem:[%s1763_s4 + $0x170] sm:$0xff] %vm234_vm1, %v874_v60  ;;  %v611_v1 = vmul.f32 %v1410_v32, %v428_v61  ;;  %v1081_v2 = vpop.f32.mrb[37].mxu0  ;;  %v641_v3 = vmul.f32 %v1410_v32, %v548_v63  ;;  %v1141_v4 = vpop.f32.mrb[37].mxu1 }
 0x127   :  { %902 = vst.msk [vmem:[%s1763_s4 + $0x88] sm:$0xff] %vm234_vm1, %v845_v0  ;;  %v875_v5 = vsel %vm761_vm7, %v704_v57, %v818_v62  ;;  %v431_v6 = vpop.f32.mrb[38].mxu0  ;;  %v551_v7 = vpop.f32.mrb[38].mxu1 }
 0x128   :  { %v675_v8 = vadd.f32 %v1415_v34, %v611_v1  ;;  %932 = vst.msk [vmem:[%s1763_s4 + $0x178] sm:$0xff] %vm234_vm1, %v875_v5  ;;  %v612_v9 = vmul.f32 %v1410_v32, %v431_v6  ;;  %v1082_v10 = vpop.f32.mrb[39].mxu0  ;;  %v705_v11 = vadd.f32 %v1415_v34, %v641_v3  ;;  %v642_v12 = vmul.f32 %v1410_v32, %v551_v7  ;;  %v1142_v13 = vpop.f32.mrb[39].mxu1 }
 0x12a   :  { %vm732_vm8 = vcmp.ge.f32.partialorder %v675_v8, 0.0  ;;  %v789_v14 = vmul.f32 0.01, %v675_v8  ;;  %v676_v15 = vadd.f32 %v1415_v34, %v612_v9  ;;  %vm762_vm9 = vcmp.ge.f32.partialorder %v705_v11, 0.0 }
 0x12b   :  { %v819_v16 = vmul.f32 0.01, %v705_v11  ;;  %v706_v17 = vadd.f32 %v1415_v34, %v642_v12 }
 0x12c   :  { %v846_v18 = vsel %vm732_vm8, %v675_v8, %v789_v14  ;;  %vm733_vm10 = vcmp.ge.f32.partialorder %v676_v15, 0.0  ;;  %v790_v19 = vmul.f32 0.01, %v676_v15 }
 0x12d   :  { %903 = vst.msk [vmem:[%s1763_s4 + $0x90] sm:$0xff] %vm234_vm1, %v846_v18  ;;  %v876_v20 = vsel %vm762_vm9, %v705_v11, %v819_v16  ;;  %v436_v21 = vpop.f32.mrb[40].mxu0  ;;  %vm763_vm11 = vcmp.ge.f32.partialorder %v706_v17, 0.0  ;;  %v820_v22 = vmul.f32 0.01, %v706_v17  ;;  %v556_v23 = vpop.f32.mrb[40].mxu1 }
 0x12e   :  { %v847_v24 = vsel %vm733_vm10, %v676_v15, %v790_v19  ;;  %933 = vst.msk [vmem:[%s1763_s4 + $0x180] sm:$0xff] %vm234_vm1, %v876_v20  ;;  %v613_v25 = vmul.f32 %v1410_v32, %v436_v21  ;;  %v1085_v26 = vpop.f32.mrb[41].mxu0  ;;  %v643_v27 = vmul.f32 %v1410_v32, %v556_v23  ;;  %v1145_v28 = vpop.f32.mrb[41].mxu1 }
 0x12f   :  { %904 = vst.msk [vmem:[%s1763_s4 + $0x98] sm:$0xff] %vm234_vm1, %v847_v24  ;;  %v877_v29 = vsel %vm763_vm11, %v706_v17, %v820_v22  ;;  %v439_v30 = vpop.f32.mrb[42].mxu0  ;;  %v559_v31 = vpop.f32.mrb[42].mxu1 }
 0x130   :  { %v677_v33 = vadd.f32 %v1415_v34, %v613_v25  ;;  %934 = vst.msk [vmem:[%s1763_s4 + $0x188] sm:$0xff] %vm234_vm1, %v877_v29  ;;  %v614_v35 = vmul.f32 %v1410_v32, %v439_v30  ;;  %v1086_v36 = vpop.f32.mrb[43].mxu0  ;;  %v707_v37 = vadd.f32 %v1415_v34, %v643_v27  ;;  %v644_v38 = vmul.f32 %v1410_v32, %v559_v31  ;;  %v1146_v39 = vpop.f32.mrb[43].mxu1 }
 0x132   :  { %vm734_vm12 = vcmp.ge.f32.partialorder %v677_v33, 0.0  ;;  %v791_v40 = vmul.f32 0.01, %v677_v33  ;;  %v678_v41 = vadd.f32 %v1415_v34, %v614_v35  ;;  %vm764_vm13 = vcmp.ge.f32.partialorder %v707_v37, 0.0 }
 0x133   :  { %v821_v42 = vmul.f32 0.01, %v707_v37  ;;  %v708_v43 = vadd.f32 %v1415_v34, %v644_v38 }
 0x134   :  { %v848_v44 = vsel %vm734_vm12, %v677_v33, %v791_v40  ;;  %vm735_vm14 = vcmp.ge.f32.partialorder %v678_v41, 0.0  ;;  %v792_v45 = vmul.f32 0.01, %v678_v41 }
 0x135   :  { %905 = vst.msk [vmem:[%s1763_s4 + $0xa0] sm:$0xff] %vm234_vm1, %v848_v44  ;;  %v878_v46 = vsel %vm764_vm13, %v707_v37, %v821_v42  ;;  %v444_v47 = vpop.f32.mrb[44].mxu0  ;;  %vm765_vm15 = vcmp.ge.f32.partialorder %v708_v43, 0.0  ;;  %v822_v48 = vmul.f32 0.01, %v708_v43  ;;  %v564_v49 = vpop.f32.mrb[44].mxu1 }
 0x136   :  { %v849_v50 = vsel %vm735_vm14, %v678_v41, %v792_v45  ;;  %935 = vst.msk [vmem:[%s1763_s4 + $0x190] sm:$0xff] %vm234_vm1, %v878_v46  ;;  %v615_v51 = vmul.f32 %v1410_v32, %v444_v47  ;;  %v1089_v52 = vpop.f32.mrb[45].mxu0  ;;  %v645_v53 = vmul.f32 %v1410_v32, %v564_v49  ;;  %v1149_v54 = vpop.f32.mrb[45].mxu1 }
 0x137   :  { %906 = vst.msk [vmem:[%s1763_s4 + $0xa8] sm:$0xff] %vm234_vm1, %v849_v50  ;;  %v879_v55 = vsel %vm765_vm15, %v708_v43, %v822_v48  ;;  %v447_v56 = vpop.f32.mrb[46].mxu0  ;;  %v567_v57 = vpop.f32.mrb[46].mxu1 }
 0x138   :  { %v679_v58 = vadd.f32 %v1415_v34, %v615_v51  ;;  %936 = vst.msk [vmem:[%s1763_s4 + $0x198] sm:$0xff] %vm234_vm1, %v879_v55  ;;  %v616_v59 = vmul.f32 %v1410_v32, %v447_v56  ;;  %v1090_v60 = vpop.f32.mrb[47].mxu0  ;;  %v709_v61 = vadd.f32 %v1415_v34, %v645_v53  ;;  %v646_v62 = vmul.f32 %v1410_v32, %v567_v57  ;;  %v1150_v63 = vpop.f32.mrb[47].mxu1 }
 0x13a   :  { %vm736_vm0 = vcmp.ge.f32.partialorder %v679_v58, 0.0  ;;  %v793_v0 = vmul.f32 0.01, %v679_v58  ;;  %v680_v1 = vadd.f32 %v1415_v34, %v616_v59  ;;  %vm766_vm2 = vcmp.ge.f32.partialorder %v709_v61, 0.0 }
 0x13b   :  { %v823_v2 = vmul.f32 0.01, %v709_v61  ;;  %v710_v3 = vadd.f32 %v1415_v34, %v646_v62 }
 0x13c   :  { %v850_v4 = vsel %vm736_vm0, %v679_v58, %v793_v0  ;;  %vm737_vm3 = vcmp.ge.f32.partialorder %v680_v1, 0.0  ;;  %v794_v5 = vmul.f32 0.01, %v680_v1 }
 0x13d   :  { %907 = vst.msk [vmem:[%s1763_s4 + $0xb0] sm:$0xff] %vm234_vm1, %v850_v4  ;;  %v880_v6 = vsel %vm766_vm2, %v709_v61, %v823_v2  ;;  %v452_v7 = vpop.f32.mrb[48].mxu0  ;;  %vm767_vm4 = vcmp.ge.f32.partialorder %v710_v3, 0.0  ;;  %v824_v8 = vmul.f32 0.01, %v710_v3  ;;  %v572_v9 = vpop.f32.mrb[48].mxu1 }
 0x13e   :  { %v851_v10 = vsel %vm737_vm3, %v680_v1, %v794_v5  ;;  %937 = vst.msk [vmem:[%s1763_s4 + $0x1a0] sm:$0xff] %vm234_vm1, %v880_v6  ;;  %v617_v11 = vmul.f32 %v1410_v32, %v452_v7  ;;  %v1093_v12 = vpop.f32.mrb[49].mxu0  ;;  %v647_v13 = vmul.f32 %v1410_v32, %v572_v9  ;;  %v1153_v14 = vpop.f32.mrb[49].mxu1 }
 0x13f   :  { %908 = vst.msk [vmem:[%s1763_s4 + $0xb8] sm:$0xff] %vm234_vm1, %v851_v10  ;;  %v881_v15 = vsel %vm767_vm4, %v710_v3, %v824_v8  ;;  %v455_v16 = vpop.f32.mrb[50].mxu0  ;;  %v575_v17 = vpop.f32.mrb[50].mxu1 }
 0x140   :  { %v681_v18 = vadd.f32 %v1415_v34, %v617_v11  ;;  %938 = vst.msk [vmem:[%s1763_s4 + $0x1a8] sm:$0xff] %vm234_vm1, %v881_v15  ;;  %v618_v19 = vmul.f32 %v1410_v32, %v455_v16  ;;  %v1094_v20 = vpop.f32.mrb[51].mxu0  ;;  %v711_v21 = vadd.f32 %v1415_v34, %v647_v13  ;;  %v648_v22 = vmul.f32 %v1410_v32, %v575_v17  ;;  %v1154_v23 = vpop.f32.mrb[51].mxu1 }
 0x142   :  { %vm738_vm5 = vcmp.ge.f32.partialorder %v681_v18, 0.0  ;;  %v795_v24 = vmul.f32 0.01, %v681_v18  ;;  %v682_v25 = vadd.f32 %v1415_v34, %v618_v19  ;;  %vm768_vm6 = vcmp.ge.f32.partialorder %v711_v21, 0.0 }
 0x143   :  { %v825_v26 = vmul.f32 0.01, %v711_v21  ;;  %v712_v27 = vadd.f32 %v1415_v34, %v648_v22 }
 0x144   :  { %v852_v28 = vsel %vm738_vm5, %v681_v18, %v795_v24  ;;  %vm739_vm7 = vcmp.ge.f32.partialorder %v682_v25, 0.0  ;;  %v796_v29 = vmul.f32 0.01, %v682_v25 }
 0x145   :  { %909 = vst.msk [vmem:[%s1763_s4 + $0xc0] sm:$0xff] %vm234_vm1, %v852_v28  ;;  %v882_v30 = vsel %vm768_vm6, %v711_v21, %v825_v26  ;;  %v460_v31 = vpop.f32.mrb[52].mxu0  ;;  %vm769_vm8 = vcmp.ge.f32.partialorder %v712_v27, 0.0  ;;  %v826_v33 = vmul.f32 0.01, %v712_v27  ;;  %v580_v35 = vpop.f32.mrb[52].mxu1 }
 0x146   :  { %v853_v36 = vsel %vm739_vm7, %v682_v25, %v796_v29  ;;  %939 = vst.msk [vmem:[%s1763_s4 + $0x1b0] sm:$0xff] %vm234_vm1, %v882_v30  ;;  %v619_v37 = vmul.f32 %v1410_v32, %v460_v31  ;;  %v1097_v38 = vpop.f32.mrb[53].mxu0  ;;  %v649_v39 = vmul.f32 %v1410_v32, %v580_v35  ;;  %v1157_v40 = vpop.f32.mrb[53].mxu1 }
 0x147   :  { %910 = vst.msk [vmem:[%s1763_s4 + $0xc8] sm:$0xff] %vm234_vm1, %v853_v36  ;;  %v883_v41 = vsel %vm769_vm8, %v712_v27, %v826_v33  ;;  %v463_v42 = vpop.f32.mrb[54].mxu0  ;;  %v583_v43 = vpop.f32.mrb[54].mxu1 }
 0x148   :  { %v683_v44 = vadd.f32 %v1415_v34, %v619_v37  ;;  %940 = vst.msk [vmem:[%s1763_s4 + $0x1b8] sm:$0xff] %vm234_vm1, %v883_v41  ;;  %v620_v45 = vmul.f32 %v1410_v32, %v463_v42  ;;  %v1098_v46 = vpop.f32.mrb[55].mxu0  ;;  %v713_v47 = vadd.f32 %v1415_v34, %v649_v39  ;;  %v1158_v48 = vpop.f32.mrb[55].mxu1 }
 0x14a   :  { %vm740_vm9 = vcmp.ge.f32.partialorder %v683_v44, 0.0  ;;  %v797_v49 = vmul.f32 0.01, %v683_v44  ;;  %v684_v50 = vadd.f32 %v1415_v34, %v620_v45  ;;  %vm770_vm10 = vcmp.ge.f32.partialorder %v713_v47, 0.0 }
 0x14b   :  { %v827_v51 = vmul.f32 0.01, %v713_v47 }
 0x14c   :  { %v854_v52 = vsel %vm740_vm9, %v683_v44, %v797_v49  ;;  %vm741_vm11 = vcmp.ge.f32.partialorder %v684_v50, 0.0  ;;  %v798_v53 = vmul.f32 0.01, %v684_v50 }
 0x14d   :  { %911 = vst.msk [vmem:[%s1763_s4 + $0xd0] sm:$0xff] %vm234_vm1, %v854_v52  ;;  %v884_v54 = vsel %vm770_vm10, %v713_v47, %v827_v51  ;;  %v468_v55 = vpop.f32.mrb[56].mxu0 }
 0x14e   :  { %v855_v56 = vsel %vm741_vm11, %v684_v50, %v798_v53  ;;  %941 = vst.msk [vmem:[%s1763_s4 + $0x1c0] sm:$0xff] %vm234_vm1, %v884_v54  ;;  %v621_v57 = vmul.f32 %v1410_v32, %v468_v55  ;;  %v1101_v58 = vpop.f32.mrb[57].mxu0 }
 0x14f   :  { %912 = vst.msk [vmem:[%s1763_s4 + $0xd8] sm:$0xff] %vm234_vm1, %v855_v56  ;;  %v471_v59 = vpop.f32.mrb[58].mxu0 }
 0x150   :  { %v685_v60 = vadd.f32 %v1415_v34, %v621_v57  ;;  %v622_v61 = vmul.f32 %v1410_v32, %v471_v59  ;;  %v1102_v62 = vpop.f32.mrb[59].mxu0 }
 0x152   :  { %vm742_vm12 = vcmp.ge.f32.partialorder %v685_v60, 0.0  ;;  %v799_v63 = vmul.f32 0.01, %v685_v60  ;;  %v686_v0 = vadd.f32 %v1415_v34, %v622_v61 }
 0x154   :  { %v856_v1 = vsel %vm742_vm12, %v685_v60, %v799_v63  ;;  %vm743_vm13 = vcmp.ge.f32.partialorder %v686_v0, 0.0  ;;  %v800_v2 = vmul.f32 0.01, %v686_v0 }
 0x155   :  { %913 = vst.msk [vmem:[%s1763_s4 + $0xe0] sm:$0xff] %vm234_vm1, %v856_v1 }
 0x156   :  { %v857_v3 = vsel %vm743_vm13, %v686_v0, %v800_v2 }
 0x157   :  { %914 = vst.msk [vmem:[%s1763_s4 + $0xe8] sm:$0xff] %vm234_vm1, %v857_v3 }

</bundles_post_ra>
